<compile_context>
chip_gen: v5e
topology: v5e:2x2
jax: 0.10.0
libtpu: 0.0.40
codegen_flags: <defaults>
</compile_context>

<pallas_src>
import functools

import jax
import jax.numpy as jnp
from jax.experimental import pallas as pl
from jax.experimental.pallas import tpu as pltpu

_BN_EPS = 1e-5


# ----------------------------------------------------------------------------
# Pallas kernel: K-accumulated GEMM + BatchNorm(batch stats) + residual + ReLU
# Grid = (Cout_tiles, K_tiles); finalize epilogue on the last K step.
# ----------------------------------------------------------------------------
def _gemm_bn_kernel(*refs, apply_relu: bool, add_residual: bool):
    if add_residual:
        x_ref, w_ref, g_ref, b_ref, r_ref, o_ref, acc_ref = refs
    else:
        x_ref, w_ref, g_ref, b_ref, o_ref, acc_ref = refs

    k = pl.program_id(1)

    @pl.when(k == 0)
    def _init():
        acc_ref[...] = jnp.zeros_like(acc_ref)

    # Hot path: bf16 x bf16 -> f32 on the MXU, accumulated in VMEM scratch.
    acc_ref[...] += jnp.dot(
        x_ref[...], w_ref[...], preferred_element_type=jnp.float32
    )

    @pl.when(k == pl.num_programs(1) - 1)
    def _finalize():
        acc = acc_ref[...]
        # BatchNorm over the rows axis == (N, H, W) of the conv output.
        # M is never tiled, so this is the exact batch statistic.
        mean = jnp.mean(acc, axis=0, keepdims=True)
        ctr = acc - mean
        var = jnp.mean(ctr * ctr, axis=0, keepdims=True)       # biased variance
        y = ctr * jax.lax.rsqrt(var + _BN_EPS)                  # EUP rsqrt
        y = y * g_ref[...] + b_ref[...]
        if add_residual:
            y = y + r_ref[...]
        if apply_relu:
            y = jnp.maximum(y, 0.0)
        o_ref[...] = y.astype(o_ref.dtype)


def _pick_tile(dim, target, quantum=128):
    """Largest multiple of `quantum` that divides `dim` and is <= target."""
    best = None
    t = quantum
    while t <= min(dim, target):
        if dim % t == 0:
            best = t
        t += quantum
    return best if best is not None else dim


def gemm_bn(x2d, w, gamma, beta, residual=None, relu=True):
    """x2d: (M, K), w: (K, Cout), gamma/beta: (Cout,), residual: (M, Cout)."""
    M, K = x2d.shape
    Kw, Cout = w.shape
    assert K == Kw

    # bf16 on the MXU (halves DMA bytes); epilogue stays f32.
    x_bf = x2d.astype(jnp.bfloat16)
    w_bf = w.astype(jnp.bfloat16)
    g2 = gamma.reshape(1, Cout).astype(jnp.float32)
    b2 = beta.reshape(1, Cout).astype(jnp.float32)

    tn = _pick_tile(Cout, 256)   # lane-dense output tiles (2x256 MXU on v6e/v7x)
    tk = _pick_tile(K, 512)
    grid = (Cout // tn, K // tk)

    in_specs = [
        pl.BlockSpec((M, tk), lambda j, k: (0, k)),      # activations
        pl.BlockSpec((tk, tn), lambda j, k: (k, j)),     # weights
        pl.BlockSpec((1, tn), lambda j, k: (0, j)),      # gamma
        pl.BlockSpec((1, tn), lambda j, k: (0, j)),      # beta
    ]
    inputs = [x_bf, w_bf, g2, b2]
    if residual is not None:
        in_specs.append(pl.BlockSpec((M, tn), lambda j, k: (0, j)))
        inputs.append(residual.astype(jnp.float32))

    kernel = functools.partial(
        _gemm_bn_kernel, apply_relu=relu, add_residual=residual is not None
    )

    return pl.pallas_call(
        kernel,
        out_shape=jax.ShapeDtypeStruct((M, Cout), jnp.float32),
        grid_spec=pltpu.PrefetchScalarGridSpec(
            num_scalar_prefetch=0,
            grid=grid,
            in_specs=in_specs,
            out_specs=pl.BlockSpec((M, tn), lambda j, k: (0, j)),
            scratch_shapes=[pltpu.VMEM((M, tn), jnp.float32)],
        ),
        compiler_params=pltpu.CompilerParams(
            # Cout tiles are independent -> megacore on v7x; K is the reduction.
            dimension_semantics=("parallel", "arbitrary"),
            vmem_limit_bytes=48 * 1024 * 1024,   # headroom under v7x 64 MiB
        ),
    )(*inputs)


# ----------------------------------------------------------------------------
# Glue: im2col for the 3x3 convs (plain JAX, pure data movement)
# TODO(synk): fuse im2col into the conv2 pallas_call (shifted-window DMA via
#             pl.ANY / make_async_copy) to avoid the 9x HBM expansion.
# ----------------------------------------------------------------------------
def _im2col_3x3(x_nhwc, stride):
    n, h, w, c = x_nhwc.shape
    xp = jnp.pad(x_nhwc, ((0, 0), (1, 1), (1, 1), (0, 0)))
    ho = (h + 2 - 3) // stride + 1
    wo = (w + 2 - 3) // stride + 1
    patches = []
    for dh in range(3):
        for dw in range(3):
            patches.append(
                xp[:, dh:dh + ho * stride:stride, dw:dw + wo * stride:stride, :]
            )
    cols = jnp.concatenate(patches, axis=-1)          # (N, Ho, Wo, 9*C)
    return cols.reshape(n * ho * wo, 9 * c), (n, ho, wo)


# ----------------------------------------------------------------------------
# Bottleneck block + Res_5 forward
# TODO(synk): fuse conv1 -> conv2 -> conv3 of one bottleneck into a single
#             pallas_call to cut launch overhead and the inter-conv HBM trips.
# ----------------------------------------------------------------------------
def bottleneck(x_nhwc, p, stride, has_downsample):
    n, h, w, c = x_nhwc.shape

    # conv1: 1x1 -> BN -> ReLU
    h1 = gemm_bn(x_nhwc.reshape(n * h * w, c), p["w1"], p["g1"], p["b1"], relu=True)
    mid = p["w1"].shape[1]
    h1 = h1.reshape(n, h, w, mid)

    # conv2: 3x3 (stride) -> BN -> ReLU
    cols, (_, ho, wo) = _im2col_3x3(h1, stride)
    h2 = gemm_bn(cols, p["w2"], p["g2"], p["b2"], relu=True)   # (N*Ho*Wo, mid)

    # residual branch
    if has_downsample:
        # TODO(synk): feed the stride-2 sampling via a strided BlockSpec/DMA
        #             instead of materializing this XLA gather slice.
        xs = x_nhwc[:, ::stride, ::stride, :]        # 1x1 stride-s conv sampling
        ident = gemm_bn(
            xs.reshape(n * ho * wo, c), p["wd"], p["gd"], p["bd"], relu=False
        )
    else:
        ident = x_nhwc.reshape(n * ho * wo, c)

    # conv3: 1x1 -> BN, then +identity, then ReLU (all fused in one kernel)
    out_c = p["w3"].shape[1]
    out = gemm_bn(h2, p["w3"], p["g3"], p["b3"], residual=ident, relu=True)
    return out.reshape(n, ho, wo, out_c)


def res_5_forward(x_nchw, params):
    """x_nchw: (N, C_in, H, W) float32 -> (N, C_out, H/2, W/2) float32."""
    x = jnp.transpose(x_nchw, (0, 2, 3, 1))                    # NCHW -> NHWC
    x = bottleneck(x, params[0], stride=2, has_downsample=True)
    x = bottleneck(x, params[1], stride=1, has_downsample=False)
    x = bottleneck(x, params[2], stride=1, has_downsample=False)
    return jnp.transpose(x, (0, 3, 1, 2))                      # NHWC -> NCHW


# ----------------------------------------------------------------------------
# Deterministic parameter construction (kaiming_normal fan_out / relu; BN: 1, 0)
# ----------------------------------------------------------------------------
def _kaiming(key, k_in, c_out, ksize):
    # std = sqrt(2 / fan_out), fan_out = c_out * k * k  (mode='fan_out', relu)
    std = (2.0 / (c_out * ksize * ksize)) ** 0.5
    return std * jax.random.normal(key, (k_in, c_out), dtype=jnp.float32)


def make_params(key, c_in, mid, expansion=4):
    c_out = mid * expansion
    params = []
    in_c = c_in
    for blk in range(3):
        key, k1, k2, k3, kd = jax.random.split(key, 5)
        p = {
            "w1": _kaiming(k1, in_c, mid, 1),
            "g1": jnp.ones((mid,), jnp.float32),
            "b1": jnp.zeros((mid,), jnp.float32),
            "w2": _kaiming(k2, 9 * mid, mid, 3),
            "g2": jnp.ones((mid,), jnp.float32),
            "b2": jnp.zeros((mid,), jnp.float32),
            "w3": _kaiming(k3, mid, c_out, 1),
            "g3": jnp.ones((c_out,), jnp.float32),
            "b3": jnp.zeros((c_out,), jnp.float32),
        }
        if blk == 0:
            p["wd"] = _kaiming(kd, in_c, c_out, 1)
            p["gd"] = jnp.ones((c_out,), jnp.float32)
            p["bd"] = jnp.zeros((c_out,), jnp.float32)
        params.append(p)
        in_c = c_out
    return params


if __name__ == "__main__":
    # Scaled-down Res_5: original is in=1024, mid=512, out=2048; here
    # in=256, mid=128, out=512 (same structure: 3 bottlenecks, stride 2).
    # mid=128 keeps every GEMM output lane-dense (multiples of 128).
    N, C_IN, H, W = 2, 256, 8, 8
    MID = 128

    key = jax.random.PRNGKey(0)
    key, kx = jax.random.split(key)
    x = jax.random.normal(kx, (N, C_IN, H, W), dtype=jnp.float32)   # NCHW input

    params = make_params(key, C_IN, MID)

    out = jax.jit(res_5_forward)(x, params)
    out = jax.block_until_ready(out)

    assert out.shape == (N, MID * 4, H // 2, W // 2), out.shape
    assert out.dtype == jnp.float32
    print("KERNEL_OK")
</pallas_src>

<mosaic_0001>
module attributes {stable_mosaic.version = 11 : i64} {
  func.func @_gemm_bn_kernel(%arg0: i32, %arg1: i32, %arg2: memref<128x256xbf16, #tpu.memory_space<vmem>>, %arg3: memref<256x128xbf16, #tpu.memory_space<vmem>>, %arg4: memref<1x128xf32, #tpu.memory_space<vmem>>, %arg5: memref<1x128xf32, #tpu.memory_space<vmem>>, %arg6: memref<128x128xf32, #tpu.memory_space<vmem>>, %arg7: memref<128x128xf32, #tpu.memory_space<vmem>>) attributes {dimension_semantics = [#tpu.dimension_semantics<parallel>, #tpu.dimension_semantics<arbitrary>], iteration_bounds = array<i64: 1, 1>, scalar_prefetch = 0 : i64, scratch_operands = 1 : i64, tpu.core_type = #tpu.core_type<tc>, window_params = [{transform_indices = @transform_0, window_bounds = array<i64: 128, 256>}, {transform_indices = @transform_1, window_bounds = array<i64: 256, 128>}, {transform_indices = @transform_2, window_bounds = array<i64: 1, 128>}, {transform_indices = @transform_3, window_bounds = array<i64: 1, 128>}, {transform_indices = @transform_4, window_bounds = array<i64: 128, 128>}]} {
    %c0_i32 = arith.constant 0 : i32
    %0 = arith.cmpi eq, %arg1, %c0_i32 : i32
    %1 = arith.extui %0 : i1 to i32
    %c0_i32_0 = arith.constant 0 : i32
    %2 = arith.cmpi ne, %1, %c0_i32_0 : i32
    scf.if %2 {
      %cst_10 = arith.constant 0.000000e+00 : f32
      %12 = vector.broadcast %cst_10 : f32 to vector<128x128xf32>
      %c0_11 = arith.constant 0 : index
      %c0_12 = arith.constant 0 : index
      %13 = vector.load %arg7[%c0_11, %c0_12] : memref<128x128xf32, #tpu.memory_space<vmem>>, vector<128x128xf32>
      tpu.vector_store %arg7[%c0_11, %c0_12], %12 {strides = array<i32>} : memref<128x128xf32, #tpu.memory_space<vmem>>, vector<128x128xf32>,
    } else {
    }
    %c0 = arith.constant 0 : index
    %c0_1 = arith.constant 0 : index
    %3 = vector.load %arg7[%c0, %c0_1] : memref<128x128xf32, #tpu.memory_space<vmem>>, vector<128x128xf32>
    %c0_2 = arith.constant 0 : index
    %c0_3 = arith.constant 0 : index
    %4 = vector.load %arg2[%c0_2, %c0_3] : memref<128x256xbf16, #tpu.memory_space<vmem>>, vector<128x256xbf16>
    %c0_4 = arith.constant 0 : index
    %c0_5 = arith.constant 0 : index
    %5 = vector.load %arg3[%c0_4, %c0_5] : memref<256x128xbf16, #tpu.memory_space<vmem>>, vector<256x128xbf16>
    %cst = arith.constant dense<0.000000e+00> : vector<128x128xf32>
    %6 = tpu.matmul %4, %5, %cst {dimension_numbers = #tpu.dot_dimension_numbers<[1], [0], [0], [1], [0, 0, 1, 1], [], []>} : vector<128x256xbf16>, vector<256x128xbf16>, vector<128x128xf32> -> vector<128x128xf32>
    %7 = arith.addf %3, %6 : vector<128x128xf32>
    %c0_6 = arith.constant 0 : index
    %c0_7 = arith.constant 0 : index
    %8 = vector.load %arg7[%c0_6, %c0_7] : memref<128x128xf32, #tpu.memory_space<vmem>>, vector<128x128xf32>
    tpu.vector_store %arg7[%c0_6, %c0_7], %7 {strides = array<i32>} : memref<128x128xf32, #tpu.memory_space<vmem>>, vector<128x128xf32>,
    %c0_i32_8 = arith.constant 0 : i32
    %9 = arith.cmpi eq, %arg1, %c0_i32_8 : i32
    %10 = arith.extui %9 : i1 to i32
    %c0_i32_9 = arith.constant 0 : i32
    %11 = arith.cmpi ne, %10, %c0_i32_9 : i32
    scf.if %11 {
      %c0_10 = arith.constant 0 : index
      %c0_11 = arith.constant 0 : index
      %12 = vector.load %arg7[%c0_10, %c0_11] : memref<128x128xf32, #tpu.memory_space<vmem>>, vector<128x128xf32>
      %cst_12 = arith.constant dense<0.000000e+00> : vector<128xf32>
      %13 = vector.multi_reduction <add>, %12, %cst_12 [0] : vector<128x128xf32> to vector<128xf32>
      %14 = vector.shape_cast %13 : vector<128xf32> to vector<1x128xf32>
      %cst_13 = arith.constant 1.280000e+02 : f32
      %15 = vector.broadcast %cst_13 : f32 to vector<1x128xf32>
      %16 = arith.divf %14, %15 : vector<1x128xf32>
      %17 = vector.broadcast %16 : vector<1x128xf32> to vector<128x128xf32>
      %18 = arith.subf %12, %17 : vector<128x128xf32>
      %19 = arith.mulf %18, %18 : vector<128x128xf32>
      %cst_14 = arith.constant dense<0.000000e+00> : vector<128xf32>
      %20 = vector.multi_reduction <add>, %19, %cst_14 [0] : vector<128x128xf32> to vector<128xf32>
      %21 = vector.shape_cast %20 : vector<128xf32> to vector<1x128xf32>
      %cst_15 = arith.constant 1.280000e+02 : f32
      %22 = vector.broadcast %cst_15 : f32 to vector<1x128xf32>
      %23 = arith.divf %21, %22 : vector<1x128xf32>
      %cst_16 = arith.constant 9.99999974E-6 : f32
      %24 = vector.broadcast %cst_16 : f32 to vector<1x128xf32>
      %25 = arith.addf %23, %24 : vector<1x128xf32>
      %26 = math.rsqrt %25 : vector<1x128xf32>
      %27 = vector.broadcast %26 : vector<1x128xf32> to vector<128x128xf32>
      %28 = arith.mulf %18, %27 : vector<128x128xf32>
      %c0_17 = arith.constant 0 : index
      %c0_18 = arith.constant 0 : index
      %29 = vector.load %arg4[%c0_17, %c0_18] : memref<1x128xf32, #tpu.memory_space<vmem>>, vector<1x128xf32>
      %30 = vector.broadcast %29 : vector<1x128xf32> to vector<128x128xf32>
      %31 = arith.mulf %28, %30 : vector<128x128xf32>
      %c0_19 = arith.constant 0 : index
      %c0_20 = arith.constant 0 : index
      %32 = vector.load %arg5[%c0_19, %c0_20] : memref<1x128xf32, #tpu.memory_space<vmem>>, vector<1x128xf32>
      %33 = vector.broadcast %32 : vector<1x128xf32> to vector<128x128xf32>
      %34 = arith.addf %31, %33 : vector<128x128xf32>
      %cst_21 = arith.constant 0.000000e+00 : f32
      %35 = vector.broadcast %cst_21 : f32 to vector<128x128xf32>
      %36 = arith.maximumf %34, %35 : vector<128x128xf32>
      %c0_22 = arith.constant 0 : index
      %c0_23 = arith.constant 0 : index
      %37 = vector.load %arg6[%c0_22, %c0_23] : memref<128x128xf32, #tpu.memory_space<vmem>>, vector<128x128xf32>
      tpu.vector_store %arg6[%c0_22, %c0_23], %36 {strides = array<i32>} : memref<128x128xf32, #tpu.memory_space<vmem>>, vector<128x128xf32>,
    } else {
    }
    return
  }
  func.func @transform_0(%arg0: i32, %arg1: i32) -> (i32, i32) {
    %c0_i32 = arith.constant 0 : i32
    %c0_i32_0 = arith.constant 0 : i32
    return %c0_i32, %arg1 : i32, i32
  }
  func.func @transform_1(%arg0: i32, %arg1: i32) -> (i32, i32) {
    %c0_i32 = arith.constant 0 : i32
    return %arg1, %arg0 : i32, i32
  }
  func.func @transform_2(%arg0: i32, %arg1: i32) -> (i32, i32) {
    %c0_i32 = arith.constant 0 : i32
    %c0_i32_0 = arith.constant 0 : i32
    return %c0_i32, %arg0 : i32, i32
  }
  func.func @transform_3(%arg0: i32, %arg1: i32) -> (i32, i32) {
    %c0_i32 = arith.constant 0 : i32
    %c0_i32_0 = arith.constant 0 : i32
    return %c0_i32, %arg0 : i32, i32
  }
  func.func @transform_4(%arg0: i32, %arg1: i32) -> (i32, i32) {
    %c0_i32 = arith.constant 0 : i32
    %c0_i32_0 = arith.constant 0 : i32
    return %c0_i32, %arg0 : i32, i32
  }
}

module attributes {stable_mosaic.version = 11 : i64} {
  func.func @_gemm_bn_kernel(%arg0: i32, %arg1: i32, %arg2: memref<32x384xbf16, #tpu.memory_space<vmem>>, %arg3: memref<384x128xbf16, #tpu.memory_space<vmem>>, %arg4: memref<1x128xf32, #tpu.memory_space<vmem>>, %arg5: memref<1x128xf32, #tpu.memory_space<vmem>>, %arg6: memref<32x128xf32, #tpu.memory_space<vmem>>, %arg7: memref<32x128xf32, #tpu.memory_space<vmem>>) attributes {dimension_semantics = [#tpu.dimension_semantics<parallel>, #tpu.dimension_semantics<arbitrary>], iteration_bounds = array<i64: 1, 3>, scalar_prefetch = 0 : i64, scratch_operands = 1 : i64, tpu.core_type = #tpu.core_type<tc>, window_params = [{transform_indices = @transform_0, window_bounds = array<i64: 32, 384>}, {transform_indices = @transform_1, window_bounds = array<i64: 384, 128>}, {transform_indices = @transform_2, window_bounds = array<i64: 1, 128>}, {transform_indices = @transform_3, window_bounds = array<i64: 1, 128>}, {transform_indices = @transform_4, window_bounds = array<i64: 32, 128>}]} {
    %c0_i32 = arith.constant 0 : i32
    %0 = arith.cmpi eq, %arg1, %c0_i32 : i32
    %1 = arith.extui %0 : i1 to i32
    %c0_i32_0 = arith.constant 0 : i32
    %2 = arith.cmpi ne, %1, %c0_i32_0 : i32
    scf.if %2 {
      %cst_9 = arith.constant 0.000000e+00 : f32
      %12 = vector.broadcast %cst_9 : f32 to vector<32x128xf32>
      %c0_10 = arith.constant 0 : index
      %c0_11 = arith.constant 0 : index
      %13 = vector.load %arg7[%c0_10, %c0_11] : memref<32x128xf32, #tpu.memory_space<vmem>>, vector<32x128xf32>
      tpu.vector_store %arg7[%c0_10, %c0_11], %12 {strides = array<i32>} : memref<32x128xf32, #tpu.memory_space<vmem>>, vector<32x128xf32>,
    } else {
    }
    %c0 = arith.constant 0 : index
    %c0_1 = arith.constant 0 : index
    %3 = vector.load %arg7[%c0, %c0_1] : memref<32x128xf32, #tpu.memory_space<vmem>>, vector<32x128xf32>
    %c0_2 = arith.constant 0 : index
    %c0_3 = arith.constant 0 : index
    %4 = vector.load %arg2[%c0_2, %c0_3] : memref<32x384xbf16, #tpu.memory_space<vmem>>, vector<32x384xbf16>
    %c0_4 = arith.constant 0 : index
    %c0_5 = arith.constant 0 : index
    %5 = vector.load %arg3[%c0_4, %c0_5] : memref<384x128xbf16, #tpu.memory_space<vmem>>, vector<384x128xbf16>
    %cst = arith.constant dense<0.000000e+00> : vector<32x128xf32>
    %6 = tpu.matmul %4, %5, %cst {dimension_numbers = #tpu.dot_dimension_numbers<[1], [0], [0], [1], [0, 0, 1, 1], [], []>} : vector<32x384xbf16>, vector<384x128xbf16>, vector<32x128xf32> -> vector<32x128xf32>
    %7 = arith.addf %3, %6 : vector<32x128xf32>
    %c0_6 = arith.constant 0 : index
    %c0_7 = arith.constant 0 : index
    %8 = vector.load %arg7[%c0_6, %c0_7] : memref<32x128xf32, #tpu.memory_space<vmem>>, vector<32x128xf32>
    tpu.vector_store %arg7[%c0_6, %c0_7], %7 {strides = array<i32>} : memref<32x128xf32, #tpu.memory_space<vmem>>, vector<32x128xf32>,
    %c2_i32 = arith.constant 2 : i32
    %9 = arith.cmpi eq, %arg1, %c2_i32 : i32
    %10 = arith.extui %9 : i1 to i32
    %c0_i32_8 = arith.constant 0 : i32
    %11 = arith.cmpi ne, %10, %c0_i32_8 : i32
    scf.if %11 {
      %c0_9 = arith.constant 0 : index
      %c0_10 = arith.constant 0 : index
      %12 = vector.load %arg7[%c0_9, %c0_10] : memref<32x128xf32, #tpu.memory_space<vmem>>, vector<32x128xf32>
      %cst_11 = arith.constant dense<0.000000e+00> : vector<128xf32>
      %13 = vector.multi_reduction <add>, %12, %cst_11 [0] : vector<32x128xf32> to vector<128xf32>
      %14 = vector.shape_cast %13 : vector<128xf32> to vector<1x128xf32>
      %cst_12 = arith.constant 3.200000e+01 : f32
      %15 = vector.broadcast %cst_12 : f32 to vector<1x128xf32>
      %16 = arith.divf %14, %15 : vector<1x128xf32>
      %17 = vector.broadcast %16 : vector<1x128xf32> to vector<32x128xf32>
      %18 = arith.subf %12, %17 : vector<32x128xf32>
      %19 = arith.mulf %18, %18 : vector<32x128xf32>
      %cst_13 = arith.constant dense<0.000000e+00> : vector<128xf32>
      %20 = vector.multi_reduction <add>, %19, %cst_13 [0] : vector<32x128xf32> to vector<128xf32>
      %21 = vector.shape_cast %20 : vector<128xf32> to vector<1x128xf32>
      %cst_14 = arith.constant 3.200000e+01 : f32
      %22 = vector.broadcast %cst_14 : f32 to vector<1x128xf32>
      %23 = arith.divf %21, %22 : vector<1x128xf32>
      %cst_15 = arith.constant 9.99999974E-6 : f32
      %24 = vector.broadcast %cst_15 : f32 to vector<1x128xf32>
      %25 = arith.addf %23, %24 : vector<1x128xf32>
      %26 = math.rsqrt %25 : vector<1x128xf32>
      %27 = vector.broadcast %26 : vector<1x128xf32> to vector<32x128xf32>
      %28 = arith.mulf %18, %27 : vector<32x128xf32>
      %c0_16 = arith.constant 0 : index
      %c0_17 = arith.constant 0 : index
      %29 = vector.load %arg4[%c0_16, %c0_17] : memref<1x128xf32, #tpu.memory_space<vmem>>, vector<1x128xf32>
      %30 = vector.broadcast %29 : vector<1x128xf32> to vector<32x128xf32>
      %31 = arith.mulf %28, %30 : vector<32x128xf32>
      %c0_18 = arith.constant 0 : index
      %c0_19 = arith.constant 0 : index
      %32 = vector.load %arg5[%c0_18, %c0_19] : memref<1x128xf32, #tpu.memory_space<vmem>>, vector<1x128xf32>
      %33 = vector.broadcast %32 : vector<1x128xf32> to vector<32x128xf32>
      %34 = arith.addf %31, %33 : vector<32x128xf32>
      %cst_20 = arith.constant 0.000000e+00 : f32
      %35 = vector.broadcast %cst_20 : f32 to vector<32x128xf32>
      %36 = arith.maximumf %34, %35 : vector<32x128xf32>
      %c0_21 = arith.constant 0 : index
      %c0_22 = arith.constant 0 : index
      %37 = vector.load %arg6[%c0_21, %c0_22] : memref<32x128xf32, #tpu.memory_space<vmem>>, vector<32x128xf32>
      tpu.vector_store %arg6[%c0_21, %c0_22], %36 {strides = array<i32>} : memref<32x128xf32, #tpu.memory_space<vmem>>, vector<32x128xf32>,
    } else {
    }
    return
  }
  func.func @transform_0(%arg0: i32, %arg1: i32) -> (i32, i32) {
    %c0_i32 = arith.constant 0 : i32
    %c0_i32_0 = arith.constant 0 : i32
    return %c0_i32, %arg1 : i32, i32
  }
  func.func @transform_1(%arg0: i32, %arg1: i32) -> (i32, i32) {
    %c0_i32 = arith.constant 0 : i32
    return %arg1, %arg0 : i32, i32
  }
  func.func @transform_2(%arg0: i32, %arg1: i32) -> (i32, i32) {
    %c0_i32 = arith.constant 0 : i32
    %c0_i32_0 = arith.constant 0 : i32
    return %c0_i32, %arg0 : i32, i32
  }
  func.func @transform_3(%arg0: i32, %arg1: i32) -> (i32, i32) {
    %c0_i32 = arith.constant 0 : i32
    %c0_i32_0 = arith.constant 0 : i32
    return %c0_i32, %arg0 : i32, i32
  }
  func.func @transform_4(%arg0: i32, %arg1: i32) -> (i32, i32) {
    %c0_i32 = arith.constant 0 : i32
    %c0_i32_0 = arith.constant 0 : i32
    return %c0_i32, %arg0 : i32, i32
  }
}

module attributes {stable_mosaic.version = 11 : i64} {
  func.func @_gemm_bn_kernel(%arg0: i32, %arg1: i32, %arg2: memref<32x128xbf16, #tpu.memory_space<vmem>>, %arg3: memref<128x256xbf16, #tpu.memory_space<vmem>>, %arg4: memref<1x256xf32, #tpu.memory_space<vmem>>, %arg5: memref<1x256xf32, #tpu.memory_space<vmem>>, %arg6: memref<32x256xf32, #tpu.memory_space<vmem>>, %arg7: memref<32x256xf32, #tpu.memory_space<vmem>>, %arg8: memref<32x256xf32, #tpu.memory_space<vmem>>) attributes {dimension_semantics = [#tpu.dimension_semantics<parallel>, #tpu.dimension_semantics<arbitrary>], iteration_bounds = array<i64: 2, 1>, scalar_prefetch = 0 : i64, scratch_operands = 1 : i64, tpu.core_type = #tpu.core_type<tc>, window_params = [{transform_indices = @transform_0, window_bounds = array<i64: 32, 128>}, {transform_indices = @transform_1, window_bounds = array<i64: 128, 256>}, {transform_indices = @transform_2, window_bounds = array<i64: 1, 256>}, {transform_indices = @transform_3, window_bounds = array<i64: 1, 256>}, {transform_indices = @transform_4, window_bounds = array<i64: 32, 256>}, {transform_indices = @transform_5, window_bounds = array<i64: 32, 256>}]} {
    %c0_i32 = arith.constant 0 : i32
    %0 = arith.cmpi eq, %arg1, %c0_i32 : i32
    %1 = arith.extui %0 : i1 to i32
    %c0_i32_0 = arith.constant 0 : i32
    %2 = arith.cmpi ne, %1, %c0_i32_0 : i32
    scf.if %2 {
      %cst_10 = arith.constant 0.000000e+00 : f32
      %12 = vector.broadcast %cst_10 : f32 to vector<32x256xf32>
      %c0_11 = arith.constant 0 : index
      %c0_12 = arith.constant 0 : index
      %13 = vector.load %arg8[%c0_11, %c0_12] : memref<32x256xf32, #tpu.memory_space<vmem>>, vector<32x256xf32>
      tpu.vector_store %arg8[%c0_11, %c0_12], %12 {strides = array<i32>} : memref<32x256xf32, #tpu.memory_space<vmem>>, vector<32x256xf32>,
    } else {
    }
    %c0 = arith.constant 0 : index
    %c0_1 = arith.constant 0 : index
    %3 = vector.load %arg8[%c0, %c0_1] : memref<32x256xf32, #tpu.memory_space<vmem>>, vector<32x256xf32>
    %c0_2 = arith.constant 0 : index
    %c0_3 = arith.constant 0 : index
    %4 = vector.load %arg2[%c0_2, %c0_3] : memref<32x128xbf16, #tpu.memory_space<vmem>>, vector<32x128xbf16>
    %c0_4 = arith.constant 0 : index
    %c0_5 = arith.constant 0 : index
    %5 = vector.load %arg3[%c0_4, %c0_5] : memref<128x256xbf16, #tpu.memory_space<vmem>>, vector<128x256xbf16>
    %cst = arith.constant dense<0.000000e+00> : vector<32x256xf32>
    %6 = tpu.matmul %4, %5, %cst {dimension_numbers = #tpu.dot_dimension_numbers<[1], [0], [0], [1], [0, 0, 1, 1], [], []>} : vector<32x128xbf16>, vector<128x256xbf16>, vector<32x256xf32> -> vector<32x256xf32>
    %7 = arith.addf %3, %6 : vector<32x256xf32>
    %c0_6 = arith.constant 0 : index
    %c0_7 = arith.constant 0 : index
    %8 = vector.load %arg8[%c0_6, %c0_7] : memref<32x256xf32, #tpu.memory_space<vmem>>, vector<32x256xf32>
    tpu.vector_store %arg8[%c0_6, %c0_7], %7 {strides = array<i32>} : memref<32x256xf32, #tpu.memory_space<vmem>>, vector<32x256xf32>,
    %c0_i32_8 = arith.constant 0 : i32
    %9 = arith.cmpi eq, %arg1, %c0_i32_8 : i32
    %10 = arith.extui %9 : i1 to i32
    %c0_i32_9 = arith.constant 0 : i32
    %11 = arith.cmpi ne, %10, %c0_i32_9 : i32
    scf.if %11 {
      %c0_10 = arith.constant 0 : index
      %c0_11 = arith.constant 0 : index
      %12 = vector.load %arg8[%c0_10, %c0_11] : memref<32x256xf32, #tpu.memory_space<vmem>>, vector<32x256xf32>
      %cst_12 = arith.constant dense<0.000000e+00> : vector<256xf32>
      %13 = vector.multi_reduction <add>, %12, %cst_12 [0] : vector<32x256xf32> to vector<256xf32>
      %14 = vector.shape_cast %13 : vector<256xf32> to vector<1x256xf32>
      %cst_13 = arith.constant 3.200000e+01 : f32
      %15 = vector.broadcast %cst_13 : f32 to vector<1x256xf32>
      %16 = arith.divf %14, %15 : vector<1x256xf32>
      %17 = vector.broadcast %16 : vector<1x256xf32> to vector<32x256xf32>
      %18 = arith.subf %12, %17 : vector<32x256xf32>
      %19 = arith.mulf %18, %18 : vector<32x256xf32>
      %cst_14 = arith.constant dense<0.000000e+00> : vector<256xf32>
      %20 = vector.multi_reduction <add>, %19, %cst_14 [0] : vector<32x256xf32> to vector<256xf32>
      %21 = vector.shape_cast %20 : vector<256xf32> to vector<1x256xf32>
      %cst_15 = arith.constant 3.200000e+01 : f32
      %22 = vector.broadcast %cst_15 : f32 to vector<1x256xf32>
      %23 = arith.divf %21, %22 : vector<1x256xf32>
      %cst_16 = arith.constant 9.99999974E-6 : f32
      %24 = vector.broadcast %cst_16 : f32 to vector<1x256xf32>
      %25 = arith.addf %23, %24 : vector<1x256xf32>
      %26 = math.rsqrt %25 : vector<1x256xf32>
      %27 = vector.broadcast %26 : vector<1x256xf32> to vector<32x256xf32>
      %28 = arith.mulf %18, %27 : vector<32x256xf32>
      %c0_17 = arith.constant 0 : index
      %c0_18 = arith.constant 0 : index
      %29 = vector.load %arg4[%c0_17, %c0_18] : memref<1x256xf32, #tpu.memory_space<vmem>>, vector<1x256xf32>
      %30 = vector.broadcast %29 : vector<1x256xf32> to vector<32x256xf32>
      %31 = arith.mulf %28, %30 : vector<32x256xf32>
      %c0_19 = arith.constant 0 : index
      %c0_20 = arith.constant 0 : index
      %32 = vector.load %arg5[%c0_19, %c0_20] : memref<1x256xf32, #tpu.memory_space<vmem>>, vector<1x256xf32>
      %33 = vector.broadcast %32 : vector<1x256xf32> to vector<32x256xf32>
      %34 = arith.addf %31, %33 : vector<32x256xf32>
      %c0_21 = arith.constant 0 : index
      %c0_22 = arith.constant 0 : index
      %35 = vector.load %arg6[%c0_21, %c0_22] : memref<32x256xf32, #tpu.memory_space<vmem>>, vector<32x256xf32>
      %36 = arith.addf %34, %35 : vector<32x256xf32>
      %cst_23 = arith.constant 0.000000e+00 : f32
      %37 = vector.broadcast %cst_23 : f32 to vector<32x256xf32>
      %38 = arith.maximumf %36, %37 : vector<32x256xf32>
      %c0_24 = arith.constant 0 : index
      %c0_25 = arith.constant 0 : index
      %39 = vector.load %arg7[%c0_24, %c0_25] : memref<32x256xf32, #tpu.memory_space<vmem>>, vector<32x256xf32>
      tpu.vector_store %arg7[%c0_24, %c0_25], %38 {strides = array<i32>} : memref<32x256xf32, #tpu.memory_space<vmem>>, vector<32x256xf32>,
    } else {
    }
    return
  }
  func.func @transform_0(%arg0: i32, %arg1: i32) -> (i32, i32) {
    %c0_i32 = arith.constant 0 : i32
    %c0_i32_0 = arith.constant 0 : i32
    return %c0_i32, %arg1 : i32, i32
  }
  func.func @transform_1(%arg0: i32, %arg1: i32) -> (i32, i32) {
    %c0_i32 = arith.constant 0 : i32
    return %arg1, %arg0 : i32, i32
  }
  func.func @transform_2(%arg0: i32, %arg1: i32) -> (i32, i32) {
    %c0_i32 = arith.constant 0 : i32
    %c0_i32_0 = arith.constant 0 : i32
    return %c0_i32, %arg0 : i32, i32
  }
  func.func @transform_3(%arg0: i32, %arg1: i32) -> (i32, i32) {
    %c0_i32 = arith.constant 0 : i32
    %c0_i32_0 = arith.constant 0 : i32
    return %c0_i32, %arg0 : i32, i32
  }
  func.func @transform_4(%arg0: i32, %arg1: i32) -> (i32, i32) {
    %c0_i32 = arith.constant 0 : i32
    %c0_i32_0 = arith.constant 0 : i32
    return %c0_i32, %arg0 : i32, i32
  }
  func.func @transform_5(%arg0: i32, %arg1: i32) -> (i32, i32) {
    %c0_i32 = arith.constant 0 : i32
    %c0_i32_0 = arith.constant 0 : i32
    return %c0_i32, %arg0 : i32, i32
  }
}

module attributes {stable_mosaic.version = 11 : i64} {
  func.func @_gemm_bn_kernel(%arg0: i32, %arg1: i32, %arg2: memref<32x256xbf16, #tpu.memory_space<vmem>>, %arg3: memref<256x256xbf16, #tpu.memory_space<vmem>>, %arg4: memref<1x256xf32, #tpu.memory_space<vmem>>, %arg5: memref<1x256xf32, #tpu.memory_space<vmem>>, %arg6: memref<32x256xf32, #tpu.memory_space<vmem>>, %arg7: memref<32x256xf32, #tpu.memory_space<vmem>>) attributes {dimension_semantics = [#tpu.dimension_semantics<parallel>, #tpu.dimension_semantics<arbitrary>], iteration_bounds = array<i64: 2, 1>, scalar_prefetch = 0 : i64, scratch_operands = 1 : i64, tpu.core_type = #tpu.core_type<tc>, window_params = [{transform_indices = @transform_0, window_bounds = array<i64: 32, 256>}, {transform_indices = @transform_1, window_bounds = array<i64: 256, 256>}, {transform_indices = @transform_2, window_bounds = array<i64: 1, 256>}, {transform_indices = @transform_3, window_bounds = array<i64: 1, 256>}, {transform_indices = @transform_4, window_bounds = array<i64: 32, 256>}]} {
    %c0_i32 = arith.constant 0 : i32
    %0 = arith.cmpi eq, %arg1, %c0_i32 : i32
    %1 = arith.extui %0 : i1 to i32
    %c0_i32_0 = arith.constant 0 : i32
    %2 = arith.cmpi ne, %1, %c0_i32_0 : i32
    scf.if %2 {
      %cst_10 = arith.constant 0.000000e+00 : f32
      %12 = vector.broadcast %cst_10 : f32 to vector<32x256xf32>
      %c0_11 = arith.constant 0 : index
      %c0_12 = arith.constant 0 : index
      %13 = vector.load %arg7[%c0_11, %c0_12] : memref<32x256xf32, #tpu.memory_space<vmem>>, vector<32x256xf32>
      tpu.vector_store %arg7[%c0_11, %c0_12], %12 {strides = array<i32>} : memref<32x256xf32, #tpu.memory_space<vmem>>, vector<32x256xf32>,
    } else {
    }
    %c0 = arith.constant 0 : index
    %c0_1 = arith.constant 0 : index
    %3 = vector.load %arg7[%c0, %c0_1] : memref<32x256xf32, #tpu.memory_space<vmem>>, vector<32x256xf32>
    %c0_2 = arith.constant 0 : index
    %c0_3 = arith.constant 0 : index
    %4 = vector.load %arg2[%c0_2, %c0_3] : memref<32x256xbf16, #tpu.memory_space<vmem>>, vector<32x256xbf16>
    %c0_4 = arith.constant 0 : index
    %c0_5 = arith.constant 0 : index
    %5 = vector.load %arg3[%c0_4, %c0_5] : memref<256x256xbf16, #tpu.memory_space<vmem>>, vector<256x256xbf16>
    %cst = arith.constant dense<0.000000e+00> : vector<32x256xf32>
    %6 = tpu.matmul %4, %5, %cst {dimension_numbers = #tpu.dot_dimension_numbers<[1], [0], [0], [1], [0, 0, 1, 1], [], []>} : vector<32x256xbf16>, vector<256x256xbf16>, vector<32x256xf32> -> vector<32x256xf32>
    %7 = arith.addf %3, %6 : vector<32x256xf32>
    %c0_6 = arith.constant 0 : index
    %c0_7 = arith.constant 0 : index
    %8 = vector.load %arg7[%c0_6, %c0_7] : memref<32x256xf32, #tpu.memory_space<vmem>>, vector<32x256xf32>
    tpu.vector_store %arg7[%c0_6, %c0_7], %7 {strides = array<i32>} : memref<32x256xf32, #tpu.memory_space<vmem>>, vector<32x256xf32>,
    %c0_i32_8 = arith.constant 0 : i32
    %9 = arith.cmpi eq, %arg1, %c0_i32_8 : i32
    %10 = arith.extui %9 : i1 to i32
    %c0_i32_9 = arith.constant 0 : i32
    %11 = arith.cmpi ne, %10, %c0_i32_9 : i32
    scf.if %11 {
      %c0_10 = arith.constant 0 : index
      %c0_11 = arith.constant 0 : index
      %12 = vector.load %arg7[%c0_10, %c0_11] : memref<32x256xf32, #tpu.memory_space<vmem>>, vector<32x256xf32>
      %cst_12 = arith.constant dense<0.000000e+00> : vector<256xf32>
      %13 = vector.multi_reduction <add>, %12, %cst_12 [0] : vector<32x256xf32> to vector<256xf32>
      %14 = vector.shape_cast %13 : vector<256xf32> to vector<1x256xf32>
      %cst_13 = arith.constant 3.200000e+01 : f32
      %15 = vector.broadcast %cst_13 : f32 to vector<1x256xf32>
      %16 = arith.divf %14, %15 : vector<1x256xf32>
      %17 = vector.broadcast %16 : vector<1x256xf32> to vector<32x256xf32>
      %18 = arith.subf %12, %17 : vector<32x256xf32>
      %19 = arith.mulf %18, %18 : vector<32x256xf32>
      %cst_14 = arith.constant dense<0.000000e+00> : vector<256xf32>
      %20 = vector.multi_reduction <add>, %19, %cst_14 [0] : vector<32x256xf32> to vector<256xf32>
      %21 = vector.shape_cast %20 : vector<256xf32> to vector<1x256xf32>
      %cst_15 = arith.constant 3.200000e+01 : f32
      %22 = vector.broadcast %cst_15 : f32 to vector<1x256xf32>
      %23 = arith.divf %21, %22 : vector<1x256xf32>
      %cst_16 = arith.constant 9.99999974E-6 : f32
      %24 = vector.broadcast %cst_16 : f32 to vector<1x256xf32>
      %25 = arith.addf %23, %24 : vector<1x256xf32>
      %26 = math.rsqrt %25 : vector<1x256xf32>
      %27 = vector.broadcast %26 : vector<1x256xf32> to vector<32x256xf32>
      %28 = arith.mulf %18, %27 : vector<32x256xf32>
      %c0_17 = arith.constant 0 : index
      %c0_18 = arith.constant 0 : index
      %29 = vector.load %arg4[%c0_17, %c0_18] : memref<1x256xf32, #tpu.memory_space<vmem>>, vector<1x256xf32>
      %30 = vector.broadcast %29 : vector<1x256xf32> to vector<32x256xf32>
      %31 = arith.mulf %28, %30 : vector<32x256xf32>
      %c0_19 = arith.constant 0 : index
      %c0_20 = arith.constant 0 : index
      %32 = vector.load %arg5[%c0_19, %c0_20] : memref<1x256xf32, #tpu.memory_space<vmem>>, vector<1x256xf32>
      %33 = vector.broadcast %32 : vector<1x256xf32> to vector<32x256xf32>
      %34 = arith.addf %31, %33 : vector<32x256xf32>
      %c0_21 = arith.constant 0 : index
      %c0_22 = arith.constant 0 : index
      %35 = vector.load %arg6[%c0_21, %c0_22] : memref<32x256xf32, #tpu.memory_space<vmem>>, vector<32x256xf32>
      tpu.vector_store %arg6[%c0_21, %c0_22], %34 {strides = array<i32>} : memref<32x256xf32, #tpu.memory_space<vmem>>, vector<32x256xf32>,
    } else {
    }
    return
  }
  func.func @transform_0(%arg0: i32, %arg1: i32) -> (i32, i32) {
    %c0_i32 = arith.constant 0 : i32
    %c0_i32_0 = arith.constant 0 : i32
    return %c0_i32, %arg1 : i32, i32
  }
  func.func @transform_1(%arg0: i32, %arg1: i32) -> (i32, i32) {
    %c0_i32 = arith.constant 0 : i32
    return %arg1, %arg0 : i32, i32
  }
  func.func @transform_2(%arg0: i32, %arg1: i32) -> (i32, i32) {
    %c0_i32 = arith.constant 0 : i32
    %c0_i32_0 = arith.constant 0 : i32
    return %c0_i32, %arg0 : i32, i32
  }
  func.func @transform_3(%arg0: i32, %arg1: i32) -> (i32, i32) {
    %c0_i32 = arith.constant 0 : i32
    %c0_i32_0 = arith.constant 0 : i32
    return %c0_i32, %arg0 : i32, i32
  }
  func.func @transform_4(%arg0: i32, %arg1: i32) -> (i32, i32) {
    %c0_i32 = arith.constant 0 : i32
    %c0_i32_0 = arith.constant 0 : i32
    return %c0_i32, %arg0 : i32, i32
  }
}

module attributes {stable_mosaic.version = 11 : i64} {
  func.func @_gemm_bn_kernel(%arg0: i32, %arg1: i32, %arg2: memref<32x512xbf16, #tpu.memory_space<vmem>>, %arg3: memref<512x128xbf16, #tpu.memory_space<vmem>>, %arg4: memref<1x128xf32, #tpu.memory_space<vmem>>, %arg5: memref<1x128xf32, #tpu.memory_space<vmem>>, %arg6: memref<32x128xf32, #tpu.memory_space<vmem>>, %arg7: memref<32x128xf32, #tpu.memory_space<vmem>>) attributes {dimension_semantics = [#tpu.dimension_semantics<parallel>, #tpu.dimension_semantics<arbitrary>], iteration_bounds = array<i64: 1, 1>, scalar_prefetch = 0 : i64, scratch_operands = 1 : i64, tpu.core_type = #tpu.core_type<tc>, window_params = [{transform_indices = @transform_0, window_bounds = array<i64: 32, 512>}, {transform_indices = @transform_1, window_bounds = array<i64: 512, 128>}, {transform_indices = @transform_2, window_bounds = array<i64: 1, 128>}, {transform_indices = @transform_3, window_bounds = array<i64: 1, 128>}, {transform_indices = @transform_4, window_bounds = array<i64: 32, 128>}]} {
    %c0_i32 = arith.constant 0 : i32
    %0 = arith.cmpi eq, %arg1, %c0_i32 : i32
    %1 = arith.extui %0 : i1 to i32
    %c0_i32_0 = arith.constant 0 : i32
    %2 = arith.cmpi ne, %1, %c0_i32_0 : i32
    scf.if %2 {
      %cst_10 = arith.constant 0.000000e+00 : f32
      %12 = vector.broadcast %cst_10 : f32 to vector<32x128xf32>
      %c0_11 = arith.constant 0 : index
      %c0_12 = arith.constant 0 : index
      %13 = vector.load %arg7[%c0_11, %c0_12] : memref<32x128xf32, #tpu.memory_space<vmem>>, vector<32x128xf32>
      tpu.vector_store %arg7[%c0_11, %c0_12], %12 {strides = array<i32>} : memref<32x128xf32, #tpu.memory_space<vmem>>, vector<32x128xf32>,
    } else {
    }
    %c0 = arith.constant 0 : index
    %c0_1 = arith.constant 0 : index
    %3 = vector.load %arg7[%c0, %c0_1] : memref<32x128xf32, #tpu.memory_space<vmem>>, vector<32x128xf32>
    %c0_2 = arith.constant 0 : index
    %c0_3 = arith.constant 0 : index
    %4 = vector.load %arg2[%c0_2, %c0_3] : memref<32x512xbf16, #tpu.memory_space<vmem>>, vector<32x512xbf16>
    %c0_4 = arith.constant 0 : index
    %c0_5 = arith.constant 0 : index
    %5 = vector.load %arg3[%c0_4, %c0_5] : memref<512x128xbf16, #tpu.memory_space<vmem>>, vector<512x128xbf16>
    %cst = arith.constant dense<0.000000e+00> : vector<32x128xf32>
    %6 = tpu.matmul %4, %5, %cst {dimension_numbers = #tpu.dot_dimension_numbers<[1], [0], [0], [1], [0, 0, 1, 1], [], []>} : vector<32x512xbf16>, vector<512x128xbf16>, vector<32x128xf32> -> vector<32x128xf32>
    %7 = arith.addf %3, %6 : vector<32x128xf32>
    %c0_6 = arith.constant 0 : index
    %c0_7 = arith.constant 0 : index
    %8 = vector.load %arg7[%c0_6, %c0_7] : memref<32x128xf32, #tpu.memory_space<vmem>>, vector<32x128xf32>
    tpu.vector_store %arg7[%c0_6, %c0_7], %7 {strides = array<i32>} : memref<32x128xf32, #tpu.memory_space<vmem>>, vector<32x128xf32>,
    %c0_i32_8 = arith.constant 0 : i32
    %9 = arith.cmpi eq, %arg1, %c0_i32_8 : i32
    %10 = arith.extui %9 : i1 to i32
    %c0_i32_9 = arith.constant 0 : i32
    %11 = arith.cmpi ne, %10, %c0_i32_9 : i32
    scf.if %11 {
      %c0_10 = arith.constant 0 : index
      %c0_11 = arith.constant 0 : index
      %12 = vector.load %arg7[%c0_10, %c0_11] : memref<32x128xf32, #tpu.memory_space<vmem>>, vector<32x128xf32>
      %cst_12 = arith.constant dense<0.000000e+00> : vector<128xf32>
      %13 = vector.multi_reduction <add>, %12, %cst_12 [0] : vector<32x128xf32> to vector<128xf32>
      %14 = vector.shape_cast %13 : vector<128xf32> to vector<1x128xf32>
      %cst_13 = arith.constant 3.200000e+01 : f32
      %15 = vector.broadcast %cst_13 : f32 to vector<1x128xf32>
      %16 = arith.divf %14, %15 : vector<1x128xf32>
      %17 = vector.broadcast %16 : vector<1x128xf32> to vector<32x128xf32>
      %18 = arith.subf %12, %17 : vector<32x128xf32>
      %19 = arith.mulf %18, %18 : vector<32x128xf32>
      %cst_14 = arith.constant dense<0.000000e+00> : vector<128xf32>
      %20 = vector.multi_reduction <add>, %19, %cst_14 [0] : vector<32x128xf32> to vector<128xf32>
      %21 = vector.shape_cast %20 : vector<128xf32> to vector<1x128xf32>
      %cst_15 = arith.constant 3.200000e+01 : f32
      %22 = vector.broadcast %cst_15 : f32 to vector<1x128xf32>
      %23 = arith.divf %21, %22 : vector<1x128xf32>
      %cst_16 = arith.constant 9.99999974E-6 : f32
      %24 = vector.broadcast %cst_16 : f32 to vector<1x128xf32>
      %25 = arith.addf %23, %24 : vector<1x128xf32>
      %26 = math.rsqrt %25 : vector<1x128xf32>
      %27 = vector.broadcast %26 : vector<1x128xf32> to vector<32x128xf32>
      %28 = arith.mulf %18, %27 : vector<32x128xf32>
      %c0_17 = arith.constant 0 : index
      %c0_18 = arith.constant 0 : index
      %29 = vector.load %arg4[%c0_17, %c0_18] : memref<1x128xf32, #tpu.memory_space<vmem>>, vector<1x128xf32>
      %30 = vector.broadcast %29 : vector<1x128xf32> to vector<32x128xf32>
      %31 = arith.mulf %28, %30 : vector<32x128xf32>
      %c0_19 = arith.constant 0 : index
      %c0_20 = arith.constant 0 : index
      %32 = vector.load %arg5[%c0_19, %c0_20] : memref<1x128xf32, #tpu.memory_space<vmem>>, vector<1x128xf32>
      %33 = vector.broadcast %32 : vector<1x128xf32> to vector<32x128xf32>
      %34 = arith.addf %31, %33 : vector<32x128xf32>
      %cst_21 = arith.constant 0.000000e+00 : f32
      %35 = vector.broadcast %cst_21 : f32 to vector<32x128xf32>
      %36 = arith.maximumf %34, %35 : vector<32x128xf32>
      %c0_22 = arith.constant 0 : index
      %c0_23 = arith.constant 0 : index
      %37 = vector.load %arg6[%c0_22, %c0_23] : memref<32x128xf32, #tpu.memory_space<vmem>>, vector<32x128xf32>
      tpu.vector_store %arg6[%c0_22, %c0_23], %36 {strides = array<i32>} : memref<32x128xf32, #tpu.memory_space<vmem>>, vector<32x128xf32>,
    } else {
    }
    return
  }
  func.func @transform_0(%arg0: i32, %arg1: i32) -> (i32, i32) {
    %c0_i32 = arith.constant 0 : i32
    %c0_i32_0 = arith.constant 0 : i32
    return %c0_i32, %arg1 : i32, i32
  }
  func.func @transform_1(%arg0: i32, %arg1: i32) -> (i32, i32) {
    %c0_i32 = arith.constant 0 : i32
    return %arg1, %arg0 : i32, i32
  }
  func.func @transform_2(%arg0: i32, %arg1: i32) -> (i32, i32) {
    %c0_i32 = arith.constant 0 : i32
    %c0_i32_0 = arith.constant 0 : i32
    return %c0_i32, %arg0 : i32, i32
  }
  func.func @transform_3(%arg0: i32, %arg1: i32) -> (i32, i32) {
    %c0_i32 = arith.constant 0 : i32
    %c0_i32_0 = arith.constant 0 : i32
    return %c0_i32, %arg0 : i32, i32
  }
  func.func @transform_4(%arg0: i32, %arg1: i32) -> (i32, i32) {
    %c0_i32 = arith.constant 0 : i32
    %c0_i32_0 = arith.constant 0 : i32
    return %c0_i32, %arg0 : i32, i32
  }
}

</mosaic_0001>

<bundles_post_ra>
// kernel: res_5_forward.10
= control target key start
LH: loop header
LB: loop body
LE: loop exit
PB: predicated region body
PF: predicated region fallthrough
CT: control target
= control target key end

     0   :  { %s1059_s1 = inlined_call_operand.vmem [shape: bf16[256,128], index: 1, kind: input, shape index: {}]   ;;  %s1060_s0 = inlined_call_operand.vmem [shape: bf16[128,256], index: 0, kind: input, shape index: {}]   ;;  %s1061_s2 = inlined_call_operand.vmem [shape: f32[1,128], index: 2, kind: input, shape index: {}]   ;;  %s1062_s3 = inlined_call_operand.vmem [shape: f32[1,128], index: 3, kind: input, shape index: {}]   ;;  %s1063_s4 = inlined_call_operand.vmem [shape: f32[128,128], index: 4, kind: output, shape index: {}]  }
   0x1   :  { %v763_v0 = vld [vmem:[%s1059_s1 + $0x38] sm:$0xff]  ;;  %v762_v2 = vld [vmem:[%s1059_s1 + $0x30] sm:$0xff]  ;;  %v761_v4 = vld [vmem:[%s1059_s1 + $0x28] sm:$0xff] }
   0x2   :  { %v771_v1 = vld [vmem:[%s1059_s1 + $0x78] sm:$0xff]  ;;  %277 = vmatpush.bf16.msra.mxu0 %v763_v0  ;;  %v770_v3 = vld [vmem:[%s1059_s1 + $0x70] sm:$0xff]  ;;  %772 = vmatpush.bf16.msra.mxu2 %v763_v0  ;;  %v769_v5 = vld [vmem:[%s1059_s1 + $0x68] sm:$0xff] }
   0x3   :  { %326 = vmatpush.bf16.msra.mxu1 %v771_v1  ;;  %780 = vmatpush.bf16.msra.mxu3 %v771_v1  ;;  %v760_v6 = vld [vmem:[%s1059_s1 + $0x20] sm:$0xff]  ;;  %v759_v8 = vld [vmem:[%s1059_s1 + $0x18] sm:$0xff]  ;;  %v758_v10 = vld [vmem:[%s1059_s1 + $0x10] sm:$0xff] }
   0x4   :  { %v768_v7 = vld [vmem:[%s1059_s1 + $0x60] sm:$0xff]  ;;  %v767_v9 = vld [vmem:[%s1059_s1 + $0x58] sm:$0xff]  ;;  %v766_v11 = vld [vmem:[%s1059_s1 + $0x50] sm:$0xff] }
   0x5   :  { %v757_v12 = vld [vmem:[%s1059_s1 + $0x8] sm:$0xff]  ;;  %v756_v14 = vld [vmem:[%s1059_s1] sm:$0xff]  ;;  %v622_v28 = vld [vmem:[%s1060_s0 + $0x10] sm:$0xf] }
   0x6   :  { %278 = vmatpush.bf16.msra.mxu0 %v762_v2  ;;  %773 = vmatpush.bf16.msra.mxu2 %v762_v2  ;;  %v765_v13 = vld [vmem:[%s1059_s1 + $0x48] sm:$0xff]  ;;  %v764_v15 = vld [vmem:[%s1059_s1 + $0x40] sm:$0xff]  ;;  %v743_v29 = vld [vmem:[%s1060_s0 + $0x14] sm:$0xf0] }
   0x7   :  { %327 = vmatpush.bf16.msra.mxu1 %v770_v3  ;;  %781 = vmatpush.bf16.msra.mxu3 %v770_v3  ;;  %v614_v16 = vld [vmem:[%s1060_s0] sm:$0xf]  ;;  %v741_v17 = vld [vmem:[%s1060_s0 + $0x4] sm:$0xf0]  ;;  %v740_v18 = vld [vmem:[%s1060_s0 + $0x4] sm:$0xf]  ;;  %v623_v36 = vor.u32 %v743_v29, %v622_v28 }
   0x8   :  { %v616_v19 = vld [vmem:[%s1060_s0 + $0x8] sm:$0xf0]  ;;  %v646_v20 = vld [vmem:[%s1060_s0 + $0x40] sm:$0xf]  ;;  %v749_v21 = vld [vmem:[%s1060_s0 + $0x44] sm:$0xf0]  ;;  %v615_v24 = vor.u32 %v741_v17, %v614_v16 }
   0x9   :  { %v748_v22 = vld [vmem:[%s1060_s0 + $0x44] sm:$0xf]  ;;  %v648_v23 = vld [vmem:[%s1060_s0 + $0x48] sm:$0xf0]  ;;  %v619_v25 = vor.u32 %v740_v18, %v616_v19  ;;  %v647_v26 = vor.u32 %v749_v21, %v646_v20  ;;  %v742_v30 = vld [vmem:[%s1060_s0 + $0x14] sm:$0xf] }
   0xa   :  { %279 = vmatpush.bf16.msra.mxu0 %v761_v4  ;;  %774 = vmatpush.bf16.msra.mxu2 %v761_v4  ;;  %v651_v27 = vor.u32 %v748_v22, %v648_v23  ;;  %v624_v31 = vld [vmem:[%s1060_s0 + $0x18] sm:$0xf0]  ;;  %v654_v32 = vld [vmem:[%s1060_s0 + $0x50] sm:$0xf]  ;;  %v751_v33 = vld [vmem:[%s1060_s0 + $0x54] sm:$0xf0] }
   0xb   :  { %328 = vmatpush.bf16.msra.mxu1 %v769_v5  ;;  %782 = vmatpush.bf16.msra.mxu3 %v769_v5  ;;  %v750_v34 = vld [vmem:[%s1060_s0 + $0x54] sm:$0xf]  ;;  %v656_v35 = vld [vmem:[%s1060_s0 + $0x58] sm:$0xf0]  ;;  %v627_v37 = vor.u32 %v742_v30, %v624_v31  ;;  %v655_v38 = vor.u32 %v751_v33, %v654_v32  ;;  %v630_v40 = vld [vmem:[%s1060_s0 + $0x20] sm:$0xf] }
   0xc   :  { %v659_v39 = vor.u32 %v750_v34, %v656_v35  ;;  %v745_v41 = vld [vmem:[%s1060_s0 + $0x24] sm:$0xf0]  ;;  %v744_v42 = vld [vmem:[%s1060_s0 + $0x24] sm:$0xf]  ;;  %v632_v43 = vld [vmem:[%s1060_s0 + $0x28] sm:$0xf0] }
   0xd   :  { %v662_v44 = vld [vmem:[%s1060_s0 + $0x60] sm:$0xf]  ;;  %v753_v45 = vld [vmem:[%s1060_s0 + $0x64] sm:$0xf0]  ;;  %v752_v46 = vld [vmem:[%s1060_s0 + $0x64] sm:$0xf]  ;;  %v631_v48 = vor.u32 %v745_v41, %v630_v40  ;;  %v635_v49 = vor.u32 %v744_v42, %v632_v43 }
   0xe   :  { %280 = vmatpush.bf16.msra.mxu0 %v760_v6  ;;  %775 = vmatpush.bf16.msra.mxu2 %v760_v6  ;;  %v664_v47 = vld [vmem:[%s1060_s0 + $0x68] sm:$0xf0]  ;;  %v663_v50 = vor.u32 %v753_v45, %v662_v44  ;;  %v638_v52 = vld [vmem:[%s1060_s0 + $0x30] sm:$0xf]  ;;  %v747_v53 = vld [vmem:[%s1060_s0 + $0x34] sm:$0xf0] }
   0xf   :  { %329 = vmatpush.bf16.msra.mxu1 %v768_v7  ;;  %783 = vmatpush.bf16.msra.mxu3 %v768_v7  ;;  %v667_v51 = vor.u32 %v752_v46, %v664_v47  ;;  %v746_v54 = vld [vmem:[%s1060_s0 + $0x34] sm:$0xf]  ;;  %v640_v55 = vld [vmem:[%s1060_s0 + $0x38] sm:$0xf0]  ;;  %v670_v56 = vld [vmem:[%s1060_s0 + $0x70] sm:$0xf]  ;;  %v639_v60 = vor.u32 %v747_v53, %v638_v52 }
  0x10   :  { %v755_v57 = vld [vmem:[%s1060_s0 + $0x74] sm:$0xf0]  ;;  %v754_v58 = vld [vmem:[%s1060_s0 + $0x74] sm:$0xf]  ;;  %v672_v59 = vld [vmem:[%s1060_s0 + $0x78] sm:$0xf0]  ;;  %v643_v61 = vor.u32 %v746_v54, %v640_v55 }
  0x11   :  { %v671_v62 = vor.u32 %v755_v57, %v670_v56  ;;  %v675_v63 = vor.u32 %v754_v58, %v672_v59 }
  0x12   :  { %281 = vmatpush.bf16.msra.mxu0 %v759_v8  ;;  %776 = vmatpush.bf16.msra.mxu2 %v759_v8 }
  0x13   :  { %330 = vmatpush.bf16.msra.mxu1 %v767_v9  ;;  %784 = vmatpush.bf16.msra.mxu3 %v767_v9 }
  0x16   :  { %282 = vmatpush.bf16.msra.mxu0 %v758_v10  ;;  %777 = vmatpush.bf16.msra.mxu2 %v758_v10 }
  0x17   :  { %331 = vmatpush.bf16.msra.mxu1 %v766_v11  ;;  %785 = vmatpush.bf16.msra.mxu3 %v766_v11 }
  0x1a   :  { %283 = vmatpush.bf16.msra.mxu0 %v757_v12  ;;  %778 = vmatpush.bf16.msra.mxu2 %v757_v12 }
  0x1b   :  { %332 = vmatpush.bf16.msra.mxu1 %v765_v13  ;;  %786 = vmatpush.bf16.msra.mxu3 %v765_v13 }
  0x1e   :  { %284 = vmatpush.bf16.msra.mxu0 %v756_v14  ;;  %779 = vmatpush.bf16.msra.mxu2 %v756_v14 }
  0x1f   :  { %333 = vmatpush.bf16.msra.mxu1 %v764_v15  ;;  %787 = vmatpush.bf16.msra.mxu3 %v764_v15 }
  0x21   :  { %285 = vmatmul.bf16.vlgmr.msra.gmra.mxu0 %v615_v24  ;;  %305 = vmatmul.bf16.vlgmr.msra.gmra.mxu2 %v647_v26 }
  0x22   :  { %334 = vmatmul.bf16.vlgmr.msra.gmra.mxu1 %v619_v25  ;;  %354 = vmatmul.bf16.vlgmr.msra.gmra.mxu3 %v651_v27 }
  0x31   :  { %290 = vmatmul.bf16.gmra.mxu0 %v623_v36  ;;  %310 = vmatmul.bf16.gmra.mxu2 %v655_v38 }
  0x32   :  { %339 = vmatmul.bf16.gmra.mxu1 %v627_v37  ;;  %359 = vmatmul.bf16.gmra.mxu3 %v659_v39 }
  0x41   :  { %295 = vmatmul.bf16.gmra.mxu0 %v631_v48  ;;  %315 = vmatmul.bf16.gmra.mxu2 %v663_v50  ;;  %v795_v48 = vmov 128.0  }
  0x42   :  { %344 = vmatmul.bf16.gmra.mxu1 %v635_v49  ;;  %364 = vmatmul.bf16.gmra.mxu3 %v667_v51  ;;  %791 = vrcp.f32 %v795_v48 }
  0x48   :  { %v792_v53 = vpop.eup %791 }
  0x49   :  { %vm452_vm0 = vweird.f32 %v792_v53 }
  0x51   :  { %300 = vmatmul.bf16.gmra.mxu0 %v639_v60  ;;  %320 = vmatmul.bf16.gmra.mxu2 %v671_v62  ;;  %v448_v60 = vmul.f32 128.0, %v792_v53 }
  0x52   :  { %349 = vmatmul.bf16.gmra.mxu1 %v643_v61  ;;  %369 = vmatmul.bf16.gmra.mxu3 %v675_v63 }
  0x9e   :  { %v286_v0 = vpop.f32.mrf.mxu0 }
  0x9f   :  { %v335_v1 = vpop.f32.mrf.mxu1 }
  0xa0   :  { %v336_v23 = vadd.f32 %v335_v1, %v286_v0  ;;  %v449_v1 = vsub.f32 1.0, %v448_v60 }
  0xa4   :  { %v306_v2 = vpop.f32.mrf.mxu2 }
  0xa5   :  { %v355_v3 = vpop.f32.mrf.mxu3 }
  0xa6   :  { %v288_v4 = vpop.f32.mrf.mxu0  ;;  %v356_v42 = vadd.f32 %v355_v3, %v306_v2 }
  0xa7   :  { %v337_v5 = vpop.f32.mrf.mxu1 }
  0xa8   :  { %v338_v22 = vadd.f32 %v337_v5, %v288_v4  ;;  %v450_v4 = vmul.f32 %v792_v53, %v449_v1 }
  0xaa   :  { %v426_v25 = vadd.f32 %v338_v22, %v336_v23 }
  0xac   :  { %v308_v6 = vpop.f32.mrf.mxu2 }
  0xad   :  { %v357_v7 = vpop.f32.mrf.mxu3 }
  0xae   :  { %v291_v8 = vpop.f32.mrf.mxu0  ;;  %v358_v46 = vadd.f32 %v357_v7, %v308_v6  ;;  %v451_v7 = vadd.f32 %v792_v53, %v450_v4 }
  0xaf   :  { %v340_v9 = vpop.f32.mrf.mxu1 }
  0xb0   :  { %v341_v24 = vadd.f32 %v340_v9, %v291_v8 }
  0xb2   :  { %v427_v29 = vadd.f32 %v426_v25, %v341_v24 }
  0xb4   :  { %v311_v10 = vpop.f32.mrf.mxu2 }
  0xb5   :  { %v360_v11 = vpop.f32.mrf.mxu3 }
  0xb6   :  { %v293_v12 = vpop.f32.mrf.mxu0  ;;  %v361_v49 = vadd.f32 %v360_v11, %v311_v10  ;;  %v453_v10 = vsel %vm452_vm0, %v792_v53, %v451_v7 }
  0xb7   :  { %v342_v13 = vpop.f32.mrf.mxu1 }
  0xb8   :  { %v343_v26 = vadd.f32 %v342_v13, %v293_v12 }
  0xba   :  { %v428_v33 = vadd.f32 %v427_v29, %v343_v26 }
  0xbc   :  { %v313_v14 = vpop.f32.mrf.mxu2 }
  0xbd   :  { %v362_v15 = vpop.f32.mrf.mxu3 }
  0xbe   :  { %v296_v16 = vpop.f32.mrf.mxu0  ;;  %v363_v51 = vadd.f32 %v362_v15, %v313_v14 }
  0xbf   :  { %v345_v17 = vpop.f32.mrf.mxu1 }
  0xc0   :  { %v346_v30 = vadd.f32 %v345_v17, %v296_v16 }
  0xc2   :  { %v429_v35 = vadd.f32 %v428_v33, %v346_v30 }
  0xc4   :  { %v316_v18 = vpop.f32.mrf.mxu2 }
  0xc5   :  { %v365_v19 = vpop.f32.mrf.mxu3 }
  0xc6   :  { %v298_v20 = vpop.f32.mrf.mxu0  ;;  %v366_v54 = vadd.f32 %v365_v19, %v316_v18 }
  0xc7   :  { %v347_v21 = vpop.f32.mrf.mxu1 }
  0xc8   :  { %v348_v34 = vadd.f32 %v347_v21, %v298_v20 }
  0xca   :  { %v430_v37 = vadd.f32 %v429_v35, %v348_v34 }
  0xcc   :  { %v318_v31 = vpop.f32.mrf.mxu2 }
  0xcd   :  { %v367_v32 = vpop.f32.mrf.mxu3 }
  0xce   :  { %v301_v27 = vpop.f32.mrf.mxu0  ;;  %v368_v56 = vadd.f32 %v367_v32, %v318_v31 }
  0xcf   :  { %v350_v28 = vpop.f32.mrf.mxu1 }
  0xd0   :  { %v351_v36 = vadd.f32 %v350_v28, %v301_v27 }
  0xd2   :  { %v431_v40 = vadd.f32 %v430_v37, %v351_v36 }
  0xd4   :  { %v321_v44 = vpop.f32.mrf.mxu2 }
  0xd5   :  { %v370_v45 = vpop.f32.mrf.mxu3 }
  0xd6   :  { %v303_v38 = vpop.f32.mrf.mxu0  ;;  %v371_v61 = vadd.f32 %v370_v45, %v321_v44 }
  0xd7   :  { %v352_v39 = vpop.f32.mrf.mxu1 }
  0xd8   :  { %v353_v41 = vadd.f32 %v352_v39, %v303_v38 }
  0xda   :  { %v432_v43 = vadd.f32 %v431_v40, %v353_v41 }
  0xdc   :  { %v433_v47 = vadd.f32 %v432_v43, %v356_v42  ;;  %v323_v58 = vpop.f32.mrf.mxu2 }
  0xdd   :  { %v372_v59 = vpop.f32.mrf.mxu3 }
  0xde   :  { %v434_v50 = vadd.f32 %v433_v47, %v358_v46  ;;  %v373_v0 = vadd.f32 %v372_v59, %v323_v58 }
  0xe0   :  { %v435_v52 = vadd.f32 %v434_v50, %v361_v49 }
  0xe2   :  { %v436_v55 = vadd.f32 %v435_v52, %v363_v51 }
  0xe4   :  { %v437_v57 = vadd.f32 %v436_v55, %v366_v54 }
  0xe6   :  { %v438_v62 = vadd.f32 %v437_v57, %v368_v56 }
  0xe8   :  { %v439_v63 = vadd.f32 %v438_v62, %v371_v61 }
  0xea   :  { %v440_v2 = vadd.f32 %v439_v63, %v373_v0 }
  0xec   :  { %v441_v3 = vrot.slane %v440_v2, 4 }
  0xee   :  { %v442_v5 = vadd.f32 %v441_v3, %v440_v2 }
  0xf0   :  { %v443_v6 = vrot.slane %v442_v5, 2 }
  0xf2   :  { %v444_v8 = vadd.f32 %v443_v6, %v442_v5 }
  0xf4   :  { %v445_v9 = vrot.slane %v444_v8, 1 }
  0xf6   :  { %v446_v11 = vadd.f32 %v445_v9, %v444_v8 }
  0xf8   :  { %v454_v12 = vmul.f32 %v453_v10, %v446_v11 }
  0xfa   :  { %v965_v13 = vsub.f32 %v336_v23, %v454_v12  ;;  %v967_v14 = vsub.f32 %v338_v22, %v454_v12  ;;  %v969_v15 = vsub.f32 %v341_v24, %v454_v12  ;;  %v975_v18 = vsub.f32 %v343_v26, %v454_v12 }
  0xfb   :  { %v977_v19 = vsub.f32 %v346_v30, %v454_v12  ;;  %v981_v23 = vsub.f32 %v348_v34, %v454_v12  ;;  %v461_v25 = vsub.f32 %v351_v36, %v454_v12  ;;  %v987_v29 = vsub.f32 %v353_v41, %v454_v12 }
  0xfc   :  { %v471_v16 = vmul.f32 %v965_v13, %v965_v13  ;;  %v472_v17 = vmul.f32 %v967_v14, %v967_v14  ;;  %v473_v20 = vmul.f32 %v969_v15, %v969_v15  ;;  %v474_v22 = vmul.f32 %v975_v18, %v975_v18 }
  0xfd   :  { %v475_v27 = vmul.f32 %v977_v19, %v977_v19  ;;  %v476_v26 = vmul.f32 %v981_v23, %v981_v23  ;;  %v463_v31 = vsub.f32 %v356_v42, %v454_v12  ;;  %v477_v32 = vmul.f32 %v461_v25, %v461_v25 }
  0xfe   :  { %v487_v21 = vadd.f32 %v472_v17, %v471_v16  ;;  %v464_v34 = vsub.f32 %v358_v46, %v454_v12  ;;  %v478_v35 = vmul.f32 %v987_v29, %v987_v29  ;;  %v465_v38 = vsub.f32 %v361_v49, %v454_v12 }
  0xff   :  { %v479_v36 = vmul.f32 %v463_v31, %v463_v31  ;;  %v466_v40 = vsub.f32 %v363_v51, %v454_v12  ;;  %v467_v41 = vsub.f32 %v366_v54, %v454_v12  ;;  %v468_v48 = vsub.f32 %v368_v56, %v454_v12 }
 0x100   :  { %v488_v24 = vadd.f32 %v487_v21, %v473_v20  ;;  %v480_v43 = vmul.f32 %v464_v34, %v464_v34  ;;  %v481_v45 = vmul.f32 %v465_v38, %v465_v38  ;;  %v469_v42 = vsub.f32 %v371_v61, %v454_v12 }
 0x101   :  { %v482_v50 = vmul.f32 %v466_v40, %v466_v40  ;;  %v483_v53 = vmul.f32 %v467_v41, %v467_v41  ;;  %v993_v46 = vsub.f32 %v373_v0, %v454_v12  ;;  %v484_v57 = vmul.f32 %v468_v48, %v468_v48 }
 0x102   :  { %v489_v28 = vadd.f32 %v488_v24, %v474_v22  ;;  %v485_v59 = vmul.f32 %v469_v42, %v469_v42 }
 0x103   :  { %v486_v51 = vmul.f32 %v993_v46, %v993_v46 }
 0x104   :  { %v490_v30 = vadd.f32 %v489_v28, %v475_v27 }
 0x106   :  { %v491_v33 = vadd.f32 %v490_v30, %v476_v26 }
 0x108   :  { %v492_v37 = vadd.f32 %v491_v33, %v477_v32 }
 0x10a   :  { %v493_v39 = vadd.f32 %v492_v37, %v478_v35 }
 0x10c   :  { %v494_v44 = vadd.f32 %v493_v39, %v479_v36 }
 0x10e   :  { %v495_v47 = vadd.f32 %v494_v44, %v480_v43 }
 0x110   :  { %v496_v52 = vadd.f32 %v495_v47, %v481_v45 }
 0x112   :  { %v497_v55 = vadd.f32 %v496_v52, %v482_v50 }
 0x114   :  { %v498_v58 = vadd.f32 %v497_v55, %v483_v53 }
 0x116   :  { %v499_v49 = vadd.f32 %v498_v58, %v484_v57 }
 0x118   :  { %v500_v60 = vadd.f32 %v499_v49, %v485_v59 }
 0x11a   :  { %v501_v62 = vadd.f32 %v500_v60, %v486_v51 }
 0x11c   :  { %v502_v54 = vrot.slane %v501_v62, 4 }
 0x11e   :  { %v503_v63 = vadd.f32 %v502_v54, %v501_v62 }
 0x120   :  { %v504_v1 = vrot.slane %v503_v63, 2 }
 0x122   :  { %v505_v56 = vadd.f32 %v504_v1, %v503_v63 }
 0x124   :  { %v506_v2 = vrot.slane %v505_v56, 1 }
 0x126   :  { %v507_v3 = vadd.f32 %v506_v2, %v505_v56 }
 0x128   :  { %v508_v61 = vmul.f32 %v507_v3, %v453_v10  ;;  %v789_v10 = vld [vmem:[%s1061_s2] ss:$0 sm:$0xff] }
 0x12a   :  { %v509_v4 = vadd.f32 1e-05, %v508_v61 }
 0x12c   :  { %793 = vrsqrt.f32 %v509_v4  ;;  %vm516_vm2 = vweird.f32 %v509_v4 }
 0x132   :  { %v794_v0 = vpop.eup %793 }
 0x133   :  { %v511_v5 = vmul.f32 %v794_v0, %v509_v4  ;;  %vm517_vm1 = vweird.f32 %v794_v0 }
 0x134   :  { %vm518_vm3 = vmor %vm516_vm2, %vm517_vm1 }
 0x135   :  { %v512_v6 = vmul.f32 %v794_v0, %v511_v5 }
 0x137   :  { %v513_v7 = vmul.f32 0.5, %v512_v6 }
 0x139   :  { %v514_v8 = vsub.f32 1.5, %v513_v7 }
 0x13b   :  { %v515_v9 = vmul.f32 %v794_v0, %v514_v8 }
 0x13d   :  { %v519_v11 = vsel %vm518_vm3, %v794_v0, %v515_v9 }
 0x13e   :  { %v520_v12 = vmul.f32 %v519_v11, %v965_v13  ;;  %v521_v16 = vmul.f32 %v519_v11, %v967_v14  ;;  %v522_v17 = vmul.f32 %v519_v11, %v969_v15  ;;  %v523_v20 = vmul.f32 %v519_v11, %v975_v18  ;;  %v790_v13 = vld [vmem:[%s1062_s3] ss:$0 sm:$0xff] }
 0x13f   :  { %v524_v21 = vmul.f32 %v519_v11, %v977_v19  ;;  %v525_v22 = vmul.f32 %v519_v11, %v981_v23  ;;  %v526_v24 = vmul.f32 %v519_v11, %v461_v25  ;;  %v527_v14 = vmul.f32 %v519_v11, %v987_v29 }
 0x140   :  { %v540_v27 = vmul.f32 %v789_v10, %v520_v12  ;;  %v541_v28 = vmul.f32 %v789_v10, %v521_v16  ;;  %v542_v26 = vmul.f32 %v789_v10, %v522_v17  ;;  %v543_v15 = vmul.f32 %v789_v10, %v523_v20 }
 0x141   :  { %v528_v30 = vmul.f32 %v519_v11, %v463_v31  ;;  %v544_v32 = vmul.f32 %v789_v10, %v524_v21  ;;  %v529_v33 = vmul.f32 %v519_v11, %v464_v34  ;;  %v530_v35 = vmul.f32 %v519_v11, %v465_v38 }
 0x142   :  { %v545_v18 = vmul.f32 %v789_v10, %v525_v22  ;;  %v546_v37 = vmul.f32 %v789_v10, %v526_v24  ;;  %v560_v19 = vadd.f32 %v790_v13, %v540_v27  ;;  %v561_v36 = vadd.f32 %v790_v13, %v541_v28 }
 0x143   :  { %v562_v23 = vadd.f32 %v790_v13, %v542_v26  ;;  %v531_v25 = vmul.f32 %v519_v11, %v466_v40  ;;  %v547_v39 = vmul.f32 %v789_v10, %v527_v14  ;;  %v563_v43 = vadd.f32 %v790_v13, %v543_v15 }
 0x144   :  { %v532_v44 = vmul.f32 %v519_v11, %v467_v41  ;;  %v533_v45 = vmul.f32 %v519_v11, %v468_v48  ;;  %v548_v47 = vmul.f32 %v789_v10, %v528_v30  ;;  %v564_v50 = vadd.f32 %v790_v13, %v544_v32 }
 0x145   :  { %v534_v52 = vmul.f32 %v519_v11, %v469_v42  ;;  %v549_v53 = vmul.f32 %v789_v10, %v529_v33  ;;  %v550_v29 = vmul.f32 %v789_v10, %v530_v35  ;;  %v565_v55 = vadd.f32 %v790_v13, %v545_v18 }
 0x146   :  { %v566_v31 = vadd.f32 %v790_v13, %v546_v37  ;;  %v576_v57 = vmax.f32 %v560_v19, 0.0  ;;  %v577_v34 = vmax.f32 %v561_v36, 0.0  ;;  %v578_v38 = vmax.f32 %v562_v23, 0.0 }
 0x147   :  { %v535_v58 = vmul.f32 %v519_v11, %v993_v46  ;;  %v551_v59 = vmul.f32 %v789_v10, %v531_v25  ;;  %v567_v49 = vadd.f32 %v790_v13, %v547_v39  ;;  %v579_v51 = vmax.f32 %v563_v43, 0.0 }
 0x148   :  { %v552_v40 = vmul.f32 %v789_v10, %v532_v44  ;;  %v568_v60 = vadd.f32 %v790_v13, %v548_v47  ;;  %v580_v62 = vmax.f32 %v564_v50, 0.0  ;;  %592 = vst [vmem:[%s1063_s4] sm:$0xff] %v576_v57  ;;  %v553_v41 = vmul.f32 %v789_v10, %v533_v45 }
 0x149   :  { %v569_v48 = vadd.f32 %v790_v13, %v549_v53  ;;  %v581_v42 = vmax.f32 %v565_v55, 0.0  ;;  %593 = vst [vmem:[%s1063_s4 + $0x8] sm:$0xff] %v577_v34  ;;  %v554_v54 = vmul.f32 %v789_v10, %v534_v52  ;;  %v570_v63 = vadd.f32 %v790_v13, %v550_v29 }
 0x14a   :  { %v582_v46 = vmax.f32 %v566_v31, 0.0  ;;  %594 = vst [vmem:[%s1063_s4 + $0x10] sm:$0xff] %v578_v38  ;;  %v555_v1 = vmul.f32 %v789_v10, %v535_v58  ;;  %v571_v56 = vadd.f32 %v790_v13, %v551_v59  ;;  %v583_v2 = vmax.f32 %v567_v49, 0.0 }
 0x14b   :  { %595 = vst [vmem:[%s1063_s4 + $0x18] sm:$0xff] %v579_v51  ;;  %v572_v3 = vadd.f32 %v790_v13, %v552_v40  ;;  %v584_v61 = vmax.f32 %v568_v60, 0.0  ;;  %v573_v4 = vadd.f32 %v790_v13, %v553_v41  ;;  %v585_v0 = vmax.f32 %v569_v48, 0.0 }
 0x14c   :  { %596 = vst [vmem:[%s1063_s4 + $0x20] sm:$0xff] %v580_v62  ;;  %v574_v5 = vadd.f32 %v790_v13, %v554_v54  ;;  %v586_v6 = vmax.f32 %v570_v63, 0.0  ;;  %v575_v7 = vadd.f32 %v790_v13, %v555_v1  ;;  %v587_v8 = vmax.f32 %v571_v56, 0.0 }
 0x14d   :  { %597 = vst [vmem:[%s1063_s4 + $0x28] sm:$0xff] %v581_v42  ;;  %v588_v9 = vmax.f32 %v572_v3, 0.0  ;;  %v589_v11 = vmax.f32 %v573_v4, 0.0 }
 0x14e   :  { %598 = vst [vmem:[%s1063_s4 + $0x30] sm:$0xff] %v582_v46  ;;  %v590_v12 = vmax.f32 %v574_v5, 0.0  ;;  %v591_v16 = vmax.f32 %v575_v7, 0.0 }
 0x14f   :  { %599 = vst [vmem:[%s1063_s4 + $0x38] sm:$0xff] %v583_v2 }
 0x150   :  { %600 = vst [vmem:[%s1063_s4 + $0x40] sm:$0xff] %v584_v61 }
 0x151   :  { %601 = vst [vmem:[%s1063_s4 + $0x48] sm:$0xff] %v585_v0 }
 0x152   :  { %602 = vst [vmem:[%s1063_s4 + $0x50] sm:$0xff] %v586_v6 }
 0x153   :  { %603 = vst [vmem:[%s1063_s4 + $0x58] sm:$0xff] %v587_v8 }
 0x154   :  { %604 = vst [vmem:[%s1063_s4 + $0x60] sm:$0xff] %v588_v9 }
 0x155   :  { %605 = vst [vmem:[%s1063_s4 + $0x68] sm:$0xff] %v589_v11 }
 0x156   :  { %606 = vst [vmem:[%s1063_s4 + $0x70] sm:$0xff] %v590_v12 }
 0x157   :  { %607 = vst [vmem:[%s1063_s4 + $0x78] sm:$0xff] %v591_v16 }

// kernel: res_5_forward.11
= control target key start
LH: loop header
LB: loop body
LE: loop exit
PB: predicated region body
PF: predicated region fallthrough
CT: control target
= control target key end

     0   :  { %s1110_s15 = smov 0   ;;  %s1112_s16 = smov 0   ;;  %s1235_s0 = inlined_call_operand.vmem [shape: bf16[32,1152], index: 0, kind: input, shape index: {}]   ;;  %s1236_s1 = inlined_call_operand.vmem [shape: bf16[1152,128], index: 1, kind: input, shape index: {}]   ;;  %s1237_s2 = inlined_call_operand.vmem [shape: f32[1,128], index: 2, kind: input, shape index: {}]   ;;  %s1238_s3 = inlined_call_operand.vmem [shape: f32[1,128], index: 3, kind: input, shape index: {}]   ;;  %s1239_s4 = inlined_call_operand.vmem [shape: f32[32,128], index: 4, kind: output, shape index: {}]  }
   0x1   :  { %s1114_s17 = smov 0   ;;  %s1116_s18 = smov 0  }
   0x2   :  { %s1118_s19 = smov 0  }
   0x3 LB: > { %s23_s20 = sadd.s32 1, %s1077_s18  ;;  %p40_p1 = scmp.ne.s32.totalorder %s1069_s16, %s1065_s15  ;;  %s1081_s19 = sphi %s1118_s19, %s14_s19   ;;  %s1077_s18 = sphi %s1116_s18, %s1243_s18   ;;  %s1073_s17 = sphi %s1114_s17, %s1242_s17   ;;  %s1069_s16 = sphi %s1112_s16, %s1241_s16   ;;  %s1065_s15 = sphi %s1110_s15, %s1240_s15  }
   0x4   : > { %p24_p0 = scmp.ge.s32.totalorder %s23_s20, 3  ;;  %p41_p2 = scmp.eq.s32.totalorder %s1081_s19, 0 }
   0x5   : > { %s33_s22 = sadd.s32 1, %s1069_s16  ;;  %p817_p5 = scmp.ge.s32.totalorder %s1081_s19, 3 }
   0x6   : > { %s1245_s20 = smov (%p24_p0, %s23_s20), 0  ;;  %p42_p3 = por %p41_p2, %p40_p1 }
   0x7   : > { %s30_s21 = ssub.s32 %s1077_s18, %s1245_s20  ;;  %184 = sbr.rel (%p817_p5) target bundleno = 25 (0x19), region = 24 }
   0x8   : > { %p31_p4 = scmp.eq.s32.totalorder %s30_s21, 0 }
   0xa   : > { %s1145_s23 = scalar_select %p31_p4, %s1069_s16, %s33_s22  }
   0xc   : > { %187 = sbr.rel (!%p42_p3) target bundleno = 25 (0x19), region = 28  ;;  %s189_s24 = sand.u32 (%p42_p3), 1, %s1069_s16  }
   0xd   : > { %s954_s25 = smul.u32 (%p42_p3), 12, %s1077_s18 }
   0xe   : > { %s993_s26 = smul.u32 (%p42_p3), 48, %s189_s24 }
   0xf   : > { %s194_s29 = scalar_lea.vmem (%p42_p3), %s1235_s0, %s954_s25 }
  0x10   : > { %v209_v0 = vld [vmem:[%s194_s29] sm:$0xff] (%p42_p3)  ;;  %v213_v2 = vld [vmem:[%s194_s29 + $0x48] sm:$0xff] (%p42_p3)  ;;  %s191_s30 = scalar_lea.vmem (%p42_p3), [#allocation3], %s993_s26  ;;  %v823_v6 = vld [vmem:[%s194_s29 + $0x50] sm:$0xf] (%p42_p3) }
  0x11   : > { %v211_v1 = vld [vmem:[%s194_s29 + $0x24] sm:$0xff]  ;;  %210 = vst [vmem:[%s191_s30] sm:$0xff] %v209_v0  ;;  %v215_v3 = vld [vmem:[%s194_s29 + $0x6c] sm:$0xff]  ;;  %v825_v7 = vld [vmem:[%s194_s29 + $0x74] sm:$0xf] }
  0x12   : > { %212 = vst [vmem:[%s191_s30 + $0xc] sm:$0xff] %v211_v1  ;;  %v819_v4 = vld [vmem:[%s194_s29 + $0x8] sm:$0xf]  ;;  %v821_v5 = vld [vmem:[%s194_s29 + $0x2c] sm:$0xf] }
  0x13   : > { %214 = vst [vmem:[%s191_s30 + $0x18] sm:$0xff] %v213_v2 }
  0x14   : > { %216 = vst [vmem:[%s191_s30 + $0x24] sm:$0xff] %v215_v3 }
  0x15   : > { %820 = vst [vmem:[%s191_s30 + $0x8] sm:$0xf] %v819_v4 }
  0x16   : > { %822 = vst [vmem:[%s191_s30 + $0x14] sm:$0xf] %v821_v5 }
  0x17   : > { %824 = vst [vmem:[%s191_s30 + $0x20] sm:$0xf] %v823_v6 }
  0x18   : > { %826 = vst [vmem:[%s191_s30 + $0x2c] sm:$0xf] %v825_v7 }
  0x19 PF: > { %p827_p6 = scmp.ge.s32.totalorder %s1081_s19, 1  ;;  %p249_p7 = scmp.lt.s32.totalorder %s1081_s19, 4 }
  0x1b   : > { %p250_p8 = pnand %p827_p6, %p249_p7 }
  0x1c   : > { %s256_s5 = sand.u32 (!%p250_p8), 1, %s1065_s15   ;;  %s295_s6 = smul.u32 (!%p250_p8), 48, %s1073_s17 }
  0x1d   : > { %253 = sbr.rel (%p250_p8) target bundleno = 318 (0x13e), region = 58  ;;  %p829_p10 = scmp.ne.s32.totalorder (!%p250_p8), %s1073_s17, 0 }
  0x1e   : > { %s994_s7 = smul.u32 (!%p250_p8), 48, %s256_s5  ;;  %p296_p9 = scmp.lt.s32.totalorder (!%p250_p8), %s295_s6, 143 }
  0x20   : > { %s1162_s12 = scalar_lea.vmem (!%p250_p8), [#allocation3], %s994_s7 }
  0x22   : > { %s1247_s6 = smov (!%p296_p9, %s295_s6), 143  ;;  %317 = sbr.rel (%p829_p10) target bundleno = 44 (0x2c), region = 66 }
  0x23   : > { %s828_s8 = sshll.u32 %s1247_s6, 2 }
  0x24   : > { %s1160_s11 = scalar_lea.vmem %s1236_s1, %s828_s8 }
  0x27   : > { %v1083_v8 = vmov 0.0  }
  0x28   : > { %318 = vst [vmem:[#allocation2 + $0x10] sm:$0xff] %v1083_v8 }
  0x29   : > { %319 = vst [vmem:[#allocation2] sm:$0xff] %v1083_v8 }
  0x2a   : > { %320 = vst [vmem:[#allocation2 + $0x18] sm:$0xff] %v1083_v8 }
  0x2b   : > { %321 = vst [vmem:[#allocation2 + $0x8] sm:$0xff] %v1083_v8 }
  0x2c PF: > { %v968_v9 = vld [vmem:[%s1160_s11 + $0x38] sm:$0xff]  ;;  %v967_v12 = vld [vmem:[%s1160_s11 + $0x30] sm:$0xff]  ;;  %v966_v15 = vld [vmem:[%s1160_s11 + $0x28] sm:$0xff]  ;;  %p950_p11 = scmp.ne.s32.totalorder %s1073_s17, 2 }
  0x2d   : > { %v976_v10 = vld [vmem:[%s1160_s11 + $0x78] sm:$0xff]  ;;  %558 = vmatpush.bf16.msra.mxu0 %v968_v9  ;;  %v975_v13 = vld [vmem:[%s1160_s11 + $0x70] sm:$0xff]  ;;  %985 = vmatpush.bf16.msra.mxu3 %v968_v9  ;;  %v974_v16 = vld [vmem:[%s1160_s11 + $0x68] sm:$0xff] }
  0x2e   : > { %v984_v11 = vld [vmem:[%s1160_s11 + $0xb8] sm:$0xff]  ;;  %577 = vmatpush.bf16.msra.mxu1 %v976_v10  ;;  %v983_v14 = vld [vmem:[%s1160_s11 + $0xb0] sm:$0xff]  ;;  %v982_v17 = vld [vmem:[%s1160_s11 + $0xa8] sm:$0xff] }
  0x2f   : > { %596 = vmatpush.bf16.msra.mxu2 %v984_v11  ;;  %v965_v18 = vld [vmem:[%s1160_s11 + $0x20] sm:$0xff]  ;;  %v964_v21 = vld [vmem:[%s1160_s11 + $0x18] sm:$0xff]  ;;  %v963_v24 = vld [vmem:[%s1160_s11 + $0x10] sm:$0xff] }
  0x30   : > { %v973_v19 = vld [vmem:[%s1160_s11 + $0x60] sm:$0xff]  ;;  %v972_v22 = vld [vmem:[%s1160_s11 + $0x58] sm:$0xff]  ;;  %v971_v25 = vld [vmem:[%s1160_s11 + $0x50] sm:$0xff] }
  0x31   : > { %559 = vmatpush.bf16.msra.mxu0 %v967_v12  ;;  %986 = vmatpush.bf16.msra.mxu3 %v967_v12  ;;  %v981_v20 = vld [vmem:[%s1160_s11 + $0xa0] sm:$0xff]  ;;  %v980_v23 = vld [vmem:[%s1160_s11 + $0x98] sm:$0xff]  ;;  %v979_v26 = vld [vmem:[%s1160_s11 + $0x90] sm:$0xff] }
  0x32   : > { %578 = vmatpush.bf16.msra.mxu1 %v975_v13  ;;  %v962_v27 = vld [vmem:[%s1160_s11 + $0x8] sm:$0xff]  ;;  %v961_v30 = vld [vmem:[%s1160_s11] sm:$0xff]  ;;  %v322_v54 = vld [vmem:[#allocation2 + $0x10] sm:$0xff] }
  0x33   : > { %597 = vmatpush.bf16.msra.mxu2 %v983_v14  ;;  %v970_v28 = vld [vmem:[%s1160_s11 + $0x48] sm:$0xff]  ;;  %v969_v31 = vld [vmem:[%s1160_s11 + $0x40] sm:$0xff]  ;;  %v324_v4 = vld [vmem:[#allocation2 + $0x18] sm:$0xff] }
  0x34   : > { %v978_v29 = vld [vmem:[%s1160_s11 + $0x88] sm:$0xff]  ;;  %v977_v32 = vld [vmem:[%s1160_s11 + $0x80] sm:$0xff] }
  0x35   : > { %560 = vmatpush.bf16.msra.mxu0 %v966_v15  ;;  %987 = vmatpush.bf16.msra.mxu3 %v966_v15  ;;  %v832_v33 = vld [vmem:[%s1162_s12] sm:$0xf]  ;;  %v956_v34 = vld [vmem:[%s1162_s12 + $0x8] sm:$0xf0]  ;;  %v955_v35 = vld [vmem:[%s1162_s12 + $0x4] sm:$0xf] }
  0x36   : > { %579 = vmatpush.bf16.msra.mxu1 %v974_v16  ;;  %v834_v36 = vld [vmem:[%s1162_s12 + $0xc] sm:$0xf0]  ;;  %v840_v37 = vld [vmem:[%s1162_s12 + $0x8] sm:$0xf]  ;;  %v957_v38 = vld [vmem:[%s1162_s12 + $0x10] sm:$0xf0]  ;;  %v833_v41 = vor.u32 %v956_v34, %v832_v33 }
  0x37   : > { %598 = vmatpush.bf16.msra.mxu2 %v982_v17  ;;  %v844_v39 = vld [vmem:[%s1162_s12 + $0x18] sm:$0xf]  ;;  %v959_v40 = vld [vmem:[%s1162_s12 + $0x20] sm:$0xf0]  ;;  %v837_v42 = vor.u32 %v955_v35, %v834_v36  ;;  %v841_v43 = vor.u32 %v957_v38, %v840_v37  ;;  %v958_v45 = vld [vmem:[%s1162_s12 + $0x1c] sm:$0xf] }
  0x38   : > { %v845_v44 = vor.u32 %v959_v40, %v844_v39  ;;  %v846_v46 = vld [vmem:[%s1162_s12 + $0x24] sm:$0xf0]  ;;  %v852_v47 = vld [vmem:[%s1162_s12 + $0x20] sm:$0xf]  ;;  %v960_v48 = vld [vmem:[%s1162_s12 + $0x28] sm:$0xf0] }
  0x39   : > { %561 = vmatpush.bf16.msra.mxu0 %v965_v18  ;;  %988 = vmatpush.bf16.msra.mxu3 %v965_v18  ;;  %v849_v49 = vor.u32 %v958_v45, %v846_v46  ;;  %v853_v50 = vor.u32 %v960_v48, %v852_v47  ;;  %v323_v61 = vld [vmem:[#allocation2] sm:$0xff]  ;;  %v325_v11 = vld [vmem:[#allocation2 + $0x8] sm:$0xff] }
  0x3a   : > { %580 = vmatpush.bf16.msra.mxu1 %v973_v19 }
  0x3b   : > { %599 = vmatpush.bf16.msra.mxu2 %v981_v20 }
  0x3d   : > { %562 = vmatpush.bf16.msra.mxu0 %v964_v21  ;;  %989 = vmatpush.bf16.msra.mxu3 %v964_v21 }
  0x3e   : > { %581 = vmatpush.bf16.msra.mxu1 %v972_v22 }
  0x3f   : > { %600 = vmatpush.bf16.msra.mxu2 %v980_v23 }
  0x41   : > { %563 = vmatpush.bf16.msra.mxu0 %v963_v24  ;;  %990 = vmatpush.bf16.msra.mxu3 %v963_v24 }
  0x42   : > { %582 = vmatpush.bf16.msra.mxu1 %v971_v25 }
  0x43   : > { %601 = vmatpush.bf16.msra.mxu2 %v979_v26 }
  0x45   : > { %564 = vmatpush.bf16.msra.mxu0 %v962_v27  ;;  %991 = vmatpush.bf16.msra.mxu3 %v962_v27 }
  0x46   : > { %583 = vmatpush.bf16.msra.mxu1 %v970_v28 }
  0x47   : > { %602 = vmatpush.bf16.msra.mxu2 %v978_v29 }
  0x49   : > { %565 = vmatpush.bf16.msra.mxu0 %v961_v30  ;;  %992 = vmatpush.bf16.msra.mxu3 %v961_v30 }
  0x4a   : > { %584 = vmatpush.bf16.msra.mxu1 %v969_v31 }
  0x4b   : > { %603 = vmatpush.bf16.msra.mxu2 %v977_v32 }
  0x4c   : > { %566 = vmatmul.bf16.vlgmr.msra.gmra.mxu0 %v833_v41  ;;  %571 = vmatmul.bf16.vlgmr.msra.gmra.mxu3 %v845_v44 }
  0x4d   : > { %585 = vmatmul.bf16.vlgmr.msra.gmra.mxu1 %v837_v42 }
  0x4e   : > { %604 = vmatmul.bf16.vlgmr.msra.gmra.mxu2 %v841_v43 }
  0x5d   : > { %590 = vmatmul.bf16.gmra.mxu1 %v849_v49 }
  0x5e   : > { %609 = vmatmul.bf16.gmra.mxu2 %v853_v50 }
  0xc9   : > { %v567_v52 = vpop.f32.mrf.mxu0 }
  0xca   : > { %v586_v51 = vpop.f32.mrf.mxu1 }
  0xcb   : > { %v587_v53 = vadd.f32 %v586_v51, %v567_v52 }
  0xcf   : > { %v572_v2 = vpop.f32.mrf.mxu3 }
  0xd1   : > { %v605_v55 = vpop.f32.mrf.mxu2  ;;  %v569_v59 = vpop.f32.mrf.mxu0 }
  0xd2   : > { %v606_v56 = vadd.f32 %v605_v55, %v587_v53  ;;  %v588_v57 = vpop.f32.mrf.mxu1 }
  0xd3   : > { %v589_v60 = vadd.f32 %v588_v57, %v569_v59 }
  0xd4   : > { %v615_v58 = vadd.f32 %v606_v56, %v322_v54 }
  0xd6   : > { %619 = vst [vmem:[#allocation2 + $0x10] sm:$0xff] %v615_v58 }
  0xd7   : > { %v574_v9 = vpop.f32.mrf.mxu3 }
  0xd9   : > { %v607_v62 = vpop.f32.mrf.mxu2 }
  0xda   : > { %v608_v63 = vadd.f32 %v607_v62, %v589_v60  ;;  %v591_v0 = vpop.f32.mrf.mxu1 }
  0xdb   : > { %v592_v3 = vadd.f32 %v591_v0, %v572_v2 }
  0xdc   : > { %v616_v1 = vadd.f32 %v608_v63, %v323_v61 }
  0xde   : > { %620 = vst [vmem:[#allocation2] sm:$0xff] %v616_v1 }
  0xe1   : > { %v610_v5 = vpop.f32.mrf.mxu2 }
  0xe2   : > { %v611_v6 = vadd.f32 %v610_v5, %v592_v3  ;;  %v593_v8 = vpop.f32.mrf.mxu1 }
  0xe3   : > { %v594_v10 = vadd.f32 %v593_v8, %v574_v9 }
  0xe4   : > { %v617_v7 = vadd.f32 %v611_v6, %v324_v4 }
  0xe6   : > { %621 = vst [vmem:[#allocation2 + $0x18] sm:$0xff] %v617_v7 }
  0xe9   : > { %v612_v12 = vpop.f32.mrf.mxu2 }
  0xea   : > { %v613_v13 = vadd.f32 %v612_v12, %v594_v10  ;;  %626 = sbr.rel (%p950_p11) target bundleno = 318 (0x13e), region = 70 }
  0xec   : > { %v618_v14 = vadd.f32 %v613_v13, %v325_v11 }
  0xee   : > { %622 = vst [vmem:[#allocation2 + $0x8] sm:$0xff] %v618_v14 }
  0xef   : > { %v627_v15 = vld [vmem:[#allocation2 + $0x10] sm:$0xff]  ;;  %v628_v16 = vld [vmem:[#allocation2] sm:$0xff]  ;;  %v629_v17 = vld [vmem:[#allocation2 + $0x18] sm:$0xff]  ;;  %v1084_v19 = vmov 32.0  }
  0xf0   : > { %v631_v18 = vadd.f32 %v628_v16, %v627_v15  ;;  %1039 = vrcp.f32 %v1084_v19  ;;  %v1037_v61 = vld [vmem:[%s1237_s2] ss:$0 sm:$0xff] }
  0xf1   : > { %v1038_v0 = vld [vmem:[%s1238_s3] ss:$0 sm:$0xff] }
  0xf2   : > { %v632_v21 = vadd.f32 %v631_v18, %v629_v17 }
  0xf5   : > { %v630_v20 = vld [vmem:[#allocation2 + $0x8] sm:$0xff] }
  0xf6   : > { %v633_v22 = vadd.f32 %v632_v21, %v630_v20  ;;  %v1040_v23 = vpop.eup %1039 }
  0xf7   : > { %v641_v25 = vmul.f32 32.0, %v1040_v23  ;;  %vm645_vm0 = vweird.f32 %v1040_v23 }
  0xf8   : > { %v634_v24 = vrot.slane %v633_v22, 4 }
  0xf9   : > { %v642_v27 = vsub.f32 1.0, %v641_v25 }
  0xfa   : > { %v635_v26 = vadd.f32 %v634_v24, %v633_v22 }
  0xfb   : > { %v643_v29 = vmul.f32 %v1040_v23, %v642_v27 }
  0xfc   : > { %v636_v28 = vrot.slane %v635_v26, 2 }
  0xfd   : > { %v644_v31 = vadd.f32 %v1040_v23, %v643_v29 }
  0xfe   : > { %v637_v30 = vadd.f32 %v636_v28, %v635_v26 }
  0xff   : > { %v646_v33 = vsel %vm645_vm0, %v1040_v23, %v644_v31 }
 0x100   : > { %v638_v32 = vrot.slane %v637_v30, 1 }
 0x102   : > { %v639_v34 = vadd.f32 %v638_v32, %v637_v30 }
 0x104   : > { %v647_v35 = vmul.f32 %v646_v33, %v639_v34 }
 0x106   : > { %v648_v36 = vsub.f32 %v627_v15, %v647_v35  ;;  %v649_v37 = vsub.f32 %v628_v16, %v647_v35  ;;  %v650_v38 = vsub.f32 %v629_v17, %v647_v35  ;;  %v651_v39 = vsub.f32 %v630_v20, %v647_v35 }
 0x108   : > { %v652_v40 = vmul.f32 %v648_v36, %v648_v36  ;;  %v653_v41 = vmul.f32 %v649_v37, %v649_v37  ;;  %v654_v42 = vmul.f32 %v650_v38, %v650_v38  ;;  %v655_v43 = vmul.f32 %v651_v39, %v651_v39 }
 0x10a   : > { %v656_v44 = vadd.f32 %v653_v41, %v652_v40 }
 0x10c   : > { %v657_v45 = vadd.f32 %v656_v44, %v654_v42 }
 0x10e   : > { %v658_v46 = vadd.f32 %v657_v45, %v655_v43 }
 0x110   : > { %v659_v47 = vrot.slane %v658_v46, 4 }
 0x112   : > { %v660_v48 = vadd.f32 %v659_v47, %v658_v46 }
 0x114   : > { %v661_v49 = vrot.slane %v660_v48, 2 }
 0x116   : > { %v662_v50 = vadd.f32 %v661_v49, %v660_v48 }
 0x118   : > { %v663_v51 = vrot.slane %v662_v50, 1 }
 0x11a   : > { %v664_v52 = vadd.f32 %v663_v51, %v662_v50 }
 0x11c   : > { %v665_v53 = vmul.f32 %v664_v52, %v646_v33 }
 0x11e   : > { %v666_v54 = vadd.f32 1e-05, %v665_v53 }
 0x120   : > { %1041 = vrsqrt.f32 %v666_v54  ;;  %vm673_vm1 = vweird.f32 %v666_v54 }
 0x126   : > { %v1042_v55 = vpop.eup %1041 }
 0x127   : > { %v668_v56 = vmul.f32 %v1042_v55, %v666_v54  ;;  %vm674_vm2 = vweird.f32 %v1042_v55 }
 0x128   : > { %vm675_vm3 = vmor %vm673_vm1, %vm674_vm2 }
 0x129   : > { %v669_v57 = vmul.f32 %v1042_v55, %v668_v56 }
 0x12b   : > { %v670_v58 = vmul.f32 0.5, %v669_v57 }
 0x12d   : > { %v671_v59 = vsub.f32 1.5, %v670_v58 }
 0x12f   : > { %v672_v60 = vmul.f32 %v1042_v55, %v671_v59 }
 0x131   : > { %v676_v62 = vsel %vm675_vm3, %v1042_v55, %v672_v60 }
 0x132   : > { %v677_v63 = vmul.f32 %v676_v62, %v648_v36  ;;  %v678_v1 = vmul.f32 %v676_v62, %v649_v37  ;;  %v679_v2 = vmul.f32 %v676_v62, %v650_v38  ;;  %v680_v3 = vmul.f32 %v676_v62, %v651_v39 }
 0x134   : > { %v685_v4 = vmul.f32 %v1037_v61, %v677_v63  ;;  %v686_v5 = vmul.f32 %v1037_v61, %v678_v1  ;;  %v687_v6 = vmul.f32 %v1037_v61, %v679_v2  ;;  %v688_v7 = vmul.f32 %v1037_v61, %v680_v3 }
 0x136   : > { %v693_v8 = vadd.f32 %v1038_v0, %v685_v4  ;;  %v694_v9 = vadd.f32 %v1038_v0, %v686_v5  ;;  %v695_v10 = vadd.f32 %v1038_v0, %v687_v6  ;;  %v696_v11 = vadd.f32 %v1038_v0, %v688_v7 }
 0x138   : > { %v697_v12 = vmax.f32 %v693_v8, 0.0  ;;  %v698_v13 = vmax.f32 %v694_v9, 0.0  ;;  %v699_v14 = vmax.f32 %v695_v10, 0.0  ;;  %v700_v15 = vmax.f32 %v696_v11, 0.0 }
 0x13a   : > { %701 = vst [vmem:[%s1239_s4] sm:$0xff] %v697_v12 }
 0x13b   : > { %702 = vst [vmem:[%s1239_s4 + $0x8] sm:$0xff] %v698_v13 }
 0x13c   : > { %703 = vst [vmem:[%s1239_s4 + $0x10] sm:$0xff] %v699_v14 }
 0x13d   : > { %704 = vst [vmem:[%s1239_s4 + $0x18] sm:$0xff] %v700_v15 }
 0x13e PF: > { %s14_s19 = sadd.s32 1, %s1081_s19   ;;  %s1240_s15 = smov %s1069_s16 }
 0x13f   : > { %p11_p12 = scmp.ge.s32.totalorder %s14_s19, 5   ;;  %s1241_s16 = smov %s1145_s23 }
 0x140   : > { %s1242_s17 = smov %s1077_s18  ;;  %s1243_s18 = smov %s1245_s20 }
 0x141   :  { %13 = sbr.rel (!%p11_p12) target bundleno = 3 (0x3), region = 120 }

// kernel: res_5_forward.13
= control target key start
LH: loop header
LB: loop body
LE: loop exit
PB: predicated region body
PF: predicated region fallthrough
CT: control target
= control target key end

     0   :  { %s1204_s18 = smov 0   ;;  %s1206_s19 = smov 0   ;;  %s1402_s0 = inlined_call_operand.vmem [shape: bf16[32,128], index: 0, kind: input, shape index: {}]   ;;  %s1403_s1 = inlined_call_operand.vmem [shape: bf16[128,512], index: 1, kind: input, shape index: {}]   ;;  %s1404_s2 = inlined_call_operand.vmem [shape: f32[1,512], index: 2, kind: input, shape index: {}]   ;;  %s1405_s3 = inlined_call_operand.vmem [shape: f32[1,512], index: 3, kind: input, shape index: {}]   ;;  %s1406_s4 = inlined_call_operand.vmem [shape: f32[32,512], index: 4, kind: input, shape index: {}]   ;;  %s1407_s5 = inlined_call_operand.vmem [shape: f32[32,512], index: 5, kind: output, shape index: {}]  }
   0x1   :  { %s1208_s20 = smov 0   ;;  %s1210_s21 = smov 0  }
   0x2   :  { %s1212_s22 = smov 0  }
   0x3 LB: > { %s27_s23 = sadd.s32 1, %s1167_s21  ;;  %s955_s24 = sadd.s32 4294967295, %s1171_s22   ;;  %s1171_s22 = sphi %s1212_s22, %s15_s22   ;;  %s1167_s21 = sphi %s1210_s21, %s1413_s21   ;;  %s1163_s20 = sphi %s1208_s20, %s1412_s20   ;;  %s1159_s19 = sphi %s1206_s19, %s1411_s19   ;;  %s1155_s18 = sphi %s1204_s18, %s1410_s18  }
   0x4   : > { %p29_p0 = scmp.ge.s32.totalorder %s27_s23, 2  ;;  %p69_p1 = scmp.ne.s32.totalorder %s1159_s19, %s1155_s18 }
   0x5   : > { %p70_p2 = scmp.eq.s32.totalorder %s1171_s22, 0  ;;  %p177_p4 = scmp.eq.s32.totalorder %s955_s24, 1 }
   0x6   : > { %s1415_s23 = smov (%p29_p0, %s27_s23), 0  ;;  %s62_s27 = sadd.s32 1, %s1159_s19 }
   0x7   : > { %p1236_p3 = por %p70_p2, %p69_p1  ;;  %s58_s26 = ssub.s32 %s1167_s21, %s1415_s23 }
   0x8   : > { %p60_p5 = scmp.eq.s32.totalorder %s58_s26, 0  ;;  %p1243_p6 = por %p177_p4, %p69_p1 }
   0x9   : > { %p959_p7 = scmp.ge.s32.totalorder %s1171_s22, 2 }
   0xa   : > { %s1248_s29 = scalar_select %p60_p5, %s1159_s19, %s62_s27  }
   0xb   : > { %206 = sbr.rel (%p959_p7) target bundleno = 48 (0x30), region = 20 }
  0x10   : > { %209 = sbr.rel (!%p1236_p3) target bundleno = 36 (0x24), region = 24  ;;  %s211_s30 = sand.u32 (%p1236_p3), 1, %s1159_s19  }
  0x11   : > { %s1049_s6 = sshll.u32 (%p1236_p3), %s1167_s21, 3  ;;  %s960_s7 = sshll.u32 (%p1236_p3), %s211_s30, 7 }
  0x12   : > { %s1258_s10 = scalar_lea.vmem (%p1236_p3), %s1403_s1, %s1049_s6  ;;  %s213_s11 = scalar_lea.vmem (%p1236_p3), [#allocation3], %s960_s7 }
  0x13   : > { %v278_v0 = vld [vmem:[%s1258_s10] sm:$0xff] (%p1236_p3)  ;;  %v280_v1 = vld [vmem:[%s1258_s10 + $0x10] sm:$0xff] (%p1236_p3) }
  0x14   : > { %v282_v2 = vld [vmem:[%s1258_s10 + $0x20] sm:$0xff] (%p1236_p3)  ;;  %279 = vst [vmem:[%s213_s11] sm:$0xff] (%p1236_p3), %v278_v0  ;;  %v284_v3 = vld [vmem:[%s1258_s10 + $0x30] sm:$0xff] (%p1236_p3) }
  0x15   : > { %281 = vst [vmem:[%s213_s11 + $0x8] sm:$0xff] %v280_v1  ;;  %v286_v4 = vld [vmem:[%s1258_s10 + $0x40] sm:$0xff]  ;;  %v288_v5 = vld [vmem:[%s1258_s10 + $0x50] sm:$0xff] }
  0x16   : > { %283 = vst [vmem:[%s213_s11 + $0x10] sm:$0xff] %v282_v2  ;;  %v290_v6 = vld [vmem:[%s1258_s10 + $0x60] sm:$0xff]  ;;  %v292_v7 = vld [vmem:[%s1258_s10 + $0x70] sm:$0xff] }
  0x17   : > { %285 = vst [vmem:[%s213_s11 + $0x18] sm:$0xff] %v284_v3  ;;  %v294_v8 = vld [vmem:[%s1258_s10 + $0x80] sm:$0xff]  ;;  %v296_v9 = vld [vmem:[%s1258_s10 + $0x90] sm:$0xff] }
  0x18   : > { %287 = vst [vmem:[%s213_s11 + $0x20] sm:$0xff] %v286_v4  ;;  %v298_v10 = vld [vmem:[%s1258_s10 + $0xa0] sm:$0xff]  ;;  %v300_v11 = vld [vmem:[%s1258_s10 + $0xb0] sm:$0xff] }
  0x19   : > { %289 = vst [vmem:[%s213_s11 + $0x28] sm:$0xff] %v288_v5  ;;  %v302_v12 = vld [vmem:[%s1258_s10 + $0xc0] sm:$0xff]  ;;  %v304_v13 = vld [vmem:[%s1258_s10 + $0xd0] sm:$0xff] }
  0x1a   : > { %291 = vst [vmem:[%s213_s11 + $0x30] sm:$0xff] %v290_v6  ;;  %v306_v14 = vld [vmem:[%s1258_s10 + $0xe0] sm:$0xff]  ;;  %v308_v15 = vld [vmem:[%s1258_s10 + $0xf0] sm:$0xff] }
  0x1b   : > { %293 = vst [vmem:[%s213_s11 + $0x38] sm:$0xff] %v292_v7 }
  0x1c   : > { %295 = vst [vmem:[%s213_s11 + $0x40] sm:$0xff] %v294_v8 }
  0x1d   : > { %297 = vst [vmem:[%s213_s11 + $0x48] sm:$0xff] %v296_v9 }
  0x1e   : > { %299 = vst [vmem:[%s213_s11 + $0x50] sm:$0xff] %v298_v10 }
  0x1f   : > { %301 = vst [vmem:[%s213_s11 + $0x58] sm:$0xff] %v300_v11 }
  0x20   : > { %303 = vst [vmem:[%s213_s11 + $0x60] sm:$0xff] %v302_v12 }
  0x21   : > { %305 = vst [vmem:[%s213_s11 + $0x68] sm:$0xff] %v304_v13 }
  0x22   : > { %307 = vst [vmem:[%s213_s11 + $0x70] sm:$0xff] %v306_v14 }
  0x23   : > { %309 = vst [vmem:[%s213_s11 + $0x78] sm:$0xff] %v308_v15 }
  0x24 PF: > { %331 = sbr.rel (!%p1236_p3) target bundleno = 48 (0x30), region = 70  ;;  %s333_s12 = sand.u32 (%p1236_p3), 1, %s1159_s19  }
  0x25   : > { %s1050_s13 = sshll.u32 (%p1236_p3), %s1167_s21, 4  ;;  %s963_s14 = sshll.u32 (%p1236_p3), %s333_s12, 6 }
  0x26   : > { %s338_s17 = scalar_lea.vmem (%p1236_p3), %s1406_s4, %s1050_s13  ;;  %s335_s24 = scalar_lea.vmem (%p1236_p3), [#allocation4], %s963_s14 }
  0x27   : > { %v351_v16 = vld [vmem:[%s338_s17] sm:$0xff] (%p1236_p3)  ;;  %v353_v17 = vld [vmem:[%s338_s17 + $0x8] sm:$0xff] (%p1236_p3) }
  0x28   : > { %v355_v18 = vld [vmem:[%s338_s17 + $0x20] sm:$0xff] (%p1236_p3)  ;;  %352 = vst [vmem:[%s335_s24] sm:$0xff] (%p1236_p3), %v351_v16  ;;  %v357_v19 = vld [vmem:[%s338_s17 + $0x28] sm:$0xff] (%p1236_p3) }
  0x29   : > { %354 = vst [vmem:[%s335_s24 + $0x8] sm:$0xff] %v353_v17  ;;  %v359_v20 = vld [vmem:[%s338_s17 + $0x40] sm:$0xff]  ;;  %v361_v21 = vld [vmem:[%s338_s17 + $0x48] sm:$0xff] }
  0x2a   : > { %356 = vst [vmem:[%s335_s24 + $0x10] sm:$0xff] %v355_v18  ;;  %v363_v22 = vld [vmem:[%s338_s17 + $0x60] sm:$0xff]  ;;  %v365_v23 = vld [vmem:[%s338_s17 + $0x68] sm:$0xff] }
  0x2b   : > { %358 = vst [vmem:[%s335_s24 + $0x18] sm:$0xff] %v357_v19 }
  0x2c   : > { %360 = vst [vmem:[%s335_s24 + $0x20] sm:$0xff] %v359_v20 }
  0x2d   : > { %362 = vst [vmem:[%s335_s24 + $0x28] sm:$0xff] %v361_v21 }
  0x2e   : > { %364 = vst [vmem:[%s335_s24 + $0x30] sm:$0xff] %v363_v22 }
  0x2f   : > { %366 = vst [vmem:[%s335_s24 + $0x38] sm:$0xff] %v365_v23 }
  0x30 PF: > { %p966_p8 = scmp.ge.s32.totalorder %s1171_s22, 1  ;;  %p371_p9 = scmp.lt.s32.totalorder %s1171_s22, 3 }
  0x32   : > { %p372_p10 = pnand %p966_p8, %p371_p9 }
  0x33   : > { %s378_s25 = sand.u32 (!%p372_p10), 1, %s1155_s18   ;;  %s970_s9 = sshll.u32 (!%p372_p10), %s1163_s20, 1 }
  0x34   : > { %375 = sbr.rel (%p372_p10) target bundleno = 317 (0x13d), region = 93  ;;  %s967_s26 = sshll.u32 (!%p372_p10), %s378_s25, 7 }
  0x35   : > { %s1288_s27 = scalar_lea.vmem (!%p372_p10), [#allocation3], %s967_s26  ;;  %p434_p11 = scmp.lt.s32.totalorder (!%p372_p10), %s970_s9, 3 }
  0x36   : > { %s1369_s16 = sshll.u32 (!%p372_p10), %s378_s25, 6 }
  0x37   : > { %s387_s18 = scalar_lea.vmem (!%p372_p10), [#allocation4], %s1369_s16  ;;  %s426_s17 = scalar_lea.vmem (!%p372_p10), [#allocation5], %s1369_s16 }
  0x39   : > { %v1038_v24 = vld [vmem:[%s1288_s27 + $0x70] sm:$0xf]  ;;  %v1068_v25 = vld [vmem:[%s1288_s27 + $0x74] sm:$0xf0]  ;;  %v1067_v26 = vld [vmem:[%s1288_s27 + $0x74] sm:$0xf] }
  0x3a   : > { %v1039_v27 = vor.u32 %v1068_v25, %v1038_v24  ;;  %v1040_v28 = vld [vmem:[%s1288_s27 + $0x78] sm:$0xf0]  ;;  %v1030_v29 = vld [vmem:[%s1288_s27 + $0x60] sm:$0xf]  ;;  %v1066_v30 = vld [vmem:[%s1288_s27 + $0x64] sm:$0xf0] }
  0x3b   : > { %v1043_v31 = vor.u32 %v1067_v26, %v1040_v28  ;;  %v1065_v32 = vld [vmem:[%s1288_s27 + $0x64] sm:$0xf]  ;;  %v1032_v33 = vld [vmem:[%s1288_s27 + $0x68] sm:$0xf0]  ;;  %v1031_v34 = vor.u32 %v1066_v30, %v1030_v29  ;;  %v1022_v36 = vld [vmem:[%s1288_s27 + $0x50] sm:$0xf] }
  0x3c   : > { %577 = vmatpush.bf16.msra.mxu0 %v1039_v27  ;;  %1070 = vmatpush.bf16.msra.mxu2 %v1039_v27  ;;  %v1035_v35 = vor.u32 %v1065_v32, %v1032_v33  ;;  %v1064_v37 = vld [vmem:[%s1288_s27 + $0x54] sm:$0xf0]  ;;  %v1063_v38 = vld [vmem:[%s1288_s27 + $0x54] sm:$0xf]  ;;  %v1024_v39 = vld [vmem:[%s1288_s27 + $0x58] sm:$0xf0] }
  0x3d   : > { %596 = vmatpush.bf16.msra.mxu1 %v1043_v31  ;;  %1078 = vmatpush.bf16.msra.mxu3 %v1043_v31  ;;  %v1023_v40 = vor.u32 %v1064_v37, %v1022_v36  ;;  %v1027_v41 = vor.u32 %v1063_v38, %v1024_v39  ;;  %v1014_v42 = vld [vmem:[%s1288_s27 + $0x40] sm:$0xf]  ;;  %v1062_v43 = vld [vmem:[%s1288_s27 + $0x44] sm:$0xf0]  ;;  %v1061_v44 = vld [vmem:[%s1288_s27 + $0x44] sm:$0xf] }
  0x3e   : > { %v1016_v45 = vld [vmem:[%s1288_s27 + $0x48] sm:$0xf0]  ;;  %v1015_v46 = vor.u32 %v1062_v43, %v1014_v42  ;;  %v1006_v48 = vld [vmem:[%s1288_s27 + $0x30] sm:$0xf]  ;;  %v1060_v49 = vld [vmem:[%s1288_s27 + $0x34] sm:$0xf0] }
  0x3f   : > { %v1019_v47 = vor.u32 %v1061_v44, %v1016_v45  ;;  %v1059_v50 = vld [vmem:[%s1288_s27 + $0x34] sm:$0xf]  ;;  %v1008_v51 = vld [vmem:[%s1288_s27 + $0x38] sm:$0xf0]  ;;  %v1007_v52 = vor.u32 %v1060_v49, %v1006_v48  ;;  %v998_v54 = vld [vmem:[%s1288_s27 + $0x20] sm:$0xf] }
  0x40   : > { %578 = vmatpush.bf16.msra.mxu0 %v1031_v34  ;;  %1071 = vmatpush.bf16.msra.mxu2 %v1031_v34  ;;  %v1011_v53 = vor.u32 %v1059_v50, %v1008_v51  ;;  %v1058_v55 = vld [vmem:[%s1288_s27 + $0x24] sm:$0xf0]  ;;  %v1057_v56 = vld [vmem:[%s1288_s27 + $0x24] sm:$0xf]  ;;  %v1000_v57 = vld [vmem:[%s1288_s27 + $0x28] sm:$0xf0] }
  0x41   : > { %597 = vmatpush.bf16.msra.mxu1 %v1035_v35  ;;  %1079 = vmatpush.bf16.msra.mxu3 %v1035_v35  ;;  %v999_v58 = vor.u32 %v1058_v55, %v998_v54  ;;  %v1003_v59 = vor.u32 %v1057_v56, %v1000_v57  ;;  %v990_v60 = vld [vmem:[%s1288_s27 + $0x10] sm:$0xf]  ;;  %v1056_v61 = vld [vmem:[%s1288_s27 + $0x14] sm:$0xf0]  ;;  %v1055_v62 = vld [vmem:[%s1288_s27 + $0x14] sm:$0xf] }
  0x42   : > { %v992_v63 = vld [vmem:[%s1288_s27 + $0x18] sm:$0xf0]  ;;  %v991_v0 = vor.u32 %v1056_v61, %v990_v60  ;;  %v982_v2 = vld [vmem:[%s1288_s27] sm:$0xf]  ;;  %v1054_v3 = vld [vmem:[%s1288_s27 + $0x4] sm:$0xf0] }
  0x43   : > { %v995_v1 = vor.u32 %v1055_v62, %v992_v63  ;;  %v1053_v4 = vld [vmem:[%s1288_s27 + $0x4] sm:$0xf]  ;;  %v984_v5 = vld [vmem:[%s1288_s27 + $0x8] sm:$0xf0]  ;;  %v983_v6 = vor.u32 %v1054_v3, %v982_v2  ;;  %v1173_v12 = vmov 32.0   ;;  %s1417_s9 = smov (!%p434_p11, %s970_s9), 3 }
  0x44   : > { %579 = vmatpush.bf16.msra.mxu0 %v1023_v40  ;;  %1072 = vmatpush.bf16.msra.mxu2 %v1023_v40  ;;  %v987_v7 = vor.u32 %v1053_v4, %v984_v5  ;;  %v1051_v8 = vld [vmem:[%s1402_s0] sm:$0xff]  ;;  %v1052_v9 = vld [vmem:[%s1402_s0 + $0x8] sm:$0xff]  ;;  %1127 = vrcp.f32 %v1173_v12  ;;  %s436_s12 = scalar_lea.vmem %s1404_s2, %s1417_s9  ;;  %s441_s15 = scalar_lea.vmem %s1405_s3, %s1417_s9 }
  0x45   : > { %598 = vmatpush.bf16.msra.mxu1 %v1027_v41  ;;  %1080 = vmatpush.bf16.msra.mxu3 %v1027_v41  ;;  %s1069_s24 = sshll.u32 (%p1243_p6), %s1163_s20, 4 }
  0x46   : > { %s804_s27 = scalar_lea.vmem (%p1243_p6), %s1407_s5, %s1069_s24 }
  0x48   : > { %580 = vmatpush.bf16.msra.mxu0 %v1015_v46  ;;  %1073 = vmatpush.bf16.msra.mxu2 %v1015_v46 }
  0x49   : > { %599 = vmatpush.bf16.msra.mxu1 %v1019_v47  ;;  %1081 = vmatpush.bf16.msra.mxu3 %v1019_v47 }
  0x4a   : > { %v1128_v14 = vpop.eup %1127 }
  0x4b   : > { %v661_v20 = vmul.f32 32.0, %v1128_v14  ;;  %vm665_vm0 = vweird.f32 %v1128_v14 }
  0x4c   : > { %581 = vmatpush.bf16.msra.mxu0 %v1007_v52  ;;  %1074 = vmatpush.bf16.msra.mxu2 %v1007_v52 }
  0x4d   : > { %600 = vmatpush.bf16.msra.mxu1 %v1011_v53  ;;  %1082 = vmatpush.bf16.msra.mxu3 %v1011_v53  ;;  %v662_v23 = vsub.f32 1.0, %v661_v20 }
  0x4f   : > { %v663_v29 = vmul.f32 %v1128_v14, %v662_v23 }
  0x50   : > { %582 = vmatpush.bf16.msra.mxu0 %v999_v58  ;;  %1075 = vmatpush.bf16.msra.mxu2 %v999_v58 }
  0x51   : > { %601 = vmatpush.bf16.msra.mxu1 %v1003_v59  ;;  %1083 = vmatpush.bf16.msra.mxu3 %v1003_v59  ;;  %v664_v34 = vadd.f32 %v1128_v14, %v663_v29  ;;  %v749_v29 = vld [vmem:[%s441_s15] sm:$0x3] }
  0x53   : > { %v666_v39 = vsel %vm665_vm0, %v1128_v14, %v664_v34 }
  0x54   : > { %583 = vmatpush.bf16.msra.mxu0 %v991_v0  ;;  %1076 = vmatpush.bf16.msra.mxu2 %v991_v0 }
  0x55   : > { %602 = vmatpush.bf16.msra.mxu1 %v995_v1  ;;  %1084 = vmatpush.bf16.msra.mxu3 %v995_v1 }
  0x58   : > { %584 = vmatpush.bf16.msra.mxu0 %v983_v6  ;;  %1077 = vmatpush.bf16.msra.mxu2 %v983_v6 }
  0x59   : > { %603 = vmatpush.bf16.msra.mxu1 %v987_v7  ;;  %1085 = vmatpush.bf16.msra.mxu3 %v987_v7 }
  0x5b   : > { %585 = vmatmul.bf16.vlgmr.msra.gmra.mxu0 %v1051_v8  ;;  %590 = vmatmul.bf16.vlgmr.msra.gmra.mxu2 %v1052_v9 }
  0x5c   : > { %604 = vmatmul.bf16.vlgmr.msra.gmra.mxu1 %v1051_v8  ;;  %609 = vmatmul.bf16.vlgmr.msra.gmra.mxu3 %v1052_v9 }
  0xd8   : > { %v586_v10 = vpop.f32.mrf.mxu0 }
  0xd9   : > { %v605_v11 = vpop.f32.mrf.mxu1 }
  0xde   : > { %v591_v13 = vpop.f32.mrf.mxu2 }
  0xdf   : > { %v610_v15 = vpop.f32.mrf.mxu3 }
  0xe0   : > { %v588_v16 = vpop.f32.mrf.mxu0 }
  0xe1   : > { %v642_v17 = vadd.f32 %v588_v16, %v586_v10  ;;  %v607_v18 = vpop.f32.mrf.mxu1 }
  0xe2   : > { %v651_v19 = vadd.f32 %v607_v18, %v605_v11 }
  0xe3   : > { %v643_v21 = vadd.f32 %v642_v17, %v591_v13 }
  0xe4   : > { %v652_v24 = vadd.f32 %v651_v19, %v610_v15 }
  0xe6   : > { %v593_v22 = vpop.f32.mrf.mxu2 }
  0xe7   : > { %v644_v25 = vadd.f32 %v643_v21, %v593_v22  ;;  %v612_v26 = vpop.f32.mrf.mxu3 }
  0xe8   : > { %v653_v27 = vadd.f32 %v652_v24, %v612_v26 }
  0xe9   : > { %v645_v28 = vrot.slane %v644_v25, 4 }
  0xea   : > { %v654_v30 = vrot.slane %v653_v27, 4 }
  0xeb   : > { %v646_v31 = vadd.f32 %v645_v28, %v644_v25  ;;  %v735_v28 = vld [vmem:[%s436_s12] sm:$0x3] }
  0xec   : > { %v655_v32 = vadd.f32 %v654_v30, %v653_v27 }
  0xed   : > { %v647_v33 = vrot.slane %v646_v31, 2 }
  0xee   : > { %v656_v35 = vrot.slane %v655_v32, 2 }
  0xef   : > { %v648_v36 = vadd.f32 %v647_v33, %v646_v31 }
  0xf0   : > { %v657_v37 = vadd.f32 %v656_v35, %v655_v32  ;;  %v737_v32 = vperm.slane %v735_v28, 0  ;;  %v751_v35 = vperm.slane %v749_v29, 0 }
  0xf1   : > { %v649_v38 = vrot.slane %v648_v36, 1 }
  0xf2   : > { %v658_v40 = vrot.slane %v657_v37, 1 }
  0xf3   : > { %v650_v41 = vadd.f32 %v649_v38, %v648_v36 }
  0xf4   : > { %v659_v42 = vadd.f32 %v658_v40, %v657_v37 }
  0xf5   : > { %v667_v43 = vmul.f32 %v666_v39, %v650_v41  ;;  %v738_v41 = vperm.slane %v735_v28, 1 }
  0xf6   : > { %v668_v44 = vmul.f32 %v666_v39, %v659_v42  ;;  %v752_v42 = vperm.slane %v749_v29, 1 }
  0xf7   : > { %v1328_v45 = vsub.f32 %v586_v10, %v667_v43  ;;  %v1330_v46 = vsub.f32 %v588_v16, %v667_v43  ;;  %v1332_v47 = vsub.f32 %v591_v13, %v667_v43  ;;  %v1340_v51 = vsub.f32 %v593_v22, %v667_v43 }
  0xf8   : > { %v1334_v48 = vsub.f32 %v605_v11, %v668_v44  ;;  %v1336_v49 = vsub.f32 %v607_v18, %v668_v44  ;;  %v1338_v50 = vsub.f32 %v610_v15, %v668_v44  ;;  %v1346_v54 = vsub.f32 %v612_v26, %v668_v44 }
  0xf9   : > { %v677_v52 = vmul.f32 %v1328_v45, %v1328_v45  ;;  %v679_v53 = vmul.f32 %v1330_v46, %v1330_v46  ;;  %v681_v57 = vmul.f32 %v1332_v47, %v1332_v47  ;;  %v683_v61 = vmul.f32 %v1340_v51, %v1340_v51 }
  0xfa   : > { %v678_v55 = vmul.f32 %v1334_v48, %v1334_v48  ;;  %v680_v56 = vmul.f32 %v1336_v49, %v1336_v49  ;;  %v682_v59 = vmul.f32 %v1338_v50, %v1338_v50  ;;  %v684_v63 = vmul.f32 %v1346_v54, %v1346_v54 }
  0xfb   : > { %v685_v58 = vadd.f32 %v679_v53, %v677_v52 }
  0xfc   : > { %v694_v60 = vadd.f32 %v680_v56, %v678_v55  ;;  %v763_v55 = vld [vmem:[%s387_s18] sm:$0xff]  ;;  %v765_v56 = vld [vmem:[%s387_s18 + $0x10] sm:$0xff] }
  0xfd   : > { %v686_v62 = vadd.f32 %v685_v58, %v681_v57  ;;  %v767_v57 = vld [vmem:[%s387_s18 + $0x20] sm:$0xff]  ;;  %v769_v58 = vld [vmem:[%s387_s18 + $0x30] sm:$0xff] }
  0xfe   : > { %v695_v0 = vadd.f32 %v694_v60, %v682_v59 }
  0xff   : > { %v687_v1 = vadd.f32 %v686_v62, %v683_v61 }
 0x100   : > { %v696_v2 = vadd.f32 %v695_v0, %v684_v63 }
 0x101   : > { %v688_v3 = vrot.slane %v687_v1, 4 }
 0x102   : > { %v697_v4 = vrot.slane %v696_v2, 4 }
 0x103   : > { %v689_v5 = vadd.f32 %v688_v3, %v687_v1  ;;  %v764_v3 = vld [vmem:[%s387_s18 + $0x8] sm:$0xff] }
 0x104   : > { %v698_v6 = vadd.f32 %v697_v4, %v696_v2 }
 0x105   : > { %v690_v7 = vrot.slane %v689_v5, 2 }
 0x106   : > { %v699_v8 = vrot.slane %v698_v6, 2 }
 0x107   : > { %v691_v9 = vadd.f32 %v690_v7, %v689_v5 }
 0x108   : > { %v700_v10 = vadd.f32 %v699_v8, %v698_v6  ;;  %v770_v8 = vld [vmem:[%s387_s18 + $0x38] sm:$0xff] }
 0x109   : > { %v692_v11 = vrot.slane %v691_v9, 1 }
 0x10a   : > { %v701_v12 = vrot.slane %v700_v10, 1 }
 0x10b   : > { %v693_v13 = vadd.f32 %v692_v11, %v691_v9 }
 0x10c   : > { %v702_v14 = vadd.f32 %v701_v12, %v700_v10 }
 0x10d   : > { %v703_v15 = vmul.f32 %v693_v13, %v666_v39 }
 0x10e   : > { %v704_v16 = vmul.f32 %v702_v14, %v666_v39 }
 0x10f   : > { %v705_v17 = vadd.f32 1e-05, %v703_v15 }
 0x110   : > { %v706_v18 = vadd.f32 1e-05, %v704_v16 }
 0x111   : > { %1129 = vrsqrt.f32 %v705_v17  ;;  %vm713_vm2 = vweird.f32 %v705_v17 }
 0x112   : > { %1131 = vrsqrt.f32 %v706_v18  ;;  %vm723_vm5 = vweird.f32 %v706_v18 }
 0x117   : > { %v1130_v19 = vpop.eup %1129 }
 0x118   : > { %v1132_v20 = vpop.eup %1131  ;;  %v708_v21 = vmul.f32 %v1130_v19, %v705_v17  ;;  %vm714_vm1 = vweird.f32 %v1130_v19 }
 0x119   : > { %v718_v22 = vmul.f32 %v1132_v20, %v706_v18  ;;  %vm724_vm3 = vweird.f32 %v1132_v20  ;;  %vm715_vm4 = vmor %vm713_vm2, %vm714_vm1 }
 0x11a   : > { %v709_v23 = vmul.f32 %v1130_v19, %v708_v21  ;;  %vm725_vm6 = vmor %vm723_vm5, %vm724_vm3 }
 0x11b   : > { %v719_v24 = vmul.f32 %v1132_v20, %v718_v22 }
 0x11c   : > { %v710_v25 = vmul.f32 0.5, %v709_v23 }
 0x11d   : > { %v720_v26 = vmul.f32 0.5, %v719_v24 }
 0x11e   : > { %v711_v27 = vsub.f32 1.5, %v710_v25 }
 0x11f   : > { %v721_v30 = vsub.f32 1.5, %v720_v26 }
 0x120   : > { %v712_v31 = vmul.f32 %v1130_v19, %v711_v27 }
 0x121   : > { %v722_v33 = vmul.f32 %v1132_v20, %v721_v30 }
 0x122   : > { %v716_v34 = vsel %vm715_vm4, %v1130_v19, %v712_v31 }
 0x123   : > { %v727_v36 = vmul.f32 %v716_v34, %v1328_v45  ;;  %v729_v37 = vmul.f32 %v716_v34, %v1330_v46  ;;  %v731_v38 = vmul.f32 %v716_v34, %v1332_v47  ;;  %v733_v39 = vmul.f32 %v716_v34, %v1340_v51 }
 0x124   : > { %v726_v40 = vsel %vm725_vm6, %v1132_v20, %v722_v33 }
 0x125   : > { %v741_v43 = vmul.f32 %v737_v32, %v727_v36  ;;  %v743_v44 = vmul.f32 %v737_v32, %v729_v37  ;;  %v745_v52 = vmul.f32 %v737_v32, %v731_v38  ;;  %v747_v53 = vmul.f32 %v737_v32, %v733_v39 }
 0x126   : > { %v728_v45 = vmul.f32 %v726_v40, %v1334_v48  ;;  %v730_v46 = vmul.f32 %v726_v40, %v1336_v49  ;;  %v732_v47 = vmul.f32 %v726_v40, %v1338_v50  ;;  %v734_v51 = vmul.f32 %v726_v40, %v1346_v54  ;;  %v766_v48 = vld [vmem:[%s387_s18 + $0x18] sm:$0xff]  ;;  %v768_v49 = vld [vmem:[%s387_s18 + $0x28] sm:$0xff] }
 0x127   : > { %v755_v59 = vadd.f32 %v751_v35, %v741_v43  ;;  %v757_v60 = vadd.f32 %v751_v35, %v743_v44  ;;  %v759_v61 = vadd.f32 %v751_v35, %v745_v52  ;;  %v761_v62 = vadd.f32 %v751_v35, %v747_v53 }
 0x128   : > { %v742_v63 = vmul.f32 %v738_v41, %v728_v45  ;;  %v744_v0 = vmul.f32 %v738_v41, %v730_v46  ;;  %v746_v1 = vmul.f32 %v738_v41, %v732_v47  ;;  %v748_v2 = vmul.f32 %v738_v41, %v734_v51 }
 0x129   : > { %v771_v4 = vadd.f32 %v763_v55, %v755_v59  ;;  %v773_v5 = vadd.f32 %v765_v56, %v757_v60  ;;  %v775_v6 = vadd.f32 %v767_v57, %v759_v61  ;;  %v777_v7 = vadd.f32 %v769_v58, %v761_v62 }
 0x12a   : > { %v756_v50 = vadd.f32 %v752_v42, %v742_v63  ;;  %v758_v9 = vadd.f32 %v752_v42, %v744_v0  ;;  %v760_v54 = vadd.f32 %v752_v42, %v746_v1  ;;  %v762_v10 = vadd.f32 %v752_v42, %v748_v2 }
 0x12b   : > { %v779_v11 = vmax.f32 %v771_v4, 0.0  ;;  %v781_v12 = vmax.f32 %v773_v5, 0.0  ;;  %v783_v13 = vmax.f32 %v775_v6, 0.0  ;;  %v785_v14 = vmax.f32 %v777_v7, 0.0 }
 0x12c   : > { %v772_v15 = vadd.f32 %v764_v3, %v756_v50  ;;  %v774_v16 = vadd.f32 %v766_v48, %v758_v9  ;;  %v776_v17 = vadd.f32 %v768_v49, %v760_v54  ;;  %v778_v18 = vadd.f32 %v770_v8, %v762_v10 }
 0x12d   : > { %787 = vst [vmem:[%s426_s17] sm:$0xff] %v779_v11 }
 0x12e   : > { %789 = vst [vmem:[%s426_s17 + $0x10] sm:$0xff] %v781_v12  ;;  %v780_v19 = vmax.f32 %v772_v15, 0.0  ;;  %v782_v20 = vmax.f32 %v774_v16, 0.0  ;;  %v784_v21 = vmax.f32 %v776_v17, 0.0  ;;  %v786_v22 = vmax.f32 %v778_v18, 0.0 }
 0x12f   : > { %791 = vst [vmem:[%s426_s17 + $0x20] sm:$0xff] %v783_v13 }
 0x130   : > { %793 = vst [vmem:[%s426_s17 + $0x30] sm:$0xff] %v785_v14  ;;  %801 = sbr.rel (!%p1243_p6) target bundleno = 317 (0x13d), region = 113 }
 0x131   : > { %788 = vst [vmem:[%s426_s17 + $0x8] sm:$0xff] %v780_v19 }
 0x132   : > { %790 = vst [vmem:[%s426_s17 + $0x18] sm:$0xff] %v782_v20 }
 0x133   : > { %792 = vst [vmem:[%s426_s17 + $0x28] sm:$0xff] %v784_v21 }
 0x134   : > { %794 = vst [vmem:[%s426_s17 + $0x38] sm:$0xff] %v786_v22  ;;  %v817_v23 = vld [vmem:[%s426_s17] sm:$0xff] (%p1243_p6) }
 0x135   : > { %v821_v25 = vld [vmem:[%s426_s17 + $0x10] sm:$0xff]  ;;  %818 = vst [vmem:[%s804_s27] sm:$0xff] %v817_v23 }
 0x136   : > { %v825_v27 = vld [vmem:[%s426_s17 + $0x20] sm:$0xff]  ;;  %822 = vst [vmem:[%s804_s27 + $0x20] sm:$0xff] %v821_v25 }
 0x137   : > { %v829_v29 = vld [vmem:[%s426_s17 + $0x30] sm:$0xff]  ;;  %826 = vst [vmem:[%s804_s27 + $0x40] sm:$0xff] %v825_v27 }
 0x138   : > { %v819_v24 = vld [vmem:[%s426_s17 + $0x8] sm:$0xff]  ;;  %830 = vst [vmem:[%s804_s27 + $0x60] sm:$0xff] %v829_v29 }
 0x139   : > { %v823_v26 = vld [vmem:[%s426_s17 + $0x18] sm:$0xff]  ;;  %820 = vst [vmem:[%s804_s27 + $0x8] sm:$0xff] %v819_v24 }
 0x13a   : > { %v827_v28 = vld [vmem:[%s426_s17 + $0x28] sm:$0xff]  ;;  %824 = vst [vmem:[%s804_s27 + $0x28] sm:$0xff] %v823_v26 }
 0x13b   : > { %v831_v30 = vld [vmem:[%s426_s17 + $0x38] sm:$0xff]  ;;  %828 = vst [vmem:[%s804_s27 + $0x48] sm:$0xff] %v827_v28 }
 0x13c   : > { %832 = vst [vmem:[%s804_s27 + $0x68] sm:$0xff] %v831_v30 }
 0x13d PF: > { %s15_s22 = sadd.s32 1, %s1171_s22   ;;  %s1410_s18 = smov %s1159_s19 }
 0x13e   : > { %p12_p12 = scmp.ge.s32.totalorder %s15_s22, 4   ;;  %s1411_s19 = smov %s1248_s29 }
 0x13f   : > { %s1412_s20 = smov %s1167_s21  ;;  %s1413_s21 = smov %s1415_s23 }
 0x140   :  { %14 = sbr.rel (!%p12_p12) target bundleno = 3 (0x3), region = 184 }

// kernel: res_5_forward.12
= control target key start
LH: loop header
LB: loop body
LE: loop exit
PB: predicated region body
PF: predicated region fallthrough
CT: control target
= control target key end

     0   :  { %s1355_s15 = smov 0   ;;  %s1357_s16 = smov 0   ;;  %s1654_s0 = inlined_call_operand.vmem [shape: bf16[32,256], index: 0, kind: input, shape index: {}]   ;;  %s1655_s1 = inlined_call_operand.vmem [shape: bf16[256,512], index: 1, kind: input, shape index: {}]   ;;  %s1656_s2 = inlined_call_operand.vmem [shape: f32[1,512], index: 2, kind: input, shape index: {}]   ;;  %s1657_s3 = inlined_call_operand.vmem [shape: f32[1,512], index: 3, kind: input, shape index: {}]   ;;  %s1658_s4 = inlined_call_operand.vmem [shape: f32[32,512], index: 4, kind: output, shape index: {}]  }
   0x1   :  { %s1359_s17 = smov 0   ;;  %s1361_s18 = smov 0  }
   0x2   :  { %s1363_s19 = smov 0  }
   0x3 LB: > { %s26_s20 = sadd.s32 1, %s1323_s18  ;;  %s1042_s21 = sadd.s32 4294967295, %s1327_s19   ;;  %s1327_s19 = sphi %s1363_s19, %s14_s19   ;;  %s1323_s18 = sphi %s1361_s18, %s1663_s18   ;;  %s1319_s17 = sphi %s1359_s17, %s1662_s17   ;;  %s1315_s16 = sphi %s1357_s16, %s1661_s16   ;;  %s1311_s15 = sphi %s1355_s15, %s1660_s15  }
   0x4   : > { %p28_p0 = scmp.ge.s32.totalorder %s26_s20, 2  ;;  %p68_p1 = scmp.ne.s32.totalorder %s1315_s16, %s1311_s15 }
   0x5   : > { %p69_p2 = scmp.eq.s32.totalorder %s1327_s19, 0  ;;  %p150_p4 = scmp.eq.s32.totalorder %s1042_s21, 1 }
   0x6   : > { %s1665_s20 = smov (%p28_p0, %s26_s20), 0  ;;  %s61_s23 = sadd.s32 1, %s1315_s16 }
   0x7   : > { %p70_p3 = por %p69_p2, %p68_p1  ;;  %s57_s22 = ssub.s32 %s1323_s18, %s1665_s20 }
   0x8   : > { %p59_p5 = scmp.eq.s32.totalorder %s57_s22, 0  ;;  %p1390_p6 = por %p150_p4, %p68_p1 }
   0x9   : > { %p1046_p7 = scmp.ge.s32.totalorder %s1327_s19, 2 }
   0xa   : > { %s1395_s25 = scalar_select %p59_p5, %s1315_s16, %s61_s23  }
   0xb   : > { %181 = sbr.rel (%p1046_p7) target bundleno = 52 (0x34), region = 20 }
  0x10   : > { %184 = sbr.rel (!%p70_p3) target bundleno = 52 (0x34), region = 24  ;;  %s186_s26 = sand.u32 (%p70_p3), 1, %s1315_s16  }
  0x11   : > { %s1204_s27 = sshll.u32 (%p70_p3), %s1323_s18, 3  ;;  %s1047_s28 = sshll.u32 (%p70_p3), %s186_s26, 8 }
  0x12   : > { %s1403_s5 = scalar_lea.vmem (%p70_p3), %s1655_s1, %s1204_s27  ;;  %s1408_s6 = scalar_lea.vmem (%p70_p3), [#allocation3], %s1047_s28 }
  0x13   : > { %v285_v0 = vld [vmem:[%s1403_s5] sm:$0xff] (%p70_p3)  ;;  %v287_v1 = vld [vmem:[%s1403_s5 + $0x10] sm:$0xff] (%p70_p3) }
  0x14   : > { %v289_v2 = vld [vmem:[%s1403_s5 + $0x20] sm:$0xff] (%p70_p3)  ;;  %286 = vst [vmem:[%s1408_s6] sm:$0xff] (%p70_p3), %v285_v0  ;;  %v291_v3 = vld [vmem:[%s1403_s5 + $0x30] sm:$0xff] (%p70_p3) }
  0x15   : > { %288 = vst [vmem:[%s1408_s6 + $0x8] sm:$0xff] %v287_v1  ;;  %v293_v4 = vld [vmem:[%s1403_s5 + $0x40] sm:$0xff]  ;;  %v295_v5 = vld [vmem:[%s1403_s5 + $0x50] sm:$0xff] }
  0x16   : > { %290 = vst [vmem:[%s1408_s6 + $0x10] sm:$0xff] %v289_v2  ;;  %v297_v6 = vld [vmem:[%s1403_s5 + $0x60] sm:$0xff]  ;;  %v299_v7 = vld [vmem:[%s1403_s5 + $0x70] sm:$0xff] }
  0x17   : > { %292 = vst [vmem:[%s1408_s6 + $0x18] sm:$0xff] %v291_v3  ;;  %v301_v8 = vld [vmem:[%s1403_s5 + $0x80] sm:$0xff]  ;;  %v303_v9 = vld [vmem:[%s1403_s5 + $0x90] sm:$0xff] }
  0x18   : > { %294 = vst [vmem:[%s1408_s6 + $0x20] sm:$0xff] %v293_v4  ;;  %v305_v10 = vld [vmem:[%s1403_s5 + $0xa0] sm:$0xff]  ;;  %v307_v11 = vld [vmem:[%s1403_s5 + $0xb0] sm:$0xff] }
  0x19   : > { %296 = vst [vmem:[%s1408_s6 + $0x28] sm:$0xff] %v295_v5  ;;  %v309_v12 = vld [vmem:[%s1403_s5 + $0xc0] sm:$0xff]  ;;  %v311_v13 = vld [vmem:[%s1403_s5 + $0xd0] sm:$0xff] }
  0x1a   : > { %298 = vst [vmem:[%s1408_s6 + $0x30] sm:$0xff] %v297_v6  ;;  %v313_v14 = vld [vmem:[%s1403_s5 + $0xe0] sm:$0xff]  ;;  %v315_v15 = vld [vmem:[%s1403_s5 + $0xf0] sm:$0xff] }
  0x1b   : > { %300 = vst [vmem:[%s1408_s6 + $0x38] sm:$0xff] %v299_v7  ;;  %v317_v16 = vld [vmem:[%s1403_s5 + $0x100] sm:$0xff]  ;;  %v319_v17 = vld [vmem:[%s1403_s5 + $0x110] sm:$0xff] }
  0x1c   : > { %302 = vst [vmem:[%s1408_s6 + $0x40] sm:$0xff] %v301_v8  ;;  %v321_v18 = vld [vmem:[%s1403_s5 + $0x120] sm:$0xff]  ;;  %v323_v19 = vld [vmem:[%s1403_s5 + $0x130] sm:$0xff] }
  0x1d   : > { %304 = vst [vmem:[%s1408_s6 + $0x48] sm:$0xff] %v303_v9  ;;  %v325_v20 = vld [vmem:[%s1403_s5 + $0x140] sm:$0xff]  ;;  %v327_v21 = vld [vmem:[%s1403_s5 + $0x150] sm:$0xff] }
  0x1e   : > { %306 = vst [vmem:[%s1408_s6 + $0x50] sm:$0xff] %v305_v10  ;;  %v329_v22 = vld [vmem:[%s1403_s5 + $0x160] sm:$0xff]  ;;  %v331_v23 = vld [vmem:[%s1403_s5 + $0x170] sm:$0xff] }
  0x1f   : > { %308 = vst [vmem:[%s1408_s6 + $0x58] sm:$0xff] %v307_v11  ;;  %v333_v24 = vld [vmem:[%s1403_s5 + $0x180] sm:$0xff]  ;;  %v335_v25 = vld [vmem:[%s1403_s5 + $0x190] sm:$0xff] }
  0x20   : > { %310 = vst [vmem:[%s1408_s6 + $0x60] sm:$0xff] %v309_v12  ;;  %v337_v26 = vld [vmem:[%s1403_s5 + $0x1a0] sm:$0xff]  ;;  %v339_v27 = vld [vmem:[%s1403_s5 + $0x1b0] sm:$0xff] }
  0x21   : > { %312 = vst [vmem:[%s1408_s6 + $0x68] sm:$0xff] %v311_v13  ;;  %v341_v28 = vld [vmem:[%s1403_s5 + $0x1c0] sm:$0xff]  ;;  %v343_v29 = vld [vmem:[%s1403_s5 + $0x1d0] sm:$0xff] }
  0x22   : > { %314 = vst [vmem:[%s1408_s6 + $0x70] sm:$0xff] %v313_v14  ;;  %v345_v30 = vld [vmem:[%s1403_s5 + $0x1e0] sm:$0xff]  ;;  %v347_v31 = vld [vmem:[%s1403_s5 + $0x1f0] sm:$0xff] }
  0x23   : > { %316 = vst [vmem:[%s1408_s6 + $0x78] sm:$0xff] %v315_v15 }
  0x24   : > { %318 = vst [vmem:[%s1408_s6 + $0x80] sm:$0xff] %v317_v16 }
  0x25   : > { %320 = vst [vmem:[%s1408_s6 + $0x88] sm:$0xff] %v319_v17 }
  0x26   : > { %322 = vst [vmem:[%s1408_s6 + $0x90] sm:$0xff] %v321_v18 }
  0x27   : > { %324 = vst [vmem:[%s1408_s6 + $0x98] sm:$0xff] %v323_v19 }
  0x28   : > { %326 = vst [vmem:[%s1408_s6 + $0xa0] sm:$0xff] %v325_v20 }
  0x29   : > { %328 = vst [vmem:[%s1408_s6 + $0xa8] sm:$0xff] %v327_v21 }
  0x2a   : > { %330 = vst [vmem:[%s1408_s6 + $0xb0] sm:$0xff] %v329_v22 }
  0x2b   : > { %332 = vst [vmem:[%s1408_s6 + $0xb8] sm:$0xff] %v331_v23 }
  0x2c   : > { %334 = vst [vmem:[%s1408_s6 + $0xc0] sm:$0xff] %v333_v24 }
  0x2d   : > { %336 = vst [vmem:[%s1408_s6 + $0xc8] sm:$0xff] %v335_v25 }
  0x2e   : > { %338 = vst [vmem:[%s1408_s6 + $0xd0] sm:$0xff] %v337_v26 }
  0x2f   : > { %340 = vst [vmem:[%s1408_s6 + $0xd8] sm:$0xff] %v339_v27 }
  0x30   : > { %342 = vst [vmem:[%s1408_s6 + $0xe0] sm:$0xff] %v341_v28 }
  0x31   : > { %344 = vst [vmem:[%s1408_s6 + $0xe8] sm:$0xff] %v343_v29 }
  0x32   : > { %346 = vst [vmem:[%s1408_s6 + $0xf0] sm:$0xff] %v345_v30 }
  0x33   : > { %348 = vst [vmem:[%s1408_s6 + $0xf8] sm:$0xff] %v347_v31 }
  0x34 PF: > { %p1050_p8 = scmp.ge.s32.totalorder %s1327_s19, 1  ;;  %p369_p9 = scmp.lt.s32.totalorder %s1327_s19, 3 }
  0x36   : > { %p370_p10 = pnand %p1050_p8, %p369_p9 }
  0x37   : > { %s376_s7 = sand.u32 (!%p370_p10), 1, %s1311_s15  }
  0x38   : > { %373 = sbr.rel (%p370_p10) target bundleno = 334 (0x14e), region = 70  ;;  %s1051_s8 = sshll.u32 (!%p370_p10), %s376_s7, 8 }
  0x39   : > { %s1476_s9 = scalar_lea.vmem (!%p370_p10), [#allocation3], %s1051_s8  ;;  %s1052_s22 = sshll.u32 (!%p370_p10), %s376_s7, 6 }
  0x3a   : > { %s1611_s15 = scalar_lea.vmem (!%p370_p10), [#allocation4], %s1052_s22 }
  0x3d   : > { %v1129_v32 = vld [vmem:[%s1476_s9 + $0x70] sm:$0xf]  ;;  %v1224_v33 = vld [vmem:[%s1476_s9 + $0x74] sm:$0xf0]  ;;  %v1223_v37 = vld [vmem:[%s1476_s9 + $0x74] sm:$0xf] }
  0x3e   : > { %v1193_v34 = vld [vmem:[%s1476_s9 + $0xf0] sm:$0xf]  ;;  %v1130_v35 = vor.u32 %v1224_v33, %v1129_v32  ;;  %v1240_v36 = vld [vmem:[%s1476_s9 + $0xf4] sm:$0xf0]  ;;  %v1131_v38 = vld [vmem:[%s1476_s9 + $0x78] sm:$0xf0] }
  0x3f   : > { %v1194_v39 = vor.u32 %v1240_v36, %v1193_v34  ;;  %v1134_v40 = vor.u32 %v1223_v37, %v1131_v38  ;;  %v1239_v41 = vld [vmem:[%s1476_s9 + $0xf4] sm:$0xf]  ;;  %v1195_v42 = vld [vmem:[%s1476_s9 + $0xf8] sm:$0xf0]  ;;  %v1121_v43 = vld [vmem:[%s1476_s9 + $0x60] sm:$0xf] }
  0x40   : > { %668 = vmatpush.bf16.msra.mxu0 %v1130_v35  ;;  %v1198_v44 = vor.u32 %v1239_v41, %v1195_v42  ;;  %v1222_v45 = vld [vmem:[%s1476_s9 + $0x64] sm:$0xf0]  ;;  %v1185_v46 = vld [vmem:[%s1476_s9 + $0xe0] sm:$0xf]  ;;  %v1221_v50 = vld [vmem:[%s1476_s9 + $0x64] sm:$0xf] }
  0x41   : > { %v1238_v47 = vld [vmem:[%s1476_s9 + $0xe4] sm:$0xf0]  ;;  %687 = vmatpush.bf16.msra.mxu1 %v1194_v39  ;;  %706 = vmatpush.bf16.msra.mxu2 %v1134_v40  ;;  %v1122_v48 = vor.u32 %v1222_v45, %v1121_v43  ;;  %v1123_v51 = vld [vmem:[%s1476_s9 + $0x68] sm:$0xf0]  ;;  %v1237_v52 = vld [vmem:[%s1476_s9 + $0xe4] sm:$0xf] }
  0x42   : > { %v1186_v49 = vor.u32 %v1238_v47, %v1185_v46  ;;  %725 = vmatpush.bf16.msra.mxu3 %v1198_v44  ;;  %v1126_v53 = vor.u32 %v1221_v50, %v1123_v51  ;;  %v1187_v54 = vld [vmem:[%s1476_s9 + $0xe8] sm:$0xf0]  ;;  %v1113_v55 = vld [vmem:[%s1476_s9 + $0x50] sm:$0xf]  ;;  %v1220_v56 = vld [vmem:[%s1476_s9 + $0x54] sm:$0xf0] }
  0x43   : > { %v1190_v57 = vor.u32 %v1237_v52, %v1187_v54  ;;  %v1177_v58 = vld [vmem:[%s1476_s9 + $0xd0] sm:$0xf]  ;;  %v1236_v59 = vld [vmem:[%s1476_s9 + $0xd4] sm:$0xf0]  ;;  %v1219_v60 = vld [vmem:[%s1476_s9 + $0x54] sm:$0xf]  ;;  %v1114_v61 = vor.u32 %v1220_v56, %v1113_v55 }
  0x44   : > { %669 = vmatpush.bf16.msra.mxu0 %v1122_v48  ;;  %v1115_v62 = vld [vmem:[%s1476_s9 + $0x58] sm:$0xf0]  ;;  %v1235_v63 = vld [vmem:[%s1476_s9 + $0xd4] sm:$0xf]  ;;  %v1178_v1 = vor.u32 %v1236_v59, %v1177_v58  ;;  %v1105_v3 = vld [vmem:[%s1476_s9 + $0x40] sm:$0xf] }
  0x45   : > { %v1179_v0 = vld [vmem:[%s1476_s9 + $0xd8] sm:$0xf0]  ;;  %688 = vmatpush.bf16.msra.mxu1 %v1186_v49  ;;  %707 = vmatpush.bf16.msra.mxu2 %v1126_v53  ;;  %v1118_v2 = vor.u32 %v1219_v60, %v1115_v62  ;;  %v1218_v4 = vld [vmem:[%s1476_s9 + $0x44] sm:$0xf0]  ;;  %v1169_v5 = vld [vmem:[%s1476_s9 + $0xc0] sm:$0xf] }
  0x46   : > { %726 = vmatpush.bf16.msra.mxu3 %v1190_v57  ;;  %v1182_v6 = vor.u32 %v1235_v63, %v1179_v0  ;;  %v1234_v7 = vld [vmem:[%s1476_s9 + $0xc4] sm:$0xf0]  ;;  %v1217_v8 = vld [vmem:[%s1476_s9 + $0x44] sm:$0xf]  ;;  %v1107_v9 = vld [vmem:[%s1476_s9 + $0x48] sm:$0xf0]  ;;  %v1106_v12 = vor.u32 %v1218_v4, %v1105_v3 }
  0x47   : > { %v1233_v10 = vld [vmem:[%s1476_s9 + $0xc4] sm:$0xf]  ;;  %v1171_v11 = vld [vmem:[%s1476_s9 + $0xc8] sm:$0xf0]  ;;  %v1170_v13 = vor.u32 %v1234_v7, %v1169_v5  ;;  %v1110_v14 = vor.u32 %v1217_v8, %v1107_v9  ;;  %v1097_v15 = vld [vmem:[%s1476_s9 + $0x30] sm:$0xf] }
  0x48   : > { %670 = vmatpush.bf16.msra.mxu0 %v1114_v61  ;;  %v1216_v16 = vld [vmem:[%s1476_s9 + $0x34] sm:$0xf0]  ;;  %v1161_v17 = vld [vmem:[%s1476_s9 + $0xb0] sm:$0xf]  ;;  %v1174_v18 = vor.u32 %v1233_v10, %v1171_v11  ;;  %v1215_v20 = vld [vmem:[%s1476_s9 + $0x34] sm:$0xf] }
  0x49   : > { %689 = vmatpush.bf16.msra.mxu1 %v1178_v1  ;;  %708 = vmatpush.bf16.msra.mxu2 %v1118_v2  ;;  %v1232_v19 = vld [vmem:[%s1476_s9 + $0xb4] sm:$0xf0]  ;;  %v1099_v21 = vld [vmem:[%s1476_s9 + $0x38] sm:$0xf0]  ;;  %v1231_v22 = vld [vmem:[%s1476_s9 + $0xb4] sm:$0xf]  ;;  %v1098_v24 = vor.u32 %v1216_v16, %v1097_v15 }
  0x4a   : > { %727 = vmatpush.bf16.msra.mxu3 %v1182_v6  ;;  %v1163_v23 = vld [vmem:[%s1476_s9 + $0xb8] sm:$0xf0]  ;;  %v1162_v25 = vor.u32 %v1232_v19, %v1161_v17  ;;  %v1102_v26 = vor.u32 %v1215_v20, %v1099_v21  ;;  %v1089_v27 = vld [vmem:[%s1476_s9 + $0x20] sm:$0xf]  ;;  %v1214_v28 = vld [vmem:[%s1476_s9 + $0x24] sm:$0xf0] }
  0x4b   : > { %v1153_v29 = vld [vmem:[%s1476_s9 + $0xa0] sm:$0xf]  ;;  %v1166_v30 = vor.u32 %v1231_v22, %v1163_v23  ;;  %v1230_v31 = vld [vmem:[%s1476_s9 + $0xa4] sm:$0xf0]  ;;  %v1213_v32 = vld [vmem:[%s1476_s9 + $0x24] sm:$0xf]  ;;  %v1090_v36 = vor.u32 %v1214_v28, %v1089_v27 }
  0x4c   : > { %671 = vmatpush.bf16.msra.mxu0 %v1106_v12  ;;  %v1091_v33 = vld [vmem:[%s1476_s9 + $0x28] sm:$0xf0]  ;;  %v1229_v34 = vld [vmem:[%s1476_s9 + $0xa4] sm:$0xf]  ;;  %v1154_v37 = vor.u32 %v1230_v31, %v1153_v29  ;;  %v1081_v39 = vld [vmem:[%s1476_s9 + $0x10] sm:$0xf] }
  0x4d   : > { %690 = vmatpush.bf16.msra.mxu1 %v1170_v13  ;;  %709 = vmatpush.bf16.msra.mxu2 %v1110_v14  ;;  %v1155_v35 = vld [vmem:[%s1476_s9 + $0xa8] sm:$0xf0]  ;;  %v1094_v38 = vor.u32 %v1213_v32, %v1091_v33  ;;  %v1212_v40 = vld [vmem:[%s1476_s9 + $0x14] sm:$0xf0]  ;;  %v1145_v41 = vld [vmem:[%s1476_s9 + $0x90] sm:$0xf] }
  0x4e   : > { %728 = vmatpush.bf16.msra.mxu3 %v1174_v18  ;;  %v1158_v42 = vor.u32 %v1229_v34, %v1155_v35  ;;  %v1228_v43 = vld [vmem:[%s1476_s9 + $0x94] sm:$0xf0]  ;;  %v1211_v44 = vld [vmem:[%s1476_s9 + $0x14] sm:$0xf]  ;;  %v1083_v45 = vld [vmem:[%s1476_s9 + $0x18] sm:$0xf0]  ;;  %v1082_v48 = vor.u32 %v1212_v40, %v1081_v39 }
  0x4f   : > { %v1227_v46 = vld [vmem:[%s1476_s9 + $0x94] sm:$0xf]  ;;  %v1147_v47 = vld [vmem:[%s1476_s9 + $0x98] sm:$0xf0]  ;;  %v1146_v49 = vor.u32 %v1228_v43, %v1145_v41  ;;  %v1086_v50 = vor.u32 %v1211_v44, %v1083_v45  ;;  %v1073_v51 = vld [vmem:[%s1476_s9] sm:$0xf] }
  0x50   : > { %672 = vmatpush.bf16.msra.mxu0 %v1098_v24  ;;  %v1210_v52 = vld [vmem:[%s1476_s9 + $0x4] sm:$0xf0]  ;;  %v1137_v53 = vld [vmem:[%s1476_s9 + $0x80] sm:$0xf]  ;;  %v1150_v54 = vor.u32 %v1227_v46, %v1147_v47  ;;  %v1209_v56 = vld [vmem:[%s1476_s9 + $0x4] sm:$0xf] }
  0x51   : > { %691 = vmatpush.bf16.msra.mxu1 %v1162_v25  ;;  %710 = vmatpush.bf16.msra.mxu2 %v1102_v26  ;;  %v1226_v55 = vld [vmem:[%s1476_s9 + $0x84] sm:$0xf0]  ;;  %v1075_v57 = vld [vmem:[%s1476_s9 + $0x8] sm:$0xf0]  ;;  %v1225_v58 = vld [vmem:[%s1476_s9 + $0x84] sm:$0xf]  ;;  %v1074_v60 = vor.u32 %v1210_v52, %v1073_v51 }
  0x52   : > { %729 = vmatpush.bf16.msra.mxu3 %v1166_v30  ;;  %v1139_v59 = vld [vmem:[%s1476_s9 + $0x88] sm:$0xf0]  ;;  %v1057_v61 = vld [vmem:[%s1654_s0] sm:$0xf]  ;;  %v1206_v62 = vld [vmem:[%s1654_s0 + $0x4] sm:$0xf0]  ;;  %v1138_v63 = vor.u32 %v1226_v55, %v1137_v53  ;;  %v1078_v0 = vor.u32 %v1209_v56, %v1075_v57 }
  0x53   : > { %v1205_v1 = vld [vmem:[%s1654_s0 + $0x4] sm:$0xf]  ;;  %v1059_v2 = vld [vmem:[%s1654_s0 + $0x8] sm:$0xf0]  ;;  %v1142_v3 = vor.u32 %v1225_v58, %v1139_v59  ;;  %v1058_v4 = vor.u32 %v1206_v62, %v1057_v61  ;;  %v1065_v6 = vld [vmem:[%s1654_s0 + $0x10] sm:$0xf] }
  0x54   : > { %673 = vmatpush.bf16.msra.mxu0 %v1090_v36  ;;  %v1062_v5 = vor.u32 %v1205_v1, %v1059_v2  ;;  %v1208_v7 = vld [vmem:[%s1654_s0 + $0x14] sm:$0xf0]  ;;  %v1207_v8 = vld [vmem:[%s1654_s0 + $0x14] sm:$0xf]  ;;  %v1067_v9 = vld [vmem:[%s1654_s0 + $0x18] sm:$0xf0] }
  0x55   : > { %692 = vmatpush.bf16.msra.mxu1 %v1154_v37  ;;  %711 = vmatpush.bf16.msra.mxu2 %v1094_v38  ;;  %v1066_v10 = vor.u32 %v1208_v7, %v1065_v6  ;;  %v1070_v11 = vor.u32 %v1207_v8, %v1067_v9  ;;  %v1329_v18 = vmov 32.0   ;;  %s1053_s9 = sshll.u32 %s1319_s17, 1  ;;  %s1241_s7 = sshll.u32 (%p1390_p6), %s1319_s17, 4 }
  0x56   : > { %730 = vmatpush.bf16.msra.mxu3 %v1158_v42  ;;  %1283 = vrcp.f32 %v1329_v18  ;;  %p422_p11 = scmp.lt.s32.totalorder %s1053_s9, 3  ;;  %s909_s27 = scalar_lea.vmem (%p1390_p6), %s1658_s4, %s1241_s7 }
  0x58   : > { %674 = vmatpush.bf16.msra.mxu0 %v1082_v48  ;;  %s1667_s9 = smov (!%p422_p11, %s1053_s9), 3 }
  0x59   : > { %693 = vmatpush.bf16.msra.mxu1 %v1146_v49  ;;  %712 = vmatpush.bf16.msra.mxu2 %v1086_v50  ;;  %s424_s12 = scalar_lea.vmem %s1656_s2, %s1667_s9  ;;  %s429_s21 = scalar_lea.vmem %s1657_s3, %s1667_s9 }
  0x5a   : > { %731 = vmatpush.bf16.msra.mxu3 %v1150_v54 }
  0x5c   : > { %675 = vmatpush.bf16.msra.mxu0 %v1074_v60  ;;  %v1284_v23 = vpop.eup %1283 }
  0x5d   : > { %694 = vmatpush.bf16.msra.mxu1 %v1138_v63  ;;  %713 = vmatpush.bf16.msra.mxu2 %v1078_v0  ;;  %v790_v28 = vmul.f32 32.0, %v1284_v23  ;;  %vm794_vm0 = vweird.f32 %v1284_v23 }
  0x5e   : > { %732 = vmatpush.bf16.msra.mxu3 %v1142_v3 }
  0x5f   : > { %676 = vmatmul.bf16.vlgmr.msra.gmra.mxu0 %v1058_v4  ;;  %v791_v36 = vsub.f32 1.0, %v790_v28 }
  0x60   : > { %695 = vmatmul.bf16.vlgmr.msra.gmra.mxu1 %v1062_v5  ;;  %714 = vmatmul.bf16.vlgmr.msra.gmra.mxu2 %v1058_v4 }
  0x61   : > { %733 = vmatmul.bf16.vlgmr.msra.gmra.mxu3 %v1062_v5  ;;  %v792_v42 = vmul.f32 %v1284_v23, %v791_v36 }
  0x63   : > { %v793_v49 = vadd.f32 %v1284_v23, %v792_v42 }
  0x65   : > { %v795_v54 = vsel %vm794_vm0, %v1284_v23, %v793_v49 }
  0x6f   : > { %681 = vmatmul.bf16.gmra.mxu0 %v1066_v10 }
  0x70   : > { %700 = vmatmul.bf16.gmra.mxu1 %v1070_v11  ;;  %719 = vmatmul.bf16.gmra.mxu2 %v1066_v10 }
  0x71   : > { %738 = vmatmul.bf16.gmra.mxu3 %v1070_v11 }
  0xdc   : > { %v677_v12 = vpop.f32.mrf.mxu0 }
  0xdd   : > { %v696_v13 = vpop.f32.mrf.mxu1 }
  0xde   : > { %v697_v25 = vadd.f32 %v696_v13, %v677_v12 }
  0xe3   : > { %v715_v14 = vpop.f32.mrf.mxu2 }
  0xe4   : > { %v734_v15 = vpop.f32.mrf.mxu3  ;;  %v679_v16 = vpop.f32.mrf.mxu0 }
  0xe5   : > { %v698_v17 = vpop.f32.mrf.mxu1  ;;  %v735_v38 = vadd.f32 %v734_v15, %v715_v14 }
  0xe6   : > { %v699_v24 = vadd.f32 %v698_v17, %v679_v16 }
  0xe8   : > { %v771_v29 = vadd.f32 %v699_v24, %v697_v25 }
  0xeb   : > { %v717_v19 = vpop.f32.mrf.mxu2 }
  0xec   : > { %v736_v20 = vpop.f32.mrf.mxu3  ;;  %v682_v21 = vpop.f32.mrf.mxu0 }
  0xed   : > { %v701_v22 = vpop.f32.mrf.mxu1  ;;  %v737_v35 = vadd.f32 %v736_v20, %v717_v19 }
  0xee   : > { %v702_v26 = vadd.f32 %v701_v22, %v682_v21 }
  0xef   : > { %v780_v41 = vadd.f32 %v737_v35, %v735_v38 }
  0xf0   : > { %v772_v33 = vadd.f32 %v771_v29, %v702_v26 }
  0xf3   : > { %v720_v27 = vpop.f32.mrf.mxu2 }
  0xf4   : > { %v739_v30 = vpop.f32.mrf.mxu3  ;;  %v684_v31 = vpop.f32.mrf.mxu0 }
  0xf5   : > { %v703_v32 = vpop.f32.mrf.mxu1  ;;  %v740_v39 = vadd.f32 %v739_v30, %v720_v27 }
  0xf6   : > { %v704_v34 = vadd.f32 %v703_v32, %v684_v31 }
  0xf7   : > { %v781_v46 = vadd.f32 %v780_v41, %v740_v39 }
  0xf8   : > { %v773_v37 = vadd.f32 %v772_v33, %v704_v34 }
  0xfa   : > { %v774_v40 = vrot.slane %v773_v37, 4 }
  0xfb   : > { %v722_v43 = vpop.f32.mrf.mxu2 }
  0xfc   : > { %v775_v44 = vadd.f32 %v774_v40, %v773_v37  ;;  %v741_v45 = vpop.f32.mrf.mxu3 }
  0xfd   : > { %v742_v47 = vadd.f32 %v741_v45, %v722_v43  ;;  %v864_v43 = vld [vmem:[%s424_s12] sm:$0x3] }
  0xfe   : > { %v776_v48 = vrot.slane %v775_v44, 2 }
  0xff   : > { %v782_v50 = vadd.f32 %v781_v46, %v742_v47 }
 0x100   : > { %v777_v51 = vadd.f32 %v776_v48, %v775_v44  ;;  %v878_v44 = vld [vmem:[%s429_s21] sm:$0x3] }
 0x101   : > { %v783_v52 = vrot.slane %v782_v50, 4 }
 0x102   : > { %v778_v53 = vrot.slane %v777_v51, 1 }
 0x103   : > { %v784_v55 = vadd.f32 %v783_v52, %v782_v50  ;;  %v880_v50 = vperm.slane %v878_v44, 0 }
 0x104   : > { %v779_v56 = vadd.f32 %v778_v53, %v777_v51 }
 0x105   : > { %v785_v57 = vrot.slane %v784_v55, 2 }
 0x106   : > { %v796_v58 = vmul.f32 %v795_v54, %v779_v56 }
 0x107   : > { %v786_v59 = vadd.f32 %v785_v57, %v784_v55 }
 0x108   : > { %v1566_v60 = vsub.f32 %v697_v25, %v796_v58  ;;  %v1568_v61 = vsub.f32 %v699_v24, %v796_v58  ;;  %v1570_v62 = vsub.f32 %v702_v26, %v796_v58  ;;  %v1572_v0 = vsub.f32 %v704_v34, %v796_v58 }
 0x109   : > { %v787_v63 = vrot.slane %v786_v59, 1 }
 0x10a   : > { %v806_v1 = vmul.f32 %v1566_v60, %v1566_v60  ;;  %v808_v2 = vmul.f32 %v1568_v61, %v1568_v61  ;;  %v810_v4 = vmul.f32 %v1570_v62, %v1570_v62  ;;  %v812_v7 = vmul.f32 %v1572_v0, %v1572_v0 }
 0x10b   : > { %v788_v3 = vadd.f32 %v787_v63, %v786_v59 }
 0x10c   : > { %v814_v5 = vadd.f32 %v808_v2, %v806_v1 }
 0x10d   : > { %v797_v6 = vmul.f32 %v795_v54, %v788_v3 }
 0x10e   : > { %v815_v8 = vadd.f32 %v814_v5, %v810_v4 }
 0x10f   : > { %v1582_v9 = vsub.f32 %v735_v38, %v797_v6  ;;  %v1584_v10 = vsub.f32 %v737_v35, %v797_v6  ;;  %v1586_v11 = vsub.f32 %v740_v39, %v797_v6  ;;  %v1588_v13 = vsub.f32 %v742_v47, %v797_v6 }
 0x110   : > { %v816_v12 = vadd.f32 %v815_v8, %v812_v7  ;;  %v866_v47 = vperm.slane %v864_v43, 0 }
 0x111   : > { %v807_v14 = vmul.f32 %v1582_v9, %v1582_v9  ;;  %v809_v15 = vmul.f32 %v1584_v10, %v1584_v10  ;;  %v811_v17 = vmul.f32 %v1586_v11, %v1586_v11  ;;  %v813_v20 = vmul.f32 %v1588_v13, %v1588_v13 }
 0x112   : > { %v817_v16 = vrot.slane %v816_v12, 4 }
 0x113   : > { %v823_v18 = vadd.f32 %v809_v15, %v807_v14 }
 0x114   : > { %v818_v19 = vadd.f32 %v817_v16, %v816_v12 }
 0x115   : > { %v824_v21 = vadd.f32 %v823_v18, %v811_v17 }
 0x116   : > { %v819_v22 = vrot.slane %v818_v19, 2 }
 0x117   : > { %v825_v23 = vadd.f32 %v824_v21, %v813_v20 }
 0x118   : > { %v820_v24 = vadd.f32 %v819_v22, %v818_v19 }
 0x119   : > { %v826_v25 = vrot.slane %v825_v23, 4 }
 0x11a   : > { %v821_v26 = vrot.slane %v820_v24, 1 }
 0x11b   : > { %v827_v27 = vadd.f32 %v826_v25, %v825_v23 }
 0x11c   : > { %v822_v28 = vadd.f32 %v821_v26, %v820_v24 }
 0x11d   : > { %v828_v29 = vrot.slane %v827_v27, 2 }
 0x11e   : > { %v832_v30 = vmul.f32 %v822_v28, %v795_v54 }
 0x11f   : > { %v829_v31 = vadd.f32 %v828_v29, %v827_v27 }
 0x120   : > { %v834_v32 = vadd.f32 1e-05, %v832_v30 }
 0x121   : > { %v830_v33 = vrot.slane %v829_v31, 1 }
 0x122   : > { %1285 = vrsqrt.f32 %v834_v32  ;;  %vm842_vm2 = vweird.f32 %v834_v32 }
 0x123   : > { %v831_v34 = vadd.f32 %v830_v33, %v829_v31 }
 0x125   : > { %v833_v35 = vmul.f32 %v831_v34, %v795_v54 }
 0x127   : > { %v835_v36 = vadd.f32 1e-05, %v833_v35 }
 0x128   : > { %v1286_v37 = vpop.eup %1285 }
 0x129   : > { %v837_v38 = vmul.f32 %v1286_v37, %v834_v32  ;;  %1287 = vrsqrt.f32 %v835_v36  ;;  %vm843_vm1 = vweird.f32 %v1286_v37  ;;  %vm852_vm5 = vweird.f32 %v835_v36 }
 0x12a   : > { %vm844_vm3 = vmor %vm842_vm2, %vm843_vm1 }
 0x12b   : > { %v838_v39 = vmul.f32 %v1286_v37, %v837_v38 }
 0x12d   : > { %v839_v40 = vmul.f32 0.5, %v838_v39 }
 0x12f   : > { %v1288_v41 = vpop.eup %1287  ;;  %v840_v42 = vsub.f32 1.5, %v839_v40 }
 0x130   : > { %v847_v45 = vmul.f32 %v1288_v41, %v835_v36  ;;  %vm853_vm4 = vweird.f32 %v1288_v41 }
 0x131   : > { %v841_v46 = vmul.f32 %v1286_v37, %v840_v42  ;;  %vm854_vm6 = vmor %vm852_vm5, %vm853_vm4 }
 0x132   : > { %v848_v48 = vmul.f32 %v1288_v41, %v847_v45 }
 0x133   : > { %v845_v49 = vsel %vm844_vm3, %v1286_v37, %v841_v46 }
 0x134   : > { %v856_v51 = vmul.f32 %v845_v49, %v1566_v60  ;;  %v858_v52 = vmul.f32 %v845_v49, %v1568_v61  ;;  %v860_v53 = vmul.f32 %v845_v49, %v1570_v62  ;;  %v862_v54 = vmul.f32 %v845_v49, %v1572_v0 }
 0x135   : > { %v849_v55 = vmul.f32 0.5, %v848_v48  ;;  %v867_v60 = vperm.slane %v864_v43, 1  ;;  %v881_v62 = vperm.slane %v878_v44, 1 }
 0x136   : > { %v870_v56 = vmul.f32 %v866_v47, %v856_v51  ;;  %v872_v57 = vmul.f32 %v866_v47, %v858_v52  ;;  %v874_v58 = vmul.f32 %v866_v47, %v860_v53  ;;  %v876_v59 = vmul.f32 %v866_v47, %v862_v54 }
 0x137   : > { %v850_v63 = vsub.f32 1.5, %v849_v55 }
 0x138   : > { %v884_v1 = vadd.f32 %v880_v50, %v870_v56  ;;  %v886_v2 = vadd.f32 %v880_v50, %v872_v57  ;;  %v888_v3 = vadd.f32 %v880_v50, %v874_v58  ;;  %v890_v4 = vadd.f32 %v880_v50, %v876_v59 }
 0x139   : > { %v851_v5 = vmul.f32 %v1288_v41, %v850_v63 }
 0x13a   : > { %892 = vst [vmem:[%s1611_s15] sm:$0xff] %v884_v1 }
 0x13b   : > { %894 = vst [vmem:[%s1611_s15 + $0x10] sm:$0xff] %v886_v2  ;;  %v855_v61 = vsel %vm854_vm6, %v1288_v41, %v851_v5 }
 0x13c   : > { %896 = vst [vmem:[%s1611_s15 + $0x20] sm:$0xff] %v888_v3  ;;  %v857_v0 = vmul.f32 %v855_v61, %v1582_v9  ;;  %v859_v6 = vmul.f32 %v855_v61, %v1584_v10  ;;  %v861_v7 = vmul.f32 %v855_v61, %v1586_v11  ;;  %v863_v8 = vmul.f32 %v855_v61, %v1588_v13 }
 0x13d   : > { %898 = vst [vmem:[%s1611_s15 + $0x30] sm:$0xff] %v890_v4 }
 0x13e   : > { %v871_v12 = vmul.f32 %v867_v60, %v857_v0  ;;  %v873_v14 = vmul.f32 %v867_v60, %v859_v6  ;;  %v875_v15 = vmul.f32 %v867_v60, %v861_v7  ;;  %v877_v16 = vmul.f32 %v867_v60, %v863_v8 }
 0x140   : > { %v885_v17 = vadd.f32 %v881_v62, %v871_v12  ;;  %v887_v18 = vadd.f32 %v881_v62, %v873_v14  ;;  %v889_v19 = vadd.f32 %v881_v62, %v875_v15  ;;  %v891_v20 = vadd.f32 %v881_v62, %v877_v16 }
 0x141   : > { %906 = sbr.rel (!%p1390_p6) target bundleno = 334 (0x14e), region = 86  ;;  %v922_v9 = vld [vmem:[%s1611_s15] sm:$0xff] (%p1390_p6) }
 0x142   : > { %893 = vst [vmem:[%s1611_s15 + $0x8] sm:$0xff] %v885_v17  ;;  %v926_v11 = vld [vmem:[%s1611_s15 + $0x10] sm:$0xff] (%p1390_p6) }
 0x143   : > { %895 = vst [vmem:[%s1611_s15 + $0x18] sm:$0xff] %v887_v18  ;;  %v930_v21 = vld [vmem:[%s1611_s15 + $0x20] sm:$0xff] (%p1390_p6) }
 0x144   : > { %897 = vst [vmem:[%s1611_s15 + $0x28] sm:$0xff] %v889_v19  ;;  %v934_v23 = vld [vmem:[%s1611_s15 + $0x30] sm:$0xff] (%p1390_p6) }
 0x145   : > { %899 = vst [vmem:[%s1611_s15 + $0x38] sm:$0xff] %v891_v20 }
 0x146   : > { %923 = vst [vmem:[%s909_s27] sm:$0xff] %v922_v9 }
 0x147   : > { %927 = vst [vmem:[%s909_s27 + $0x20] sm:$0xff] %v926_v11 }
 0x148   : > { %931 = vst [vmem:[%s909_s27 + $0x40] sm:$0xff] %v930_v21 }
 0x149   : > { %v924_v10 = vld [vmem:[%s1611_s15 + $0x8] sm:$0xff]  ;;  %935 = vst [vmem:[%s909_s27 + $0x60] sm:$0xff] %v934_v23 }
 0x14a   : > { %v928_v13 = vld [vmem:[%s1611_s15 + $0x18] sm:$0xff]  ;;  %925 = vst [vmem:[%s909_s27 + $0x8] sm:$0xff] %v924_v10 }
 0x14b   : > { %v932_v22 = vld [vmem:[%s1611_s15 + $0x28] sm:$0xff]  ;;  %929 = vst [vmem:[%s909_s27 + $0x28] sm:$0xff] %v928_v13 }
 0x14c   : > { %v936_v24 = vld [vmem:[%s1611_s15 + $0x38] sm:$0xff]  ;;  %933 = vst [vmem:[%s909_s27 + $0x48] sm:$0xff] %v932_v22 }
 0x14d   : > { %937 = vst [vmem:[%s909_s27 + $0x68] sm:$0xff] %v936_v24 }
 0x14e PF: > { %s14_s19 = sadd.s32 1, %s1327_s19   ;;  %s1660_s15 = smov %s1315_s16 }
 0x14f   : > { %p11_p12 = scmp.ge.s32.totalorder %s14_s19, 4   ;;  %s1661_s16 = smov %s1395_s25 }
 0x150   : > { %s1662_s17 = smov %s1323_s18  ;;  %s1663_s18 = smov %s1665_s20 }
 0x151   :  { %13 = sbr.rel (!%p11_p12) target bundleno = 3 (0x3), region = 149 }

// kernel: res_5_forward.14
= control target key start
LH: loop header
LB: loop body
LE: loop exit
PB: predicated region body
PF: predicated region fallthrough
CT: control target
= control target key end

     0   :  { %s897_s1 = inlined_call_operand.vmem [shape: bf16[512,128], index: 1, kind: input, shape index: {}]   ;;  %s898_s0 = inlined_call_operand.vmem [shape: bf16[32,512], index: 0, kind: input, shape index: {}]   ;;  %s899_s2 = inlined_call_operand.vmem [shape: f32[1,128], index: 2, kind: input, shape index: {}]   ;;  %s900_s3 = inlined_call_operand.vmem [shape: f32[1,128], index: 3, kind: input, shape index: {}]   ;;  %s901_s4 = inlined_call_operand.vmem [shape: f32[32,128], index: 4, kind: output, shape index: {}]  }
   0x1   :  { %v677_v0 = vld [vmem:[%s897_s1 + $0x38] sm:$0xff]  ;;  %v676_v4 = vld [vmem:[%s897_s1 + $0x30] sm:$0xff]  ;;  %v675_v8 = vld [vmem:[%s897_s1 + $0x28] sm:$0xff] }
   0x2   :  { %v685_v1 = vld [vmem:[%s897_s1 + $0x78] sm:$0xff]  ;;  %333 = vmatpush.bf16.msra.mxu0 %v677_v0  ;;  %v684_v5 = vld [vmem:[%s897_s1 + $0x70] sm:$0xff]  ;;  %v683_v9 = vld [vmem:[%s897_s1 + $0x68] sm:$0xff] }
   0x3   :  { %v693_v2 = vld [vmem:[%s897_s1 + $0xb8] sm:$0xff]  ;;  %352 = vmatpush.bf16.msra.mxu1 %v685_v1  ;;  %v692_v6 = vld [vmem:[%s897_s1 + $0xb0] sm:$0xff]  ;;  %v691_v10 = vld [vmem:[%s897_s1 + $0xa8] sm:$0xff] }
   0x4   :  { %v701_v3 = vld [vmem:[%s897_s1 + $0xf8] sm:$0xff]  ;;  %371 = vmatpush.bf16.msra.mxu2 %v693_v2  ;;  %v700_v7 = vld [vmem:[%s897_s1 + $0xf0] sm:$0xff]  ;;  %v699_v11 = vld [vmem:[%s897_s1 + $0xe8] sm:$0xff] }
   0x5   :  { %390 = vmatpush.bf16.msra.mxu3 %v701_v3  ;;  %v674_v12 = vld [vmem:[%s897_s1 + $0x20] sm:$0xff]  ;;  %v673_v16 = vld [vmem:[%s897_s1 + $0x18] sm:$0xff]  ;;  %v672_v20 = vld [vmem:[%s897_s1 + $0x10] sm:$0xff] }
   0x6   :  { %334 = vmatpush.bf16.msra.mxu0 %v676_v4  ;;  %v682_v13 = vld [vmem:[%s897_s1 + $0x60] sm:$0xff]  ;;  %v681_v17 = vld [vmem:[%s897_s1 + $0x58] sm:$0xff]  ;;  %v680_v21 = vld [vmem:[%s897_s1 + $0x50] sm:$0xff] }
   0x7   :  { %353 = vmatpush.bf16.msra.mxu1 %v684_v5  ;;  %v690_v14 = vld [vmem:[%s897_s1 + $0xa0] sm:$0xff]  ;;  %v689_v18 = vld [vmem:[%s897_s1 + $0x98] sm:$0xff]  ;;  %v688_v22 = vld [vmem:[%s897_s1 + $0x90] sm:$0xff]  ;;  %v709_v5 = vmov 32.0  }
   0x8   :  { %372 = vmatpush.bf16.msra.mxu2 %v692_v6  ;;  %v698_v15 = vld [vmem:[%s897_s1 + $0xe0] sm:$0xff]  ;;  %v697_v19 = vld [vmem:[%s897_s1 + $0xd8] sm:$0xff]  ;;  %v696_v23 = vld [vmem:[%s897_s1 + $0xd0] sm:$0xff]  ;;  %705 = vrcp.f32 %v709_v5 }
   0x9   :  { %391 = vmatpush.bf16.msra.mxu3 %v700_v7  ;;  %v671_v24 = vld [vmem:[%s897_s1 + $0x8] sm:$0xff]  ;;  %v670_v28 = vld [vmem:[%s897_s1] sm:$0xff]  ;;  %v664_v33 = vld [vmem:[%s898_s0 + $0xc] sm:$0xf0] }
   0xa   :  { %335 = vmatpush.bf16.msra.mxu0 %v675_v8  ;;  %v679_v25 = vld [vmem:[%s897_s1 + $0x48] sm:$0xff]  ;;  %v678_v29 = vld [vmem:[%s897_s1 + $0x40] sm:$0xff]  ;;  %v506_v35 = vld [vmem:[%s898_s0 + $0x10] sm:$0xf0] }
   0xb   :  { %354 = vmatpush.bf16.msra.mxu1 %v683_v9  ;;  %v687_v26 = vld [vmem:[%s897_s1 + $0x88] sm:$0xff]  ;;  %v686_v30 = vld [vmem:[%s897_s1 + $0x80] sm:$0xff]  ;;  %v665_v37 = vld [vmem:[%s898_s0 + $0x14] sm:$0xf0] }
   0xc   :  { %373 = vmatpush.bf16.msra.mxu2 %v691_v10  ;;  %v695_v27 = vld [vmem:[%s897_s1 + $0xc8] sm:$0xff]  ;;  %v694_v31 = vld [vmem:[%s897_s1 + $0xc0] sm:$0xff]  ;;  %v514_v39 = vld [vmem:[%s898_s0 + $0x18] sm:$0xf0] }
   0xd   :  { %392 = vmatpush.bf16.msra.mxu3 %v699_v11  ;;  %v504_v32 = vld [vmem:[%s898_s0] sm:$0xf]  ;;  %v662_v34 = vld [vmem:[%s898_s0 + $0x4] sm:$0xf]  ;;  %v512_v36 = vld [vmem:[%s898_s0 + $0x8] sm:$0xf] }
   0xe   :  { %336 = vmatpush.bf16.msra.mxu0 %v674_v12  ;;  %v663_v38 = vld [vmem:[%s898_s0 + $0xc] sm:$0xf]  ;;  %v505_v40 = vor.u32 %v664_v33, %v504_v32  ;;  %v509_v41 = vor.u32 %v662_v34, %v506_v35  ;;  %v513_v42 = vor.u32 %v665_v37, %v512_v36  ;;  %v520_v44 = vld [vmem:[%s898_s0 + $0x20] sm:$0xf]  ;;  %v668_v45 = vld [vmem:[%s898_s0 + $0x2c] sm:$0xf0] }
   0xf   :  { %355 = vmatpush.bf16.msra.mxu1 %v682_v13  ;;  %v517_v43 = vor.u32 %v663_v38, %v514_v39  ;;  %v666_v46 = vld [vmem:[%s898_s0 + $0x24] sm:$0xf]  ;;  %v522_v47 = vld [vmem:[%s898_s0 + $0x30] sm:$0xf0]  ;;  %v528_v48 = vld [vmem:[%s898_s0 + $0x28] sm:$0xf]  ;;  %v521_v52 = vor.u32 %v668_v45, %v520_v44  ;;  %v706_v13 = vpop.eup %705 }
  0x10   :  { %374 = vmatpush.bf16.msra.mxu2 %v690_v14  ;;  %v669_v49 = vld [vmem:[%s898_s0 + $0x34] sm:$0xf0]  ;;  %v667_v50 = vld [vmem:[%s898_s0 + $0x2c] sm:$0xf]  ;;  %v530_v51 = vld [vmem:[%s898_s0 + $0x38] sm:$0xf0]  ;;  %v525_v53 = vor.u32 %v666_v46, %v522_v47  ;;  %vm438_vm0 = vweird.f32 %v706_v13 }
  0x11   :  { %393 = vmatpush.bf16.msra.mxu3 %v698_v15  ;;  %v529_v54 = vor.u32 %v669_v49, %v528_v48  ;;  %v533_v55 = vor.u32 %v667_v50, %v530_v51 }
  0x12   :  { %337 = vmatpush.bf16.msra.mxu0 %v673_v16 }
  0x13   :  { %356 = vmatpush.bf16.msra.mxu1 %v681_v17 }
  0x14   :  { %375 = vmatpush.bf16.msra.mxu2 %v689_v18 }
  0x15   :  { %394 = vmatpush.bf16.msra.mxu3 %v697_v19  ;;  %v434_v19 = vmul.f32 32.0, %v706_v13 }
  0x16   :  { %338 = vmatpush.bf16.msra.mxu0 %v672_v20 }
  0x17   :  { %357 = vmatpush.bf16.msra.mxu1 %v680_v21 }
  0x18   :  { %376 = vmatpush.bf16.msra.mxu2 %v688_v22 }
  0x19   :  { %395 = vmatpush.bf16.msra.mxu3 %v696_v23 }
  0x1a   :  { %339 = vmatpush.bf16.msra.mxu0 %v671_v24 }
  0x1b   :  { %358 = vmatpush.bf16.msra.mxu1 %v679_v25  ;;  %v435_v25 = vsub.f32 1.0, %v434_v19 }
  0x1c   :  { %377 = vmatpush.bf16.msra.mxu2 %v687_v26 }
  0x1d   :  { %396 = vmatpush.bf16.msra.mxu3 %v695_v27 }
  0x1e   :  { %340 = vmatpush.bf16.msra.mxu0 %v670_v28  ;;  %v436_v28 = vmul.f32 %v706_v13, %v435_v25 }
  0x1f   :  { %359 = vmatpush.bf16.msra.mxu1 %v678_v29 }
  0x20   :  { %378 = vmatpush.bf16.msra.mxu2 %v686_v30 }
  0x21   :  { %397 = vmatpush.bf16.msra.mxu3 %v694_v31  ;;  %341 = vmatmul.bf16.vlgmr.msra.gmra.mxu0 %v505_v40  ;;  %v437_v31 = vadd.f32 %v706_v13, %v436_v28 }
  0x22   :  { %360 = vmatmul.bf16.vlgmr.msra.gmra.mxu1 %v509_v41 }
  0x23   :  { %379 = vmatmul.bf16.vlgmr.msra.gmra.mxu2 %v513_v42  ;;  %v439_v34 = vsel %vm438_vm0, %v706_v13, %v437_v31 }
  0x24   :  { %398 = vmatmul.bf16.vlgmr.msra.gmra.mxu3 %v517_v43 }
  0x31   :  { %346 = vmatmul.bf16.gmra.mxu0 %v521_v52 }
  0x32   :  { %365 = vmatmul.bf16.gmra.mxu1 %v525_v53 }
  0x33   :  { %384 = vmatmul.bf16.gmra.mxu2 %v529_v54 }
  0x34   :  { %403 = vmatmul.bf16.gmra.mxu3 %v533_v55 }
  0x9e   :  { %v342_v56 = vpop.f32.mrf.mxu0 }
  0x9f   :  { %v361_v57 = vpop.f32.mrf.mxu1 }
  0xa0   :  { %v362_v2 = vadd.f32 %v361_v57, %v342_v56 }
  0xa6   :  { %v380_v58 = vpop.f32.mrf.mxu2  ;;  %v344_v60 = vpop.f32.mrf.mxu0 }
  0xa7   :  { %v399_v59 = vpop.f32.mrf.mxu3  ;;  %v363_v61 = vpop.f32.mrf.mxu1  ;;  %v381_v9 = vadd.f32 %v380_v58, %v362_v2 }
  0xa8   :  { %v364_v3 = vadd.f32 %v363_v61, %v344_v60 }
  0xa9   :  { %v400_v15 = vadd.f32 %v399_v59, %v381_v9 }
  0xae   :  { %v382_v62 = vpop.f32.mrf.mxu2  ;;  %v347_v0 = vpop.f32.mrf.mxu0 }
  0xaf   :  { %v401_v63 = vpop.f32.mrf.mxu3  ;;  %v366_v1 = vpop.f32.mrf.mxu1  ;;  %v383_v8 = vadd.f32 %v382_v62, %v364_v3  ;;  %v703_v62 = vld [vmem:[%s899_s2] ss:$0 sm:$0xff] }
  0xb0   :  { %v367_v4 = vadd.f32 %v366_v1, %v347_v0 }
  0xb1   :  { %v402_v14 = vadd.f32 %v401_v63, %v383_v8 }
  0xb3   :  { %v424_v20 = vadd.f32 %v402_v14, %v400_v15 }
  0xb6   :  { %v385_v6 = vpop.f32.mrf.mxu2  ;;  %v349_v11 = vpop.f32.mrf.mxu0 }
  0xb7   :  { %v404_v7 = vpop.f32.mrf.mxu3  ;;  %v386_v10 = vadd.f32 %v385_v6, %v367_v4  ;;  %v368_v12 = vpop.f32.mrf.mxu1  ;;  %v704_v4 = vld [vmem:[%s900_s3] ss:$0 sm:$0xff] }
  0xb8   :  { %v369_v17 = vadd.f32 %v368_v12, %v349_v11 }
  0xb9   :  { %v405_v16 = vadd.f32 %v404_v7, %v386_v10 }
  0xbb   :  { %v425_v23 = vadd.f32 %v424_v20, %v405_v16 }
  0xbe   :  { %v387_v18 = vpop.f32.mrf.mxu2 }
  0xbf   :  { %v388_v21 = vadd.f32 %v387_v18, %v369_v17  ;;  %v406_v22 = vpop.f32.mrf.mxu3 }
  0xc1   :  { %v407_v24 = vadd.f32 %v406_v22, %v388_v21 }
  0xc3   :  { %v426_v26 = vadd.f32 %v425_v23, %v407_v24 }
  0xc5   :  { %v427_v27 = vrot.slane %v426_v26, 4 }
  0xc7   :  { %v428_v29 = vadd.f32 %v427_v27, %v426_v26 }
  0xc9   :  { %v429_v30 = vrot.slane %v428_v29, 2 }
  0xcb   :  { %v430_v32 = vadd.f32 %v429_v30, %v428_v29 }
  0xcd   :  { %v431_v33 = vrot.slane %v430_v32, 1 }
  0xcf   :  { %v432_v35 = vadd.f32 %v431_v33, %v430_v32 }
  0xd1   :  { %v440_v36 = vmul.f32 %v439_v34, %v432_v35 }
  0xd3   :  { %v441_v37 = vsub.f32 %v400_v15, %v440_v36  ;;  %v442_v38 = vsub.f32 %v402_v14, %v440_v36  ;;  %v443_v39 = vsub.f32 %v405_v16, %v440_v36  ;;  %v444_v40 = vsub.f32 %v407_v24, %v440_v36 }
  0xd5   :  { %v445_v41 = vmul.f32 %v441_v37, %v441_v37  ;;  %v446_v42 = vmul.f32 %v442_v38, %v442_v38  ;;  %v447_v43 = vmul.f32 %v443_v39, %v443_v39  ;;  %v448_v45 = vmul.f32 %v444_v40, %v444_v40 }
  0xd7   :  { %v449_v44 = vadd.f32 %v446_v42, %v445_v41 }
  0xd9   :  { %v450_v46 = vadd.f32 %v449_v44, %v447_v43 }
  0xdb   :  { %v451_v47 = vadd.f32 %v450_v46, %v448_v45 }
  0xdd   :  { %v452_v48 = vrot.slane %v451_v47, 4 }
  0xdf   :  { %v453_v49 = vadd.f32 %v452_v48, %v451_v47 }
  0xe1   :  { %v454_v50 = vrot.slane %v453_v49, 2 }
  0xe3   :  { %v455_v51 = vadd.f32 %v454_v50, %v453_v49 }
  0xe5   :  { %v456_v52 = vrot.slane %v455_v51, 1 }
  0xe7   :  { %v457_v53 = vadd.f32 %v456_v52, %v455_v51 }
  0xe9   :  { %v458_v54 = vmul.f32 %v457_v53, %v439_v34 }
  0xeb   :  { %v459_v55 = vadd.f32 1e-05, %v458_v54 }
  0xed   :  { %707 = vrsqrt.f32 %v459_v55  ;;  %vm466_vm2 = vweird.f32 %v459_v55 }
  0xf3   :  { %v708_v56 = vpop.eup %707 }
  0xf4   :  { %v461_v57 = vmul.f32 %v708_v56, %v459_v55  ;;  %vm467_vm1 = vweird.f32 %v708_v56 }
  0xf5   :  { %vm468_vm3 = vmor %vm466_vm2, %vm467_vm1 }
  0xf6   :  { %v462_v58 = vmul.f32 %v708_v56, %v461_v57 }
  0xf8   :  { %v463_v59 = vmul.f32 0.5, %v462_v58 }
  0xfa   :  { %v464_v60 = vsub.f32 1.5, %v463_v59 }
  0xfc   :  { %v465_v61 = vmul.f32 %v708_v56, %v464_v60 }
  0xfe   :  { %v469_v63 = vsel %vm468_vm3, %v708_v56, %v465_v61 }
  0xff   :  { %v470_v0 = vmul.f32 %v469_v63, %v441_v37  ;;  %v471_v1 = vmul.f32 %v469_v63, %v442_v38  ;;  %v472_v2 = vmul.f32 %v469_v63, %v443_v39  ;;  %v473_v3 = vmul.f32 %v469_v63, %v444_v40 }
 0x101   :  { %v478_v5 = vmul.f32 %v703_v62, %v470_v0  ;;  %v479_v6 = vmul.f32 %v703_v62, %v471_v1  ;;  %v480_v7 = vmul.f32 %v703_v62, %v472_v2  ;;  %v481_v8 = vmul.f32 %v703_v62, %v473_v3 }
 0x103   :  { %v486_v9 = vadd.f32 %v704_v4, %v478_v5  ;;  %v487_v10 = vadd.f32 %v704_v4, %v479_v6  ;;  %v488_v11 = vadd.f32 %v704_v4, %v480_v7  ;;  %v489_v12 = vadd.f32 %v704_v4, %v481_v8 }
 0x105   :  { %v490_v13 = vmax.f32 %v486_v9, 0.0  ;;  %v491_v14 = vmax.f32 %v487_v10, 0.0  ;;  %v492_v15 = vmax.f32 %v488_v11, 0.0  ;;  %v493_v16 = vmax.f32 %v489_v12, 0.0 }
 0x107   :  { %494 = vst [vmem:[%s901_s4] sm:$0xff] %v490_v13 }
 0x108   :  { %495 = vst [vmem:[%s901_s4 + $0x8] sm:$0xff] %v491_v14 }
 0x109   :  { %496 = vst [vmem:[%s901_s4 + $0x10] sm:$0xff] %v492_v15 }
 0x10a   :  { %497 = vst [vmem:[%s901_s4 + $0x18] sm:$0xff] %v493_v16 }

</bundles_post_ra>
